<compile_context>
chip_gen: v7x
topology: tpu7x:2x2x1
jax: 0.10.0
libtpu: 0.0.40
codegen_flags: <defaults>
</compile_context>

<pallas_src>
import functools
import numpy as np

import jax
import jax.numpy as jnp
from jax import lax
from jax.experimental import pallas as pl
from jax.experimental.pallas import tpu as pltpu


def _vmem_limit_bytes():
    """~3/4 of physical VMEM, capped at 100 MiB (v7x: 48 MiB, v5e/v6e: 96 MiB)."""
    cap = 128 * 1024 * 1024
    try:
        cap = int(getattr(pltpu.get_tpu_info(), "vmem_capacity_bytes", cap))
    except Exception:
        pass
    return min((cap * 3) // 4, 100 * 1024 * 1024)


# ----------------------------------------------------------------------------
# Fused Pallas kernel: input conv + LeakyReLU + num_blocks residual blocks
# ----------------------------------------------------------------------------
def _stack_kernel(xc_ref, win_ref, bin_ref, w1_ref, b1_ref, w2_ref, b2_ref,
                  o_ref, feat_pad, tmp_pad, *, H, W, C, num_blocks):
    """Grid = (batch, block).  One residual block per grid step; the C-channel
    feature stays resident in `feat_pad` (with a zero 1-px halo) across the
    whole block axis.

    xc_ref   : (H*W, 9*Cin) bf16  wrapper-side im2col of the module input
    win_ref  : (9*Cin, C)   bf16  input-conv weight, taps packed along K
    bin_ref  : (1, C)       f32
    w1_ref   : (9*C, C)     bf16  conv1 of block j (streamed per grid step)
    b1_ref   : (1, C)       f32
    w2_ref   : (9*C, C)     bf16  conv2 of block j (streamed per grid step)
    b2_ref   : (1, C)       f32
    o_ref    : (H, W, C)    f32   written only on the last block step
    feat_pad : (H+2, W+2, C) f32  VMEM scratch - feature with zero halo
    tmp_pad  : (H+2, W+2, C) f32  VMEM scratch - relu(conv1) with zero halo
    """
    j = pl.program_id(1)
    HW = H * W

    @pl.when(j == 0)
    def _init():
        # Zero only the 1-px halo strips (the interior is fully overwritten
        # every layer; no layer ever writes the halo, so it stays zero).
        zrow = jnp.zeros((1, W + 2, C), jnp.float32)
        zcol = jnp.zeros((H, 1, C), jnp.float32)
        for buf in (feat_pad, tmp_pad):
            buf[0:1, :, :] = zrow
            buf[H + 1:H + 2, :, :] = zrow
            buf[1:H + 1, 0:1, :] = zcol
            buf[1:H + 1, W + 1:W + 2, :] = zcol
        # Input conv: single K = 9*Cin matmul (im2col done in the wrapper),
        # then LeakyReLU(0.1).
        acc = jnp.dot(xc_ref[...], win_ref[...],
                      preferred_element_type=jnp.float32) + bin_ref[...]
        acc = jnp.where(acc >= 0.0, acc, 0.1 * acc)
        feat_pad[1:H + 1, 1:W + 1, :] = acc.reshape(H, W, C)

    def packed_conv(src_pad, w_bf16, b_f32):
        # 9 shifted windows, cast per-tap to bf16, packed along the MXU
        # contraction axis -> one deep (HW, 9C) @ (9C, C) matmul, f32 acc.
        # TODO(synk): for production resolutions (e.g. 180x320) strip-tile
        # this slab over row bands and move the dx shifts to pltpu.roll /
        # a lane-dense (H, W*C) resident layout to relieve relayout/vst
        # pressure and fit v7x's 64 MiB VMEM.
        cols = [src_pad[dy:dy + H, dx:dx + W, :]
                .reshape(HW, C).astype(jnp.bfloat16)
                for dy in range(3) for dx in range(3)]
        slab = jnp.concatenate(cols, axis=-1)                    # (HW, 9C) bf16
        return jnp.dot(slab, w_bf16, preferred_element_type=jnp.float32) + b_f32

    # Residual block j:  x + conv2(relu(conv1(x)))
    t = jnp.maximum(packed_conv(feat_pad, w1_ref[...], b1_ref[...]), 0.0)
    tmp_pad[1:H + 1, 1:W + 1, :] = t.reshape(H, W, C)
    delta = packed_conv(tmp_pad, w2_ref[...], b2_ref[...])
    feat_pad[1:H + 1, 1:W + 1, :] = (
        feat_pad[1:H + 1, 1:W + 1, :] + delta.reshape(H, W, C))

    @pl.when(j == num_blocks - 1)
    def _finalize():
        o_ref[...] = feat_pad[1:H + 1, 1:W + 1, :].astype(o_ref.dtype)


@functools.lru_cache(maxsize=None)
def _get_stack_call(n, H, W, Cin, C, num_blocks):
    kernel = functools.partial(_stack_kernel, H=H, W=W, C=C,
                               num_blocks=num_blocks)
    HW = H * W
    return pl.pallas_call(
        kernel,
        out_shape=jax.ShapeDtypeStruct((n, H, W, C), jnp.float32),
        grid_spec=pltpu.PrefetchScalarGridSpec(
            num_scalar_prefetch=0,
            grid=(n, num_blocks),
            in_specs=[
                # im2col'd module input: re-fetched only when the batch index
                # changes (constant block index across the block axis).
                pl.BlockSpec((None, HW, 9 * Cin), lambda i, j: (i, 0, 0)),
                pl.BlockSpec((9 * Cin, C), lambda i, j: (0, 0)),
                pl.BlockSpec((1, C), lambda i, j: (0, 0)),
                # Per-block weights/biases streamed along the block axis.
                pl.BlockSpec((None, 9 * C, C), lambda i, j: (j, 0, 0)),
                pl.BlockSpec((None, 1, C), lambda i, j: (j, 0, 0)),
                pl.BlockSpec((None, 9 * C, C), lambda i, j: (j, 0, 0)),
                pl.BlockSpec((None, 1, C), lambda i, j: (j, 0, 0)),
            ],
            out_specs=pl.BlockSpec((None, H, W, C), lambda i, j: (i, 0, 0, 0)),
            scratch_shapes=[
                pltpu.VMEM((H + 2, W + 2, C), jnp.float32),   # feature (+halo)
                pltpu.VMEM((H + 2, W + 2, C), jnp.float32),   # relu(conv1) (+halo)
            ],
        ),
        compiler_params=pltpu.CompilerParams(
            dimension_semantics=("parallel", "arbitrary"),  # batch -> both TCs
            vmem_limit_bytes=_vmem_limit_bytes(),
        ),
    )


# ----------------------------------------------------------------------------
# Parameters (packed for the kernel: taps along the contraction axis, bf16)
# ----------------------------------------------------------------------------
def init_params(key, in_channels, mid_channels=64, num_blocks=5):
    keys = jax.random.split(key, 2 + 4 * num_blocks)
    it = iter(keys)

    def conv_w(k, cin, cout):
        return jax.random.normal(k, (3, 3, cin, cout), jnp.float32) / np.sqrt(9.0 * cin)

    def conv_b(k, cout):
        return jax.random.normal(k, (cout,), jnp.float32) * 0.01

    w_in = conv_w(next(it), in_channels, mid_channels)
    b_in = conv_b(next(it), mid_channels)
    w1 = jnp.stack([conv_w(next(it), mid_channels, mid_channels) for _ in range(num_blocks)])
    b1 = jnp.stack([conv_b(next(it), mid_channels) for _ in range(num_blocks)])
    w2 = jnp.stack([conv_w(next(it), mid_channels, mid_channels) for _ in range(num_blocks)])
    b2 = jnp.stack([conv_b(next(it), mid_channels) for _ in range(num_blocks)])

    return {
        # input conv: taps packed along K -> (9*Cin, C), bf16 for the MXU
        "w_in": w_in.reshape(9 * in_channels, mid_channels).astype(jnp.bfloat16),
        "b_in": b_in.reshape(1, mid_channels),
        # residual blocks: taps packed along K -> (9*C, C), stacked per block
        "w1": w1.reshape(num_blocks, 9 * mid_channels, mid_channels).astype(jnp.bfloat16),
        "b1": b1.reshape(num_blocks, 1, mid_channels),
        "w2": w2.reshape(num_blocks, 9 * mid_channels, mid_channels).astype(jnp.bfloat16),
        "b2": b2.reshape(num_blocks, 1, mid_channels),
    }


# ----------------------------------------------------------------------------
# Forward (PyTorch semantics: dict in, dict out, NCHW layout for 'x')
# ----------------------------------------------------------------------------
@jax.jit
def _forward_x(params, x_nchw):
    n, cin, H, W = x_nchw.shape
    C = params["b_in"].shape[-1]
    num_blocks = params["w1"].shape[0]
    x = jnp.transpose(x_nchw.astype(jnp.float32), (0, 2, 3, 1))       # -> NHWC
    xp = jnp.pad(x, ((0, 0), (1, 1), (1, 1), (0, 0)))
    # Wrapper-side im2col for the input conv (avoids the Cin=4 lane-starved
    # path inside the kernel): (n, H*W, 9*Cin), tap order (dy, dx) row-major.
    cols = [xp[:, dy:dy + H, dx:dx + W, :].reshape(n, H * W, cin)
            for dy in range(3) for dx in range(3)]
    x_cols = jnp.concatenate(cols, axis=-1).astype(jnp.bfloat16)
    out = _get_stack_call(n, H, W, cin, C, num_blocks)(
        x_cols, params["w_in"], params["b_in"],
        params["w1"], params["b1"], params["w2"], params["b2"])
    return jnp.transpose(out, (0, 3, 1, 2))                           # -> NCHW


def residual_blocks_with_input_conv_dynamic(params, feat):
    """feat: dict with 'x' of shape (n, in_channels, H, W); 'x' is replaced."""
    # TODO(synk): ResidualBlockNoBNDynamic's dynamic/expert branches
    # (num_experts, with_se, gaintune, ...) are not defined in the provided
    # source; the standard ResidualBlockNoBN (conv-relu-conv + identity)
    # semantics are implemented and extra dict entries pass through untouched.
    out = dict(feat)
    out["x"] = _forward_x(params, feat["x"])
    return out


# ----------------------------------------------------------------------------
# Pure-JAX reference (f32 convs, same bf16-rounded weights) for validation
# ----------------------------------------------------------------------------
def _reference_forward(params, x_nchw):
    C = params["b_in"].shape[-1]
    x = jnp.transpose(x_nchw.astype(jnp.float32), (0, 2, 3, 1))
    dn = lax.conv_dimension_numbers(x.shape, (3, 3, x.shape[-1], C),
                                    ("NHWC", "HWIO", "NHWC"))

    def conv(v, w, b):
        y = lax.conv_general_dilated(v, w.astype(jnp.float32), (1, 1), "SAME",
                                     dimension_numbers=dn,
                                     precision=lax.Precision.HIGHEST)
        return y + b.reshape(1, 1, 1, -1)

    w_in = params["w_in"].reshape(3, 3, -1, C)
    f = conv(x, w_in, params["b_in"])
    f = jnp.where(f >= 0.0, f, 0.1 * f)
    for k in range(params["w1"].shape[0]):
        w1 = params["w1"][k].reshape(3, 3, C, C)
        w2 = params["w2"][k].reshape(3, 3, C, C)
        t = jnp.maximum(conv(f, w1, params["b1"][k]), 0.0)
        f = f + conv(t, w2, params["b2"][k])
    return jnp.transpose(f, (0, 3, 1, 2))


# ----------------------------------------------------------------------------
if __name__ == "__main__":
    key = jax.random.PRNGKey(0)
    kp, kx = jax.random.split(key)

    # Small demo shapes (module defaults are mid=64, num_blocks=30).
    # n >= 2 so the "parallel" batch axis can feed both TensorCores on v7x.
    n, in_channels, H, W = 2, 4, 16, 16
    mid_channels, num_blocks = 64, 5

    params = init_params(kp, in_channels, mid_channels, num_blocks)
    x = jax.random.normal(kx, (n, in_channels, H, W), jnp.float32)
    feat = {"x": x}

    out = residual_blocks_with_input_conv_dynamic(params, feat)
    out_x = jax.block_until_ready(out["x"])
    assert out_x.shape == (n, mid_channels, H, W), out_x.shape
    assert bool(jnp.all(jnp.isfinite(out_x)))

    # Loose numerical check (kernel casts activations to bf16 at the matmuls).
    ref = jax.block_until_ready(_reference_forward(params, x))
    max_err = float(jnp.max(jnp.abs(out_x - ref)))
    scale = float(jnp.max(jnp.abs(ref)))
    assert max_err <= 0.08 * max(scale, 1.0) + 0.1, (max_err, scale)

    print("KERNEL_OK")
</pallas_src>

<mosaic_0001>
module attributes {stable_mosaic.version = 11 : i64} {
  func.func @_stack_kernel(%arg0: i32, %arg1: i32, %arg2: memref<1x256x36xbf16, #tpu.memory_space<vmem>>, %arg3: memref<36x64xbf16, #tpu.memory_space<vmem>>, %arg4: memref<1x64xf32, #tpu.memory_space<vmem>>, %arg5: memref<1x576x64xbf16, #tpu.memory_space<vmem>>, %arg6: memref<1x1x64xf32, #tpu.memory_space<vmem>>, %arg7: memref<1x576x64xbf16, #tpu.memory_space<vmem>>, %arg8: memref<1x1x64xf32, #tpu.memory_space<vmem>>, %arg9: memref<1x16x16x64xf32, #tpu.memory_space<vmem>>, %arg10: memref<18x18x64xf32, #tpu.memory_space<vmem>>, %arg11: memref<18x18x64xf32, #tpu.memory_space<vmem>>) attributes {dimension_semantics = [#tpu.dimension_semantics<parallel>, #tpu.dimension_semantics<arbitrary>], iteration_bounds = array<i64: 2, 5>, scalar_prefetch = 0 : i64, scratch_operands = 2 : i64, tpu.core_type = #tpu.core_type<tc>, window_params = [{transform_indices = @transform_0, window_bounds = array<i64: 1, 256, 36>}, {pipeline_mode = #tpu.pipeline_mode<synchronous>, transform_indices = @transform_1, window_bounds = array<i64: 36, 64>}, {pipeline_mode = #tpu.pipeline_mode<synchronous>, transform_indices = @transform_2, window_bounds = array<i64: 1, 64>}, {transform_indices = @transform_3, window_bounds = array<i64: 1, 576, 64>}, {transform_indices = @transform_4, window_bounds = array<i64: 1, 1, 64>}, {transform_indices = @transform_5, window_bounds = array<i64: 1, 576, 64>}, {transform_indices = @transform_6, window_bounds = array<i64: 1, 1, 64>}, {transform_indices = @transform_7, window_bounds = array<i64: 1, 16, 16, 64>}]} {
    %c0_i32 = arith.constant 0 : i32
    %0 = arith.cmpi eq, %arg1, %c0_i32 : i32
    %1 = arith.extui %0 : i1 to i32
    %c0_i32_0 = arith.constant 0 : i32
    %2 = arith.cmpi ne, %1, %c0_i32_0 : i32
    scf.if %2 {
      %cst_76 = arith.constant 0.000000e+00 : f32
      %84 = vector.broadcast %cst_76 : f32 to vector<1x18x64xf32>
      %cst_77 = arith.constant 0.000000e+00 : f32
      %85 = vector.broadcast %cst_77 : f32 to vector<16x1x64xf32>
      %c0_78 = arith.constant 0 : index
      %c0_79 = arith.constant 0 : index
      %c0_80 = arith.constant 0 : index
      %86 = vector.load %arg10[%c0_78, %c0_79, %c0_80] : memref<18x18x64xf32, #tpu.memory_space<vmem>>, vector<1x18x64xf32>
      tpu.vector_store %arg10[%c0_78, %c0_79, %c0_80], %84 {strides = array<i32>} : memref<18x18x64xf32, #tpu.memory_space<vmem>>, vector<1x18x64xf32>,
      %c17 = arith.constant 17 : index
      %c0_81 = arith.constant 0 : index
      %c0_82 = arith.constant 0 : index
      %87 = vector.load %arg10[%c17, %c0_81, %c0_82] : memref<18x18x64xf32, #tpu.memory_space<vmem>>, vector<1x18x64xf32>
      tpu.vector_store %arg10[%c17, %c0_81, %c0_82], %84 {strides = array<i32>} : memref<18x18x64xf32, #tpu.memory_space<vmem>>, vector<1x18x64xf32>,
      %c1_83 = arith.constant 1 : index
      %c0_84 = arith.constant 0 : index
      %c0_85 = arith.constant 0 : index
      %88 = vector.load %arg10[%c1_83, %c0_84, %c0_85] : memref<18x18x64xf32, #tpu.memory_space<vmem>>, vector<16x1x64xf32>
      tpu.vector_store %arg10[%c1_83, %c0_84, %c0_85], %85 {strides = array<i32>} : memref<18x18x64xf32, #tpu.memory_space<vmem>>, vector<16x1x64xf32>,
      %c1_86 = arith.constant 1 : index
      %c17_87 = arith.constant 17 : index
      %c0_88 = arith.constant 0 : index
      %89 = vector.load %arg10[%c1_86, %c17_87, %c0_88] : memref<18x18x64xf32, #tpu.memory_space<vmem>>, vector<16x1x64xf32>
      tpu.vector_store %arg10[%c1_86, %c17_87, %c0_88], %85 {strides = array<i32>} : memref<18x18x64xf32, #tpu.memory_space<vmem>>, vector<16x1x64xf32>,
      %c0_89 = arith.constant 0 : index
      %c0_90 = arith.constant 0 : index
      %c0_91 = arith.constant 0 : index
      %90 = vector.load %arg11[%c0_89, %c0_90, %c0_91] : memref<18x18x64xf32, #tpu.memory_space<vmem>>, vector<1x18x64xf32>
      tpu.vector_store %arg11[%c0_89, %c0_90, %c0_91], %84 {strides = array<i32>} : memref<18x18x64xf32, #tpu.memory_space<vmem>>, vector<1x18x64xf32>,
      %c17_92 = arith.constant 17 : index
      %c0_93 = arith.constant 0 : index
      %c0_94 = arith.constant 0 : index
      %91 = vector.load %arg11[%c17_92, %c0_93, %c0_94] : memref<18x18x64xf32, #tpu.memory_space<vmem>>, vector<1x18x64xf32>
      tpu.vector_store %arg11[%c17_92, %c0_93, %c0_94], %84 {strides = array<i32>} : memref<18x18x64xf32, #tpu.memory_space<vmem>>, vector<1x18x64xf32>,
      %c1_95 = arith.constant 1 : index
      %c0_96 = arith.constant 0 : index
      %c0_97 = arith.constant 0 : index
      %92 = vector.load %arg11[%c1_95, %c0_96, %c0_97] : memref<18x18x64xf32, #tpu.memory_space<vmem>>, vector<16x1x64xf32>
      tpu.vector_store %arg11[%c1_95, %c0_96, %c0_97], %85 {strides = array<i32>} : memref<18x18x64xf32, #tpu.memory_space<vmem>>, vector<16x1x64xf32>,
      %c1_98 = arith.constant 1 : index
      %c17_99 = arith.constant 17 : index
      %c0_100 = arith.constant 0 : index
      %93 = vector.load %arg11[%c1_98, %c17_99, %c0_100] : memref<18x18x64xf32, #tpu.memory_space<vmem>>, vector<16x1x64xf32>
      tpu.vector_store %arg11[%c1_98, %c17_99, %c0_100], %85 {strides = array<i32>} : memref<18x18x64xf32, #tpu.memory_space<vmem>>, vector<16x1x64xf32>,
      %c0_101 = arith.constant 0 : index
      %c0_102 = arith.constant 0 : index
      %c0_103 = arith.constant 0 : index
      %94 = vector.load %arg2[%c0_101, %c0_102, %c0_103] : memref<1x256x36xbf16, #tpu.memory_space<vmem>>, vector<1x256x36xbf16>
      %95 = vector.shape_cast %94 : vector<1x256x36xbf16> to vector<256x36xbf16>
      %c0_104 = arith.constant 0 : index
      %c0_105 = arith.constant 0 : index
      %96 = vector.load %arg3[%c0_104, %c0_105] : memref<36x64xbf16, #tpu.memory_space<vmem>>, vector<36x64xbf16>
      %cst_106 = arith.constant dense<0.000000e+00> : vector<256x64xf32>
      %97 = tpu.matmul %95, %96, %cst_106 {dimension_numbers = #tpu.dot_dimension_numbers<[1], [0], [0], [1], [0, 0, 1, 1], [], []>} : vector<256x36xbf16>, vector<36x64xbf16>, vector<256x64xf32> -> vector<256x64xf32>
      %c0_107 = arith.constant 0 : index
      %c0_108 = arith.constant 0 : index
      %98 = vector.load %arg4[%c0_107, %c0_108] : memref<1x64xf32, #tpu.memory_space<vmem>>, vector<1x64xf32>
      %99 = vector.broadcast %98 : vector<1x64xf32> to vector<256x64xf32>
      %100 = arith.addf %97, %99 : vector<256x64xf32>
      %cst_109 = arith.constant 0.000000e+00 : f32
      %101 = vector.broadcast %cst_109 : f32 to vector<256x64xf32>
      %102 = arith.cmpf oge, %100, %101 : vector<256x64xf32>
      %cst_110 = arith.constant 1.000000e-01 : f32
      %103 = vector.broadcast %cst_110 : f32 to vector<256x64xf32>
      %104 = arith.mulf %103, %100 : vector<256x64xf32>
      %105 = arith.select %102, %100, %104 : vector<256x64xi1>, vector<256x64xf32>
      %106 = vector.shape_cast %105 : vector<256x64xf32> to vector<16x16x64xf32>
      %c1_111 = arith.constant 1 : index
      %c1_112 = arith.constant 1 : index
      %c0_113 = arith.constant 0 : index
      %107 = vector.load %arg10[%c1_111, %c1_112, %c0_113] : memref<18x18x64xf32, #tpu.memory_space<vmem>>, vector<16x16x64xf32>
      tpu.vector_store %arg10[%c1_111, %c1_112, %c0_113], %106 {strides = array<i32>} : memref<18x18x64xf32, #tpu.memory_space<vmem>>, vector<16x16x64xf32>,
    } else {
    }
    %c0 = arith.constant 0 : index
    %c0_1 = arith.constant 0 : index
    %c0_2 = arith.constant 0 : index
    %3 = vector.load %arg5[%c0, %c0_1, %c0_2] : memref<1x576x64xbf16, #tpu.memory_space<vmem>>, vector<1x576x64xbf16>
    %4 = vector.shape_cast %3 : vector<1x576x64xbf16> to vector<576x64xbf16>
    %c0_3 = arith.constant 0 : index
    %c0_4 = arith.constant 0 : index
    %c0_5 = arith.constant 0 : index
    %5 = vector.load %arg6[%c0_3, %c0_4, %c0_5] : memref<1x1x64xf32, #tpu.memory_space<vmem>>, vector<1x1x64xf32>
    %6 = vector.shape_cast %5 : vector<1x1x64xf32> to vector<1x64xf32>
    %c0_6 = arith.constant 0 : index
    %c0_7 = arith.constant 0 : index
    %c0_8 = arith.constant 0 : index
    %7 = vector.load %arg10[%c0_6, %c0_7, %c0_8] : memref<18x18x64xf32, #tpu.memory_space<vmem>>, vector<16x16x64xf32>
    %8 = vector.shape_cast %7 : vector<16x16x64xf32> to vector<256x64xf32>
    %9 = arith.truncf %8 : vector<256x64xf32> to vector<256x64xbf16>
    %c0_9 = arith.constant 0 : index
    %c1 = arith.constant 1 : index
    %c0_10 = arith.constant 0 : index
    %10 = vector.load %arg10[%c0_9, %c1, %c0_10] : memref<18x18x64xf32, #tpu.memory_space<vmem>>, vector<16x16x64xf32>
    %11 = vector.shape_cast %10 : vector<16x16x64xf32> to vector<256x64xf32>
    %12 = arith.truncf %11 : vector<256x64xf32> to vector<256x64xbf16>
    %c0_11 = arith.constant 0 : index
    %c2 = arith.constant 2 : index
    %c0_12 = arith.constant 0 : index
    %13 = vector.load %arg10[%c0_11, %c2, %c0_12] : memref<18x18x64xf32, #tpu.memory_space<vmem>>, vector<16x16x64xf32>
    %14 = vector.shape_cast %13 : vector<16x16x64xf32> to vector<256x64xf32>
    %15 = arith.truncf %14 : vector<256x64xf32> to vector<256x64xbf16>
    %c1_13 = arith.constant 1 : index
    %c0_14 = arith.constant 0 : index
    %c0_15 = arith.constant 0 : index
    %16 = vector.load %arg10[%c1_13, %c0_14, %c0_15] : memref<18x18x64xf32, #tpu.memory_space<vmem>>, vector<16x16x64xf32>
    %17 = vector.shape_cast %16 : vector<16x16x64xf32> to vector<256x64xf32>
    %18 = arith.truncf %17 : vector<256x64xf32> to vector<256x64xbf16>
    %c1_16 = arith.constant 1 : index
    %c1_17 = arith.constant 1 : index
    %c0_18 = arith.constant 0 : index
    %19 = vector.load %arg10[%c1_16, %c1_17, %c0_18] : memref<18x18x64xf32, #tpu.memory_space<vmem>>, vector<16x16x64xf32>
    %20 = vector.shape_cast %19 : vector<16x16x64xf32> to vector<256x64xf32>
    %21 = arith.truncf %20 : vector<256x64xf32> to vector<256x64xbf16>
    %c1_19 = arith.constant 1 : index
    %c2_20 = arith.constant 2 : index
    %c0_21 = arith.constant 0 : index
    %22 = vector.load %arg10[%c1_19, %c2_20, %c0_21] : memref<18x18x64xf32, #tpu.memory_space<vmem>>, vector<16x16x64xf32>
    %23 = vector.shape_cast %22 : vector<16x16x64xf32> to vector<256x64xf32>
    %24 = arith.truncf %23 : vector<256x64xf32> to vector<256x64xbf16>
    %c2_22 = arith.constant 2 : index
    %c0_23 = arith.constant 0 : index
    %c0_24 = arith.constant 0 : index
    %25 = vector.load %arg10[%c2_22, %c0_23, %c0_24] : memref<18x18x64xf32, #tpu.memory_space<vmem>>, vector<16x16x64xf32>
    %26 = vector.shape_cast %25 : vector<16x16x64xf32> to vector<256x64xf32>
    %27 = arith.truncf %26 : vector<256x64xf32> to vector<256x64xbf16>
    %c2_25 = arith.constant 2 : index
    %c1_26 = arith.constant 1 : index
    %c0_27 = arith.constant 0 : index
    %28 = vector.load %arg10[%c2_25, %c1_26, %c0_27] : memref<18x18x64xf32, #tpu.memory_space<vmem>>, vector<16x16x64xf32>
    %29 = vector.shape_cast %28 : vector<16x16x64xf32> to vector<256x64xf32>
    %30 = arith.truncf %29 : vector<256x64xf32> to vector<256x64xbf16>
    %c2_28 = arith.constant 2 : index
    %c2_29 = arith.constant 2 : index
    %c0_30 = arith.constant 0 : index
    %31 = vector.load %arg10[%c2_28, %c2_29, %c0_30] : memref<18x18x64xf32, #tpu.memory_space<vmem>>, vector<16x16x64xf32>
    %32 = vector.shape_cast %31 : vector<16x16x64xf32> to vector<256x64xf32>
    %33 = arith.truncf %32 : vector<256x64xf32> to vector<256x64xbf16>
    %34 = tpu.concatenate %9, %12, %15, %18, %21, %24, %27, %30, %33 in 1 : vector<256x64xbf16>, vector<256x64xbf16>, vector<256x64xbf16>, vector<256x64xbf16>, vector<256x64xbf16>, vector<256x64xbf16>, vector<256x64xbf16>, vector<256x64xbf16>, vector<256x64xbf16> -> vector<256x576xbf16>
    %cst = arith.constant dense<0.000000e+00> : vector<256x64xf32>
    %35 = tpu.matmul %34, %4, %cst {dimension_numbers = #tpu.dot_dimension_numbers<[1], [0], [0], [1], [0, 0, 1, 1], [], []>} : vector<256x576xbf16>, vector<576x64xbf16>, vector<256x64xf32> -> vector<256x64xf32>
    %36 = vector.broadcast %6 : vector<1x64xf32> to vector<256x64xf32>
    %37 = arith.addf %35, %36 : vector<256x64xf32>
    %cst_31 = arith.constant 0.000000e+00 : f32
    %38 = vector.broadcast %cst_31 : f32 to vector<256x64xf32>
    %39 = arith.maximumf %37, %38 : vector<256x64xf32>
    %40 = vector.shape_cast %39 : vector<256x64xf32> to vector<16x16x64xf32>
    %c1_32 = arith.constant 1 : index
    %c1_33 = arith.constant 1 : index
    %c0_34 = arith.constant 0 : index
    %41 = vector.load %arg11[%c1_32, %c1_33, %c0_34] : memref<18x18x64xf32, #tpu.memory_space<vmem>>, vector<16x16x64xf32>
    tpu.vector_store %arg11[%c1_32, %c1_33, %c0_34], %40 {strides = array<i32>} : memref<18x18x64xf32, #tpu.memory_space<vmem>>, vector<16x16x64xf32>,
    %c0_35 = arith.constant 0 : index
    %c0_36 = arith.constant 0 : index
    %c0_37 = arith.constant 0 : index
    %42 = vector.load %arg7[%c0_35, %c0_36, %c0_37] : memref<1x576x64xbf16, #tpu.memory_space<vmem>>, vector<1x576x64xbf16>
    %43 = vector.shape_cast %42 : vector<1x576x64xbf16> to vector<576x64xbf16>
    %c0_38 = arith.constant 0 : index
    %c0_39 = arith.constant 0 : index
    %c0_40 = arith.constant 0 : index
    %44 = vector.load %arg8[%c0_38, %c0_39, %c0_40] : memref<1x1x64xf32, #tpu.memory_space<vmem>>, vector<1x1x64xf32>
    %45 = vector.shape_cast %44 : vector<1x1x64xf32> to vector<1x64xf32>
    %c0_41 = arith.constant 0 : index
    %c0_42 = arith.constant 0 : index
    %c0_43 = arith.constant 0 : index
    %46 = vector.load %arg11[%c0_41, %c0_42, %c0_43] : memref<18x18x64xf32, #tpu.memory_space<vmem>>, vector<16x16x64xf32>
    %47 = vector.shape_cast %46 : vector<16x16x64xf32> to vector<256x64xf32>
    %48 = arith.truncf %47 : vector<256x64xf32> to vector<256x64xbf16>
    %c0_44 = arith.constant 0 : index
    %c1_45 = arith.constant 1 : index
    %c0_46 = arith.constant 0 : index
    %49 = vector.load %arg11[%c0_44, %c1_45, %c0_46] : memref<18x18x64xf32, #tpu.memory_space<vmem>>, vector<16x16x64xf32>
    %50 = vector.shape_cast %49 : vector<16x16x64xf32> to vector<256x64xf32>
    %51 = arith.truncf %50 : vector<256x64xf32> to vector<256x64xbf16>
    %c0_47 = arith.constant 0 : index
    %c2_48 = arith.constant 2 : index
    %c0_49 = arith.constant 0 : index
    %52 = vector.load %arg11[%c0_47, %c2_48, %c0_49] : memref<18x18x64xf32, #tpu.memory_space<vmem>>, vector<16x16x64xf32>
    %53 = vector.shape_cast %52 : vector<16x16x64xf32> to vector<256x64xf32>
    %54 = arith.truncf %53 : vector<256x64xf32> to vector<256x64xbf16>
    %c1_50 = arith.constant 1 : index
    %c0_51 = arith.constant 0 : index
    %c0_52 = arith.constant 0 : index
    %55 = vector.load %arg11[%c1_50, %c0_51, %c0_52] : memref<18x18x64xf32, #tpu.memory_space<vmem>>, vector<16x16x64xf32>
    %56 = vector.shape_cast %55 : vector<16x16x64xf32> to vector<256x64xf32>
    %57 = arith.truncf %56 : vector<256x64xf32> to vector<256x64xbf16>
    %c1_53 = arith.constant 1 : index
    %c1_54 = arith.constant 1 : index
    %c0_55 = arith.constant 0 : index
    %58 = vector.load %arg11[%c1_53, %c1_54, %c0_55] : memref<18x18x64xf32, #tpu.memory_space<vmem>>, vector<16x16x64xf32>
    %59 = vector.shape_cast %58 : vector<16x16x64xf32> to vector<256x64xf32>
    %60 = arith.truncf %59 : vector<256x64xf32> to vector<256x64xbf16>
    %c1_56 = arith.constant 1 : index
    %c2_57 = arith.constant 2 : index
    %c0_58 = arith.constant 0 : index
    %61 = vector.load %arg11[%c1_56, %c2_57, %c0_58] : memref<18x18x64xf32, #tpu.memory_space<vmem>>, vector<16x16x64xf32>
    %62 = vector.shape_cast %61 : vector<16x16x64xf32> to vector<256x64xf32>
    %63 = arith.truncf %62 : vector<256x64xf32> to vector<256x64xbf16>
    %c2_59 = arith.constant 2 : index
    %c0_60 = arith.constant 0 : index
    %c0_61 = arith.constant 0 : index
    %64 = vector.load %arg11[%c2_59, %c0_60, %c0_61] : memref<18x18x64xf32, #tpu.memory_space<vmem>>, vector<16x16x64xf32>
    %65 = vector.shape_cast %64 : vector<16x16x64xf32> to vector<256x64xf32>
    %66 = arith.truncf %65 : vector<256x64xf32> to vector<256x64xbf16>
    %c2_62 = arith.constant 2 : index
    %c1_63 = arith.constant 1 : index
    %c0_64 = arith.constant 0 : index
    %67 = vector.load %arg11[%c2_62, %c1_63, %c0_64] : memref<18x18x64xf32, #tpu.memory_space<vmem>>, vector<16x16x64xf32>
    %68 = vector.shape_cast %67 : vector<16x16x64xf32> to vector<256x64xf32>
    %69 = arith.truncf %68 : vector<256x64xf32> to vector<256x64xbf16>
    %c2_65 = arith.constant 2 : index
    %c2_66 = arith.constant 2 : index
    %c0_67 = arith.constant 0 : index
    %70 = vector.load %arg11[%c2_65, %c2_66, %c0_67] : memref<18x18x64xf32, #tpu.memory_space<vmem>>, vector<16x16x64xf32>
    %71 = vector.shape_cast %70 : vector<16x16x64xf32> to vector<256x64xf32>
    %72 = arith.truncf %71 : vector<256x64xf32> to vector<256x64xbf16>
    %73 = tpu.concatenate %48, %51, %54, %57, %60, %63, %66, %69, %72 in 1 : vector<256x64xbf16>, vector<256x64xbf16>, vector<256x64xbf16>, vector<256x64xbf16>, vector<256x64xbf16>, vector<256x64xbf16>, vector<256x64xbf16>, vector<256x64xbf16>, vector<256x64xbf16> -> vector<256x576xbf16>
    %cst_68 = arith.constant dense<0.000000e+00> : vector<256x64xf32>
    %74 = tpu.matmul %73, %43, %cst_68 {dimension_numbers = #tpu.dot_dimension_numbers<[1], [0], [0], [1], [0, 0, 1, 1], [], []>} : vector<256x576xbf16>, vector<576x64xbf16>, vector<256x64xf32> -> vector<256x64xf32>
    %75 = vector.broadcast %45 : vector<1x64xf32> to vector<256x64xf32>
    %76 = arith.addf %74, %75 : vector<256x64xf32>
    %c1_69 = arith.constant 1 : index
    %c1_70 = arith.constant 1 : index
    %c0_71 = arith.constant 0 : index
    %77 = vector.load %arg10[%c1_69, %c1_70, %c0_71] : memref<18x18x64xf32, #tpu.memory_space<vmem>>, vector<16x16x64xf32>
    %78 = vector.shape_cast %76 : vector<256x64xf32> to vector<16x16x64xf32>
    %79 = arith.addf %77, %78 : vector<16x16x64xf32>
    %c1_72 = arith.constant 1 : index
    %c1_73 = arith.constant 1 : index
    %c0_74 = arith.constant 0 : index
    %80 = vector.load %arg10[%c1_72, %c1_73, %c0_74] : memref<18x18x64xf32, #tpu.memory_space<vmem>>, vector<16x16x64xf32>
    tpu.vector_store %arg10[%c1_72, %c1_73, %c0_74], %79 {strides = array<i32>} : memref<18x18x64xf32, #tpu.memory_space<vmem>>, vector<16x16x64xf32>,
    %c4_i32 = arith.constant 4 : i32
    %81 = arith.cmpi eq, %arg1, %c4_i32 : i32
    %82 = arith.extui %81 : i1 to i32
    %c0_i32_75 = arith.constant 0 : i32
    %83 = arith.cmpi ne, %82, %c0_i32_75 : i32
    scf.if %83 {
      %c1_76 = arith.constant 1 : index
      %c1_77 = arith.constant 1 : index
      %c0_78 = arith.constant 0 : index
      %84 = vector.load %arg10[%c1_76, %c1_77, %c0_78] : memref<18x18x64xf32, #tpu.memory_space<vmem>>, vector<16x16x64xf32>
      %c0_79 = arith.constant 0 : index
      %c0_80 = arith.constant 0 : index
      %c0_81 = arith.constant 0 : index
      %c0_82 = arith.constant 0 : index
      %85 = vector.load %arg9[%c0_79, %c0_80, %c0_81, %c0_82] : memref<1x16x16x64xf32, #tpu.memory_space<vmem>>, vector<1x16x16x64xf32>
      %86 = vector.shape_cast %85 : vector<1x16x16x64xf32> to vector<16x16x64xf32>
      %87 = vector.shape_cast %84 : vector<16x16x64xf32> to vector<1x16x16x64xf32>
      tpu.vector_store %arg9[%c0_79, %c0_80, %c0_81, %c0_82], %87 {strides = array<i32>} : memref<1x16x16x64xf32, #tpu.memory_space<vmem>>, vector<1x16x16x64xf32>,
    } else {
    }
    return
  }
  func.func @transform_0(%arg0: i32, %arg1: i32) -> (i32, i32, i32) {
    %c0_i32 = arith.constant 0 : i32
    %c0_i32_0 = arith.constant 0 : i32
    %c0_i32_1 = arith.constant 0 : i32
    return %arg0, %c0_i32, %c0_i32_0 : i32, i32, i32
  }
  func.func @transform_1(%arg0: i32, %arg1: i32) -> (i32, i32) {
    %c0_i32 = arith.constant 0 : i32
    %c0_i32_0 = arith.constant 0 : i32
    %c0_i32_1 = arith.constant 0 : i32
    return %c0_i32, %c0_i32_0 : i32, i32
  }
  func.func @transform_2(%arg0: i32, %arg1: i32) -> (i32, i32) {
    %c0_i32 = arith.constant 0 : i32
    %c0_i32_0 = arith.constant 0 : i32
    %c0_i32_1 = arith.constant 0 : i32
    return %c0_i32, %c0_i32_0 : i32, i32
  }
  func.func @transform_3(%arg0: i32, %arg1: i32) -> (i32, i32, i32) {
    %c0_i32 = arith.constant 0 : i32
    %c0_i32_0 = arith.constant 0 : i32
    %c0_i32_1 = arith.constant 0 : i32
    return %arg1, %c0_i32, %c0_i32_0 : i32, i32, i32
  }
  func.func @transform_4(%arg0: i32, %arg1: i32) -> (i32, i32, i32) {
    %c0_i32 = arith.constant 0 : i32
    %c0_i32_0 = arith.constant 0 : i32
    %c0_i32_1 = arith.constant 0 : i32
    return %arg1, %c0_i32, %c0_i32_0 : i32, i32, i32
  }
  func.func @transform_5(%arg0: i32, %arg1: i32) -> (i32, i32, i32) {
    %c0_i32 = arith.constant 0 : i32
    %c0_i32_0 = arith.constant 0 : i32
    %c0_i32_1 = arith.constant 0 : i32
    return %arg1, %c0_i32, %c0_i32_0 : i32, i32, i32
  }
  func.func @transform_6(%arg0: i32, %arg1: i32) -> (i32, i32, i32) {
    %c0_i32 = arith.constant 0 : i32
    %c0_i32_0 = arith.constant 0 : i32
    %c0_i32_1 = arith.constant 0 : i32
    return %arg1, %c0_i32, %c0_i32_0 : i32, i32, i32
  }
  func.func @transform_7(%arg0: i32, %arg1: i32) -> (i32, i32, i32, i32) {
    %c0_i32 = arith.constant 0 : i32
    %c0_i32_0 = arith.constant 0 : i32
    %c0_i32_1 = arith.constant 0 : i32
    %c0_i32_2 = arith.constant 0 : i32
    return %arg0, %c0_i32, %c0_i32_0, %c0_i32_1 : i32, i32, i32, i32
  }
}

</mosaic_0001>

<bundles_post_ra>
// kernel: _forward_x.1
= control target key start
LH: loop header
LB: loop body
LE: loop exit
PB: predicated region body
PF: predicated region fallthrough
CT: control target
= control target key end

     0   :  { %s8396_s0 = inlined_call_operand.hbm [shape: bf16[2,256,36], index: 0, kind: input, shape index: {}]   ;;  %s8397_s1 = inlined_call_operand.hbm [shape: bf16[36,64], index: 1, kind: input, shape index: {}]   ;;  %s8398_s2 = inlined_call_operand.hbm [shape: f32[1,64], index: 2, kind: input, shape index: {}]   ;;  %s8399_s3 = inlined_call_operand.hbm [shape: bf16[5,576,64], index: 3, kind: input, shape index: {}]   ;;  %s8400_s4 = inlined_call_operand.hbm [shape: f32[5,1,64], index: 4, kind: input, shape index: {}]   ;;  %s8401_s5 = inlined_call_operand.hbm [shape: bf16[5,576,64], index: 5, kind: input, shape index: {}]   ;;  %s8402_s6 = inlined_call_operand.hbm [shape: f32[5,1,64], index: 6, kind: input, shape index: {}]   ;;  %s8403_s7 = inlined_call_operand.hbm [shape: f32[2,16,16,64], index: 7, kind: output, shape index: {}]  }
   0x1   :  { %8436 = sst [smem:[#allocation33_spill]] %s8396_s0 }
   0x2   :  { %8437 = sst [smem:[#allocation34_spill]] %s8397_s1 }
   0x3   :  { %8438 = sst [smem:[#allocation35_spill]] %s8398_s2 }
   0x4   :  { %8439 = sst [smem:[#allocation36_spill]] %s8399_s3 }
   0x5   :  { %8440 = sst [smem:[#allocation37_spill]] %s8401_s5 }
   0x6   :  { %8441 = sst [smem:[#allocation38_spill]] %s8402_s6 }
   0x7   :  { %8442 = sst [smem:[#allocation39_spill]] %s8403_s7 }
   0x8   :  { %12 = vsyncpa [#allocation5], 0 }
   0x9   :  { %14 = vsyncpa [#allocation5 + $0x1], 0 }
   0xa   :  { %15 = vsyncpa [#allocation8], 0 }
   0xb   :  { %16 = vsyncpa [#allocation11], 0 }
   0xc   :  { %18 = vsyncpa [#allocation11 + $0x1], 0 }
   0xd   :  { %19 = vsyncpa [#allocation14], 0 }
   0xe   :  { %21 = vsyncpa [#allocation14 + $0x1], 0 }
   0xf   :  { %22 = vsyncpa [#allocation6], 0 }
  0x10   :  { %24 = vsyncpa [#allocation6 + $0x1], 0  ;;  %s6332_s24 = smov 0   ;;  %s6334_s25 = smov 0  }
  0x11   :  { %s6336_s26 = smov 0   ;;  %s6338_s27 = smov 0  }
  0x12   :  { %s6340_s28 = smov 0   ;;  %s6342_s29 = smov 0  }
  0x13   :  { %s6344_s30 = smov 0   ;;  %s6346_s8 = smov 0  }
  0x14   :  { %s6348_s9 = smov 0   ;;  %s6350_s10 = smov 0  }
  0x15   :  { %s6352_s11 = smov 0  }
  0x16 LB: > { %8443 = sst [smem:[#allocation22_spill]] %s6240_s25  ;;  %s6386_s12 = sadd.s32 4294967295, %s6276_s11   ;;  %s6276_s11 = sphi %s6352_s11, %s30_s11   ;;  %s6272_s10 = sphi %s6350_s10, %s8515_s10   ;;  %s6268_s9 = sphi %s6348_s9, %s8514_s9   ;;  %s6264_s8 = sphi %s6346_s8, %s8513_s8   ;;  %s6260_s30 = sphi %s6344_s30, %s8512_s30   ;;  %s6256_s29 = sphi %s6342_s29, %s8511_s29   ;;  %s6252_s28 = sphi %s6340_s28, %s8510_s28   ;;  %s6248_s27 = sphi %s6338_s27, %s8509_s27   ;;  %s6244_s26 = sphi %s6336_s26, %s8507_s26   ;;  %s6240_s25 = sphi %s6334_s25, %s8506_s25   ;;  %s6236_s24 = sphi %s6332_s24, %s8505_s24  }
  0x17   : > { %8444 = sst [smem:[#allocation23_spill]] %s6244_s26  ;;  %s4890_s13 = sadd.s32 4294967294, %s6276_s11  }
  0x18   : > { %8445 = sst [smem:[#allocation24_spill]] %s6248_s27  ;;  %p62_p0 = scmp.ne.s32.totalorder %s6252_s28, %s6248_s27 }
  0x19   : > { %8446 = sst [smem:[#allocation25_spill]] %s6260_s30  ;;  %p8407_p1 = scmp.eq.s32.totalorder %s6386_s12, 0 }
  0x1a   : > { %8447 = sst [smem:[#allocation26_spill]] %s6264_s8  ;;  %p130_p2 = scmp.ne.s32.totalorder %s6240_s25, %s6236_s24 }
  0x1b   : > { %p6396_p4 = por %p8407_p1, %p62_p0  ;;  %p238_p5 = scmp.eq.s32.totalorder %s4890_s13, 9 }
  0x1c   : > { %p6402_p6 = por %p130_p2, %p8407_p1  ;;  %p4891_p7 = scmp.ge.s32.totalorder %s6276_s11, 1 }
  0x1d   : > { %s8448_s14 = scalar_select %p6396_p4, 1, 0 }
  0x1e   : > { %s8450_s15 = scalar_select %p6402_p6, 1, 0 }
  0x1f   : > { %8449 = sst [smem:[#allocation27_spill]] %s8448_s14  ;;  %p6407_p8 = por %p238_p5, %p62_p0 }
  0x20   : > { %8451 = sst [smem:[#allocation28_spill]] %s8450_s15  ;;  %p245_p9 = scmp.lt.s32.totalorder %s6276_s11, 11 }
  0x21   : > { %s8452_s16 = scalar_select %p6407_p8, 1, 0 }
  0x22   : > { %p6412_p10 = pnand %p4891_p7, %p245_p9  ;;  %s6278_s18 = smov [#allocation7]  }
  0x23   : > { %8453 = sst [smem:[#allocation29_spill]] %s8452_s16  ;;  %s257_s19 = sshll.u32 %s6278_s18, 4  ;;  %s258_s19 = int_to_ptr.vmem [resolvable:$true] %s257_s19 }
  0x24   : > { %s8454_s17 = scalar_select %p6412_p10, 1, 0 }
  0x25   : > { %p5716_p11 = pneg %p6412_p10  ;;  %s39_s21 = sadd.s32 1, %s6268_s9 }
  0x26   : > { %8455 = sst [smem:[#allocation30_spill]] %s8454_s17 }
  0x27   : > { %p6420_p12 = pnand %p5716_p11, %p8407_p1  ;;  %s8457_s1 = sld [smem:[#allocation34_spill]] }
  0x29   : > { %s8456_s20 = scalar_select %p6420_p12, 1, 0 }
  0x2a   : > { %p8422_p0 = pneg %p6420_p12 }
  0x2d   : > { %s5936_s24 = scalar_lea.hbm %s8457_s1, 320 }
  0x2e   : > { %p5937_p13 = scmp.ne.s32.totalorder %s8457_s1, %s5936_s24  ;;  %p5943_p7 = scmp.lt.u32.totalorder %s5936_s24, %s8457_s1 }
  0x30   : > { %p5939_p2 = pnand %p8422_p0, %p5937_p13 }
  0x32   : > { %p5940_p5 = pneg %p5939_p2 }
  0x34   : > { %p5945_p9 = pnand %p5943_p7, %p5940_p5 }
  0x36   : > { %5948 = shalt.err (!%p5945_p9)
}
  0x37   : > { %s5949_s7 = scalar_lea.vmem %s258_s19, 320  ;;  %p5957_p8 = scmp.lt.s32.totalorder %s258_s19, %s258_s19 }
  0x38   : > { %p5950_p11 = scmp.ne.s32.totalorder %s258_s19, %s5949_s7  ;;  %p5958_p6 = scmp.lt.s32.totalorder %s5949_s7, %s5949_s7 }
  0x3a   : > { %p5952_p1 = pnand %p5950_p11, %p8422_p0  ;;  %p5959_p4 = por %p5958_p6, %p5957_p8 }
  0x3c   : > { %p5953_p3 = pneg %p5952_p1 }
  0x3e   : > { %p5960_p10 = pnand %p5959_p4, %p5953_p3 }
  0x40   : > { %5963 = shalt.err (!%p5960_p10)
}
  0x41   : > { %s8411_s16 = smov 64   ;;  %s8413_s27 = smov 4  }
  0x42   : > { %5719 = dma.hbm_to_vmem [thread:$0]  (!%p6420_p12), %s8457_s1, 320, %s258_s19, [#allocation8], %s8411_s16, %s8411_s16, %s8413_s27  }
  0x43   : > { %p6450_p1 = scmp.ge.s32.totalorder %s39_s21, 5  ;;  %p8421_p3 = scmp.eq.s32.totalorder %s6276_s11, 0 }
  0x44   : > { %s117_s24 = sadd.s32 1, %s6244_s26  ;;  %p124_p4 = scmp.ne.s32.totalorder %s6244_s26, %s6240_s25 }
  0x45   : > { %s8458_s23 = scalar_select %p6450_p1, 1, 0 }
  0x46   : > { %s8517_s21 = smov (%p6450_p1, %s39_s21), 0  ;;  %p126_p6 = por %p124_p4, %p8421_p3 }
  0x47   : > { %8459 = sst [smem:[#allocation31_spill]] %s8517_s21  ;;  %p8420_p8 = scmp.lt.s32.totalorder %s6276_s11, 10 }
  0x48   : > { %s114_s13 = ssub.s32 %s6268_s9, %s8517_s21  ;;  %s6469_s19 = sand.u32 1, %s6244_s26  }
  0x49   : > { %p115_p10 = scmp.eq.s32.totalorder %s114_s13, 0  ;;  %s5692_s7 = smul.u32 4608, %s6268_s9 }
  0x4a   : > { %s8419_s16 = smul.u32 288, %s6469_s19  ;;  %s8461_s3 = sld [smem:[#allocation36_spill]] }
  0x4b   : > { %s6473_s22 = scalar_select %p115_p10, %s6244_s26, %s117_s24  }
  0x4c   : > { %p6483_p13 = pnand %p8420_p8, %p126_p6  ;;  %s307_s18 = scalar_lea.vmem [#allocation10], %s8419_s16 }
  0x4d   : > { %8460 = sst [smem:[#allocation32_spill]] %s6473_s22  ;;  %s314_s24 = sshll.u32 %s307_s18, 4  ;;  %s6489_s24 = int_to_ptr.vmem [resolvable:$true] %s314_s24 }
  0x4e   : > { %s8462_s13 = scalar_select %p6483_p13, 1, 0 }
  0x4f   : > { %s8463_s5 = sld [smem:[#allocation37_spill]]  ;;  %s8464_s27 = sand.u32 1, %s6276_s11  }
  0x50   : > { %s6479_s8 = scalar_lea.hbm %s8461_s3, %s5692_s7  ;;  %s6498_s26 = scalar_lea.sflag [#allocation11], %s8464_s27 }
  0x51   : > { %s5964_s30 = scalar_lea.hbm %s6479_s8, 4608  ;;  %p6504_p5 = pneg %p6483_p13 }
  0x52   : > { %p5965_p2 = scmp.ne.s32.totalorder %s6479_s8, %s5964_s30  ;;  %s5969_s21 = scalar_lea.hbm %s8461_s3, 23040 }
  0x53   : > { %s8465_s15 = scalar_select %p6504_p5, 1, 0 }
  0x54   : > { %p5967_p7 = pnand %p6504_p5, %p5965_p2  ;;  %p5970_p11 = scmp.lt.u32.totalorder %s6479_s8, %s8461_s3 }
  0x55   : > { %s6494_s1 = scalar_lea.hbm %s8463_s5, %s5692_s7  ;;  %p5971_p4 = scmp.lt.u32.totalorder %s5969_s21, %s5964_s30 }
  0x56   : > { %p5968_p9 = pneg %p5967_p7  ;;  %p5973_p10 = scmp.lt.u32.totalorder %s5964_s30, %s6479_s8 }
  0x57   : > { %p5972_p6 = por %p5971_p4, %p5970_p11 }
  0x59   : > { %p5974_p8 = por %p5973_p10, %p5972_p6 }
  0x5b   : > { %p5975_p3 = pnand %p5974_p8, %p5968_p9 }
  0x5d   : > { %5978 = shalt.err (!%p5975_p3)
}
  0x5e   : > { %s5979_s27 = scalar_lea.vmem %s6489_s24, 4608  ;;  %s6281_s16 = smov [#allocation10]  }
  0x5f   : > { %p5980_p2 = scmp.ne.s32.totalorder %s6489_s24, %s5979_s27  ;;  %s5984_s18 = sshll.u32 %s6281_s16, 4  ;;  %s5985_s18 = int_to_ptr.vmem [resolvable:$false] %s5984_s18 }
  0x60   : > { %s5986_s7 = scalar_lea.vmem %s5985_s18, 9216  ;;  %p5987_p1 = scmp.lt.s32.totalorder %s6489_s24, %s5985_s18 }
  0x61   : > { %p5982_p7 = pnand %p5980_p2, %p6504_p5  ;;  %p5988_p12 = scmp.lt.s32.totalorder %s5986_s7, %s5979_s27 }
  0x63   : > { %p5983_p0 = pneg %p5982_p7  ;;  %p5989_p11 = por %p5988_p12, %p5987_p1 }
  0x65   : > { %p5990_p4 = pnand %p5989_p11, %p5983_p0 }
  0x67   : > { %5993 = shalt.err (!%p5990_p4)
}
  0x68   : > { %s8466_s30 = smov 4   ;;  %s8467_s21 = smov 64  }
  0x69   : > { %5729 = dma.hbm_to_vmem [thread:$0]  (!%p6483_p13), %s6479_s8, 4608, %s6489_s24, %s6498_s26, %s8467_s21, %s8467_s21, %s8466_s30  }
  0x6a   : > { %s8468_s22 = smul.u32 288, %s6469_s19  ;;  %s6282_s18 = smov [#allocation9]  }
  0x6b   : > { %s6535_s7 = sshll.u32 %s6282_s18, 4  ;;  %s8469_s3 = sand.u32 1, %s6276_s11   ;;  %s272_s7 = int_to_ptr.vmem [resolvable:$true] %s6535_s7 }
  0x6c   : > { %s345_s27 = scalar_lea.vmem [#allocation13], %s8468_s22  ;;  %s6539_s25 = scalar_lea.sflag [#allocation14], %s8469_s3 }
  0x6d   : > { %s352_s16 = sshll.u32 %s345_s27, 4  ;;  %s5994_s14 = scalar_lea.hbm %s6494_s1, 4608  ;;  %s6533_s16 = int_to_ptr.vmem [resolvable:$true] %s352_s16 }
  0x6e   : > { %p5995_p12 = scmp.ne.s32.totalorder %s6494_s1, %s5994_s14  ;;  %s5999_s8 = scalar_lea.hbm %s8463_s5, 23040 }
  0x6f   : > { %p6000_p3 = scmp.lt.u32.totalorder %s6494_s1, %s8463_s5  ;;  %p6001_p8 = scmp.lt.u32.totalorder %s5999_s8, %s5994_s14 }
  0x70   : > { %p5997_p0 = pnand %p5995_p12, %p6504_p5  ;;  %p6003_p6 = scmp.lt.u32.totalorder %s5994_s14, %s6494_s1 }
  0x71   : > { %p6002_p9 = por %p6001_p8, %p6000_p3 }
  0x72   : > { %p5998_p1 = pneg %p5997_p0 }
  0x73   : > { %p6004_p10 = por %p6003_p6, %p6002_p9 }
  0x75   : > { %p6005_p2 = pnand %p6004_p10, %p5998_p1 }
  0x77   : > { %6008 = shalt.err (!%p6005_p2)
}
  0x78   : > { %s6009_s3 = scalar_lea.vmem %s6533_s16, 4608  ;;  %s6283_s6 = smov [#allocation13]  }
  0x79   : > { %p6010_p7 = scmp.ne.s32.totalorder %s6533_s16, %s6009_s3  ;;  %s6014_s17 = sshll.u32 %s6283_s6, 4  ;;  %s6015_s17 = int_to_ptr.vmem [resolvable:$false] %s6014_s17 }
  0x7a   : > { %s6016_s27 = scalar_lea.vmem %s6015_s17, 9216  ;;  %p6017_p12 = scmp.lt.s32.totalorder %s6533_s16, %s6015_s17 }
  0x7b   : > { %p6012_p11 = pnand %p6010_p7, %p6504_p5  ;;  %p6018_p0 = scmp.lt.s32.totalorder %s6016_s27, %s6009_s3 }
  0x7d   : > { %p6013_p4 = pneg %p6012_p11  ;;  %p6019_p3 = por %p6018_p0, %p6017_p12 }
  0x7f   : > { %p6020_p8 = pnand %p6019_p3, %p6013_p4 }
  0x81   : > { %6023 = shalt.err (!%p6020_p8)
}
  0x82   : > { %5735 = dma.hbm_to_vmem [thread:$0]  (!%p6483_p13), %s6494_s1, 4608, %s6533_s16, %s6539_s25, %s8467_s21, %s8467_s21, %s8466_s30  }
  0x83   : > { %s8470_s2 = sld [smem:[#allocation35_spill]]  ;;  %p8471_p9 = scmp.ne.s32.totalorder %s8456_s20, 0 }
  0x85   : > { %p8472_p6 = pneg %p8471_p9 }
  0x89   : > { %s6024_s8 = scalar_lea.hbm %s8470_s2, 16 }
  0x8a   : > { %p6025_p1 = scmp.ne.s32.totalorder %s8470_s2, %s6024_s8  ;;  %p6031_p7 = scmp.lt.u32.totalorder %s6024_s8, %s8470_s2 }
  0x8c   : > { %p6027_p10 = pnand %p6025_p1, %p8472_p6 }
  0x8e   : > { %p6028_p2 = pneg %p6027_p10 }
  0x90   : > { %p6033_p11 = pnand %p6031_p7, %p6028_p2 }
  0x92   : > { %6036 = shalt.err (!%p6033_p11)
}
  0x93   : > { %s6037_s1 = scalar_lea.vmem %s272_s7, 16  ;;  %p8473_p12 = pmov %p8472_p6 }
  0x94   : > { %p6038_p4 = scmp.ne.s32.totalorder %s272_s7, %s6037_s1  ;;  %s6044_s16 = scalar_lea.vmem %s272_s7, 32 }
  0x95   : > { %p6045_p8 = scmp.lt.s32.totalorder %s272_s7, %s272_s7  ;;  %p6046_p13 = scmp.lt.s32.totalorder %s6044_s16, %s6037_s1 }
  0x96   : > { %p6040_p0 = pnand %p6038_p4, %p8473_p12 }
  0x97   : > { %p6047_p5 = por %p6046_p13, %p6045_p8 }
  0x98   : > { %p6041_p3 = pneg %p6040_p0 }
  0x9a   : > { %p6048_p1 = pnand %p6047_p5, %p6041_p3 }
  0x9c   : > { %6051 = shalt.err (!%p6048_p1)
}
  0x9d   : > { %5722 = dma.hbm_to_vmem [thread:$0]  (!%p8471_p9), %s8470_s2, 16, %s272_s7, [#allocation8]  }
  0x9e   : > { %s49_s14 = sadd.s32 1, %s6256_s29  ;;  %s42_s18 = sadd.s32 1, %s6272_s10 }
  0x9f   : > { %p56_p13 = scmp.ne.s32.totalorder %s6256_s29, %s6252_s28  ;;  %p8474_p5 = scmp.ne.s32.totalorder %s8458_s23, 0 }
  0xa0   : > { %p8475_p6 = scmp.eq.s32.totalorder %s6276_s11, 0  ;;  %p8477_p2 = scmp.eq.s32.totalorder %s6386_s12, 9 }
  0xa1   : > { %s8519_s18 = smov (!%p8474_p5, %s42_s18), %s6272_s10  ;;  %s282_s7 = sand.u32 1, %s6256_s29  }
  0xa2   : > { %p6596_p10 = por %p8475_p6, %p56_p13  ;;  %p6602_p7 = por %p8477_p2, %p56_p13 }
  0xa3   : > { %p44_p11 = scmp.ge.s32.totalorder %s8519_s18, 2  ;;  %s4895_s24 = sshll.u32 %s282_s7, 7 }
  0xa4   : > { %s8478_s8 = scalar_select %p6602_p7, 1, 0 }
  0xa5   : > { %s8521_s18 = smov (%p44_p11, %s8519_s18), 0  ;;  %s5056_s23 = sshll.u32 %s6272_s10, 11 }
  0xa6   : > { %s46_s22 = ssub.s32 %s6272_s10, %s8521_s18  ;;  %s8479_s0 = sld [smem:[#allocation33_spill]] }
  0xa7   : > { %p47_p9 = scmp.eq.s32.totalorder %s46_s22, 0  ;;  %s286_s16 = scalar_lea.vmem [#allocation4], %s4895_s24 }
  0xa8   : > { %s293_s17 = sshll.u32 %s286_s16, 4  ;;  %p8480_p4 = scmp.lt.s32.totalorder %s6276_s11, 10  ;;  %s6617_s17 = int_to_ptr.vmem [resolvable:$true] %s293_s17 }
  0xa9   : > { %s6628_s3 = scalar_select %p47_p9, %s6256_s29, %s49_s14  }
  0xaa   : > { %p6623_p12 = pnand %p8480_p4, %p6596_p10 }
  0xac   : > { %s6615_s1 = scalar_lea.hbm %s8479_s0, %s5056_s23  ;;  %s6630_s23 = scalar_lea.sflag [#allocation5], %s282_s7 }
  0xad   : > { %s6052_s6 = scalar_lea.hbm %s6615_s1, 2048  ;;  %p6054_p3 = pneg %p6623_p12 }
  0xae   : > { %p6053_p0 = scmp.ne.s32.totalorder %s6615_s1, %s6052_s6  ;;  %s6057_s22 = scalar_lea.hbm %s8479_s0, 4096 }
  0xaf   : > { %p6058_p13 = scmp.lt.u32.totalorder %s6615_s1, %s8479_s0  ;;  %p6059_p5 = scmp.lt.u32.totalorder %s6057_s22, %s6052_s6 }
  0xb0   : > { %p6055_p8 = pnand %p6054_p3, %p6053_p0  ;;  %p6061_p10 = scmp.lt.u32.totalorder %s6052_s6, %s6615_s1 }
  0xb1   : > { %p6060_p6 = por %p6059_p5, %p6058_p13 }
  0xb2   : > { %p6056_p1 = pneg %p6055_p8 }
  0xb3   : > { %p6062_p2 = por %p6061_p10, %p6060_p6 }
  0xb5   : > { %p6063_p11 = pnand %p6062_p2, %p6056_p1 }
  0xb7   : > { %6066 = shalt.err (!%p6063_p11)
}
  0xb8   : > { %s6067_s14 = scalar_lea.vmem %s6617_s17, 2048  ;;  %s6284_s7 = smov [#allocation4]  }
  0xb9   : > { %p6068_p9 = scmp.ne.s32.totalorder %s6617_s17, %s6067_s14  ;;  %s6072_s20 = sshll.u32 %s6284_s7, 4  ;;  %s6073_s20 = int_to_ptr.vmem [resolvable:$false] %s6072_s20 }
  0xba   : > { %s6074_s2 = scalar_lea.vmem %s6073_s20, 4096  ;;  %p6075_p8 = scmp.lt.s32.totalorder %s6617_s17, %s6073_s20 }
  0xbb   : > { %p6070_p4 = pnand %p6068_p9, %p6054_p3  ;;  %p6076_p13 = scmp.lt.s32.totalorder %s6074_s2, %s6067_s14 }
  0xbd   : > { %p6071_p0 = pneg %p6070_p4  ;;  %p6077_p5 = por %p6076_p13, %p6075_p8 }
  0xbf   : > { %p6078_p6 = pnand %p6077_p5, %p6071_p0 }
  0xc1   : > { %6081 = shalt.err (!%p6078_p6)
}
  0xc2   : > { %5726 = dma.hbm_to_vmem [thread:$0]  (!%p6623_p12), %s6615_s1, 2048, %s6617_s17, %s6630_s23, %s8467_s21, %s8467_s21, %s8466_s30  }
  0xc3   : > { %s4899_s6 = sshll.u32 %s6268_s9, 4  ;;  %s327_s24 = scalar_lea.vmem [#allocation12], %s6469_s19 }
  0xc4   : > { %s334_s22 = sshll.u32 %s327_s24, 4  ;;  %s332_s7 = scalar_lea.hbm %s8400_s4, %s4899_s6  ;;  %s335_s22 = int_to_ptr.vmem [resolvable:$true] %s334_s22 }
  0xc5   : > { %s6082_s27 = scalar_lea.hbm %s332_s7, 16  ;;  %p8482_p1 = scmp.ne.s32.totalorder %s8465_s15, 0 }
  0xc6   : > { %p6083_p3 = scmp.ne.s32.totalorder %s332_s7, %s6082_s27  ;;  %s6087_s0 = scalar_lea.hbm %s8400_s4, 80 }
  0xc7   : > { %p6088_p12 = scmp.lt.u32.totalorder %s332_s7, %s8400_s4  ;;  %p6089_p11 = scmp.lt.u32.totalorder %s6087_s0, %s6082_s27 }
  0xc8   : > { %p6085_p10 = pnand %p6083_p3, %p8482_p1  ;;  %p6091_p4 = scmp.lt.u32.totalorder %s6082_s27, %s332_s7 }
  0xc9   : > { %p6090_p9 = por %p6089_p11, %p6088_p12 }
  0xca   : > { %p6086_p2 = pneg %p6085_p10 }
  0xcb   : > { %p6092_p0 = por %p6091_p4, %p6090_p9 }
  0xcd   : > { %p6093_p8 = pnand %p6092_p0, %p6086_p2 }
  0xcf   : > { %6096 = shalt.err (!%p6093_p8)
}
  0xd0   : > { %s6097_s21 = scalar_lea.vmem %s335_s22, 16  ;;  %s6285_s1 = smov [#allocation12]  }
  0xd1   : > { %p6098_p13 = scmp.ne.s32.totalorder %s335_s22, %s6097_s21  ;;  %s6102_s17 = sshll.u32 %s6285_s1, 4  ;;  %s6103_s17 = int_to_ptr.vmem [resolvable:$false] %s6102_s17 }
  0xd2   : > { %s6104_s23 = scalar_lea.vmem %s6103_s17, 32  ;;  %p6105_p3 = scmp.lt.s32.totalorder %s335_s22, %s6103_s17 }
  0xd3   : > { %p6100_p5 = pnand %p6098_p13, %p8482_p1  ;;  %p6106_p10 = scmp.lt.s32.totalorder %s6104_s23, %s6097_s21 }
  0xd5   : > { %p6101_p6 = pneg %p6100_p5  ;;  %p6107_p7 = por %p6106_p10, %p6105_p3 }
  0xd7   : > { %p6108_p11 = pnand %p6107_p7, %p6101_p6 }
  0xd9   : > { %6111 = shalt.err (!%p6108_p11)
}
  0xda   : > { %p8483_p12 = scmp.ne.s32.totalorder %s8462_s13, 0  ;;  %s8484_s24 = sld [smem:[#allocation38_spill]] }
  0xdb   : > { %s365_s27 = scalar_lea.vmem [#allocation15], %s6469_s19 }
  0xdc   : > { %5732 = dma.hbm_to_vmem [thread:$0]  (!%p8483_p12), %s332_s7, 16, %s335_s22, %s6498_s26  }
  0xdd   : > { %s372_s20 = sshll.u32 %s365_s27, 4  ;;  %s373_s20 = int_to_ptr.vmem [resolvable:$true] %s372_s20 }
  0xe0   : > { %s8485_s16 = smov %s8484_s24  ;;  %s6686_s14 = scalar_lea.hbm %s8484_s24, %s4899_s6 }
  0xe1   : > { %s6112_s2 = scalar_lea.hbm %s6686_s14, 16  ;;  %s6117_s22 = scalar_lea.hbm %s8485_s16, 80 }
  0xe2   : > { %p6113_p7 = scmp.ne.s32.totalorder %s6686_s14, %s6112_s2  ;;  %p6118_p4 = scmp.lt.u32.totalorder %s6686_s14, %s8485_s16 }
  0xe3   : > { %p6119_p0 = scmp.lt.u32.totalorder %s6117_s22, %s6112_s2  ;;  %p6121_p13 = scmp.lt.u32.totalorder %s6112_s2, %s6686_s14 }
  0xe4   : > { %p6115_p2 = pnand %p6113_p7, %p8482_p1 }
  0xe5   : > { %p6120_p8 = por %p6119_p0, %p6118_p4 }
  0xe6   : > { %p6116_p9 = pneg %p6115_p2 }
  0xe7   : > { %p6122_p5 = por %p6121_p13, %p6120_p8 }
  0xe9   : > { %p6123_p6 = pnand %p6122_p5, %p6116_p9 }
  0xeb   : > { %6126 = shalt.err (!%p6123_p6)
}
  0xec   : > { %s6127_s19 = scalar_lea.vmem %s373_s20, 16  ;;  %s6286_s6 = smov [#allocation15]  }
  0xed   : > { %p6128_p3 = scmp.ne.s32.totalorder %s373_s20, %s6127_s19  ;;  %s6132_s1 = sshll.u32 %s6286_s6, 4  ;;  %s6133_s1 = int_to_ptr.vmem [resolvable:$false] %s6132_s1 }
  0xee   : > { %s6134_s17 = scalar_lea.vmem %s6133_s1, 32  ;;  %p6135_p7 = scmp.lt.s32.totalorder %s373_s20, %s6133_s1 }
  0xef   : > { %p6130_p10 = pnand %p6128_p3, %p8482_p1  ;;  %p6136_p2 = scmp.lt.s32.totalorder %s6134_s17, %s6127_s19 }
  0xf1   : > { %p6131_p11 = pneg %p6130_p10  ;;  %p6137_p12 = por %p6136_p2, %p6135_p7 }
  0xf3   : > { %p6138_p0 = pnand %p6137_p12, %p6131_p11 }
  0xf5   : > { %6141 = shalt.err (!%p6138_p0)
}
  0xf6   : > { %p8486_p4 = scmp.ne.s32.totalorder %s8462_s13, 0  ;;  %s8487_s23 = sld [smem:[#allocation30_spill]] }
  0xf8   : > { %5738 = dma.hbm_to_vmem [thread:$0]  (!%p8486_p4), %s6686_s14, 16, %s373_s20, %s6539_s25  }
  0xfc   : > { %p8488_p9 = scmp.ne.s32.totalorder %s8487_s23, 0 }
  0xfd   : > { %s8489_s15 = sld [smem:[#allocation27_spill]] (!%p8488_p9)  ;;  %s6710_s0 = sand.u32 (!%p8488_p9), 1, %s6252_s28  }
  0xfe   : > { %381 = sbr.rel (%p8488_p9) target bundleno = 1614 (0x64e), region = 48  ;;  %s4903_s5 = sshll.u32 (!%p8488_p9), %s6710_s0, 7 }
  0xff   : > { %s384_s24 = scalar_lea.sflag (!%p8488_p9), [#allocation5], %s6710_s0  ;;  %s6714_s27 = scalar_lea.vmem (!%p8488_p9), [#allocation4], %s4903_s5 }
 0x103   : > { %p8490_p1 = scmp.ne.s32.totalorder (!%p8488_p9), %s8489_s15, 0 }
 0x105   : > { %6215 = dma.done.wait (%p8490_p1), %s384_s24, 2048  }
 0x106   : > { %6217 = vsyncadd (%p8490_p1), %s384_s24, 4294965248  ;;  %p8491_p12 = scmp.eq.s32.totalorder %s6386_s12, 0 }
 0x108   : > { %6219 = dma.done.wait (%p8491_p12), [#allocation8], 336   ;;  %p8492_p8 = pmov %p8491_p12 }
 0x109   : > { %s8493_s25 = sld [smem:[#allocation22_spill]]  ;;  %s400_s14 = sand.u32 1, %s6386_s12  }
 0x10a   : > { %6221 = vsyncadd (%p8492_p8), [#allocation8], 4294966960  ;;  %s8494_s13 = sld [smem:[#allocation28_spill]]  ;;  %s401_s30 = scalar_lea.sflag [#allocation11], %s400_s14 }
 0x10f   : > { %s6726_s20 = sand.u32 1, %s8493_s25  }
 0x110   : > { %s5695_s2 = smul.u32 288, %s6726_s20  ;;  %p8495_p13 = scmp.ne.s32.totalorder %s8494_s13, 0 }
 0x112   : > { %s6729_s26 = scalar_lea.vmem [#allocation10], %s5695_s2 }
 0x113   : > { %6223 = dma.done.wait (%p8495_p13), %s401_s30, 4624  }
 0x114   : > { %6225 = vsyncadd (%p8495_p13), %s401_s30, 4294962672  ;;  %s412_s22 = scalar_lea.vmem [#allocation12], %s6726_s20  ;;  %s418_s7 = scalar_lea.sflag [#allocation14], %s400_s14 }
 0x115   : > { %s6736_s21 = scalar_lea.vmem [#allocation13], %s5695_s2 }
 0x116   : > { %6227 = dma.done.wait (%p8495_p13), %s418_s7, 4624  }
 0x117   : > { %6229 = vsyncadd (%p8495_p13), %s418_s7, 4294962672  ;;  %s4906_s12 = sshll.u32 %s6710_s0, 8  ;;  %s429_s19 = scalar_lea.vmem [#allocation15], %s6726_s20 }
 0x118   : > { %s6744_s6 = scalar_lea.vmem [#allocation16], %s4906_s12  ;;  %s8496_s1 = sld [smem:[#allocation25_spill]] }
 0x11e   : > { %p4907_p5 = scmp.ne.s32.totalorder %s8496_s1, 0 }
 0x11f   : > { %vm486_vm0 = vcmask (!%p4907_p5), 517120   ;;  %vm493_vm1 = vcmask (!%p4907_p5), 516096   ;;  %v6747_v0 = vld [vmem:[#allocation7] sm:$0xff] (!%p4907_p5)   ;;  %v6287_v1 = vmov (!%p4907_p5), 0.0   ;;  %v5846_v2 = vld [vmem:[#allocation7 + $0x8] sm:$0xff] (!%p4907_p5)   ;;  %vm754_vm2 = vcmask (!%p4907_p5), 1041408  }
 0x120   : > { %482 = sbr.rel (%p4907_p5) target bundleno = 576 (0x240), region = 80  ;;  %487 = vst.msk [vmem:[#allocation2 + $0x10] sm:$0x3] (!%p4907_p5), %vm486_vm0, %v6287_v1  ;;  %491 = vst.msk [vmem:[#allocation2 + $0x1a8] sm:$0x3] (!%p4907_p5), %vm486_vm0, %v6287_v1  ;;  %5565 = vmatprep.subr.bf16.mxu0 (!%p4907_p5), %v6747_v0  ;;  %5683 = vmatprep.subr.bf16.mxu1 (!%p4907_p5), %v6747_v0  ;;  %v5848_v4 = vld [vmem:[%s6714_s27] sm:$0xff] (!%p4907_p5)  }
 0x121   : > { %494 = vst.msk [vmem:[#allocation2 + $0x18] sm:$0x1] (!%p4907_p5), %vm493_vm1, %v6287_v1  ;;  %495 = vst.msk [vmem:[#allocation2 + $0x30] sm:$0x1] (!%p4907_p5), %vm493_vm1, %v6287_v1  ;;  %5566 = vmatpush3.bf16.msra.mxu0 (!%p4907_p5), %v6747_v0  ;;  %5686 = vmatpush3.bf16.msra.mxu1 (!%p4907_p5), %v6747_v0  ;;  %vm705_vm3 = vcmask (!%p4907_p5), 293888   ;;  %v5849_v5 = vld [vmem:[%s6714_s27 + $0x40] sm:$0xff] (!%p4907_p5)  }
 0x122   : > { %496 = vst.msk [vmem:[#allocation2 + $0x48] sm:$0x1] (!%p4907_p5), %vm493_vm1, %v6287_v1  ;;  %497 = vst.msk [vmem:[#allocation2 + $0x60] sm:$0x1] (!%p4907_p5), %vm493_vm1, %v6287_v1  ;;  %5567 = vmatprep.subr.bf16.mxu0 (!%p4907_p5), %v5846_v2  ;;  %5684 = vmatprep.subr.bf16.mxu1 (!%p4907_p5), %v5846_v2  ;;  %vm483_vm4 = vcmask (!%p4907_p5), 523264   ;;  %v5850_v7 = vld [vmem:[%s6714_s27 + $0x8] sm:$0xff] (!%p4907_p5)  }
 0x123   : > { %498 = vst.msk [vmem:[#allocation2 + $0x78] sm:$0x1] (!%p4907_p5), %vm493_vm1, %v6287_v1  ;;  %499 = vst.msk [vmem:[#allocation2 + $0x90] sm:$0x1] (!%p4907_p5), %vm493_vm1, %v6287_v1  ;;  %5571 = vmatprep.mubr.msk.bf16.mxu0 (!%p4907_p5), %vm705_vm3, %v5848_v4  ;;  %5587 = vmatprep.mubr.msk.bf16.mxu1 (!%p4907_p5), %vm705_vm3, %v5849_v5  ;;  %v5851_v8 = vld [vmem:[%s6714_s27 + $0x48] sm:$0xff] (!%p4907_p5)   ;;  %v5852_v9 = vld [vmem:[%s6714_s27 + $0x10] sm:$0xff] (!%p4907_p5)  }
 0x124   : > { %500 = vst.msk [vmem:[#allocation2 + $0xa8] sm:$0x1] (!%p4907_p5), %vm493_vm1, %v6287_v1  ;;  %501 = vst.msk [vmem:[#allocation2 + $0xc0] sm:$0x1] (!%p4907_p5), %vm493_vm1, %v6287_v1  ;;  %v5853_v10 = vld [vmem:[%s6714_s27 + $0x50] sm:$0xff] (!%p4907_p5)   ;;  %v5854_v11 = vld [vmem:[%s6714_s27 + $0x18] sm:$0xff] (!%p4907_p5)  }
 0x125   : > { %502 = vst.msk [vmem:[#allocation2 + $0xd8] sm:$0x1] (!%p4907_p5), %vm493_vm1, %v6287_v1  ;;  %503 = vst.msk [vmem:[#allocation2 + $0xf0] sm:$0x1] (!%p4907_p5), %vm493_vm1, %v6287_v1  ;;  %5568 = vmatpush3.bf16.msra.mxu0 (!%p4907_p5), %v5846_v2  ;;  %5687 = vmatpush3.bf16.msra.mxu1 (!%p4907_p5), %v5846_v2  ;;  %v5855_v12 = vld [vmem:[%s6714_s27 + $0x58] sm:$0xff] (!%p4907_p5)   ;;  %v5856_v13 = vld [vmem:[%s6714_s27 + $0x20] sm:$0xff] (!%p4907_p5)  }
 0x126   : > { %504 = vst.msk [vmem:[#allocation2 + $0x108] sm:$0x1] (!%p4907_p5), %vm493_vm1, %v6287_v1  ;;  %505 = vst.msk [vmem:[#allocation2 + $0x120] sm:$0x1] (!%p4907_p5), %vm493_vm1, %v6287_v1  ;;  %v5857_v14 = vld [vmem:[%s6714_s27 + $0x60] sm:$0xff] (!%p4907_p5)   ;;  %v5858_v15 = vld [vmem:[%s6714_s27 + $0x28] sm:$0xff] (!%p4907_p5)  }
 0x127   : > { %506 = vst.msk [vmem:[#allocation2 + $0x138] sm:$0x1] %vm493_vm1, %v6287_v1  ;;  %507 = vst.msk [vmem:[#allocation2 + $0x150] sm:$0x1] %vm493_vm1, %v6287_v1  ;;  %v5859_v16 = vld [vmem:[%s6714_s27 + $0x68] sm:$0xff]   ;;  %v5860_v17 = vld [vmem:[%s6714_s27 + $0x30] sm:$0xff]  }
 0x128   : > { %508 = vst.msk [vmem:[#allocation2 + $0x168] sm:$0x1] %vm493_vm1, %v6287_v1  ;;  %509 = vst.msk [vmem:[#allocation2 + $0x180] sm:$0x1] %vm493_vm1, %v6287_v1  ;;  %v5861_v18 = vld [vmem:[%s6714_s27 + $0x70] sm:$0xff]   ;;  %v5862_v19 = vld [vmem:[%s6714_s27 + $0x38] sm:$0xff]  }
 0x129   : > { %510 = vst.msk [vmem:[#allocation2 + $0x29] sm:$0x1] %vm493_vm1, %v6287_v1  ;;  %511 = vst.msk [vmem:[#allocation2 + $0x41] sm:$0x1] %vm493_vm1, %v6287_v1  ;;  %v5863_v20 = vld [vmem:[%s6714_s27 + $0x78] sm:$0xff]  }
 0x12a   : > { %512 = vst.msk [vmem:[#allocation2 + $0x59] sm:$0x1] %vm493_vm1, %v6287_v1  ;;  %513 = vst.msk [vmem:[#allocation2 + $0x71] sm:$0x1] %vm493_vm1, %v6287_v1  ;;  %v6940_v21 = vld [vmem:[#allocation9] ss:$0 sm:$0xff] }
 0x12b   : > { %514 = vst.msk [vmem:[#allocation2 + $0x89] sm:$0x1] %vm493_vm1, %v6287_v1  ;;  %515 = vst.msk [vmem:[#allocation2 + $0xa1] sm:$0x1] %vm493_vm1, %v6287_v1 }
 0x12c   : > { %516 = vst.msk [vmem:[#allocation2 + $0xb9] sm:$0x1] %vm493_vm1, %v6287_v1  ;;  %517 = vst.msk [vmem:[#allocation2 + $0xd1] sm:$0x1] %vm493_vm1, %v6287_v1 }
 0x12d   : > { %518 = vst.msk [vmem:[#allocation2 + $0xe9] sm:$0x1] %vm493_vm1, %v6287_v1  ;;  %519 = vst.msk [vmem:[#allocation2 + $0x101] sm:$0x1] %vm493_vm1, %v6287_v1 }
 0x12e   : > { %520 = vst.msk [vmem:[#allocation2 + $0x119] sm:$0x1] %vm493_vm1, %v6287_v1  ;;  %521 = vst.msk [vmem:[#allocation2 + $0x131] sm:$0x1] %vm493_vm1, %v6287_v1 }
 0x12f   : > { %522 = vst.msk [vmem:[#allocation2 + $0x149] sm:$0x1] %vm493_vm1, %v6287_v1  ;;  %523 = vst.msk [vmem:[#allocation2 + $0x161] sm:$0x1] %vm493_vm1, %v6287_v1 }
 0x130   : > { %524 = vst.msk [vmem:[#allocation2 + $0x179] sm:$0x1] %vm493_vm1, %v6287_v1  ;;  %525 = vst.msk [vmem:[#allocation2 + $0x191] sm:$0x1] %vm493_vm1, %v6287_v1 }
 0x131   : > { %528 = vst.msk [vmem:[#allocation3 + $0x10] sm:$0x3] %vm486_vm0, %v6287_v1  ;;  %532 = vst.msk [vmem:[#allocation3 + $0x1a8] sm:$0x3] %vm486_vm0, %v6287_v1 }
 0x132   : > { %534 = vst.msk [vmem:[#allocation3 + $0x18] sm:$0x1] %vm493_vm1, %v6287_v1  ;;  %535 = vst.msk [vmem:[#allocation3 + $0x30] sm:$0x1] %vm493_vm1, %v6287_v1 }
 0x133   : > { %536 = vst.msk [vmem:[#allocation3 + $0x48] sm:$0x1] %vm493_vm1, %v6287_v1  ;;  %537 = vst.msk [vmem:[#allocation3 + $0x60] sm:$0x1] %vm493_vm1, %v6287_v1 }
 0x134   : > { %538 = vst.msk [vmem:[#allocation3 + $0x78] sm:$0x1] %vm493_vm1, %v6287_v1  ;;  %539 = vst.msk [vmem:[#allocation3 + $0x90] sm:$0x1] %vm493_vm1, %v6287_v1 }
 0x135   : > { %540 = vst.msk [vmem:[#allocation3 + $0xa8] sm:$0x1] %vm493_vm1, %v6287_v1  ;;  %541 = vst.msk [vmem:[#allocation3 + $0xc0] sm:$0x1] %vm493_vm1, %v6287_v1 }
 0x136   : > { %542 = vst.msk [vmem:[#allocation3 + $0xd8] sm:$0x1] %vm493_vm1, %v6287_v1  ;;  %543 = vst.msk [vmem:[#allocation3 + $0xf0] sm:$0x1] %vm493_vm1, %v6287_v1 }
 0x137   : > { %544 = vst.msk [vmem:[#allocation3 + $0x108] sm:$0x1] %vm493_vm1, %v6287_v1  ;;  %545 = vst.msk [vmem:[#allocation3 + $0x120] sm:$0x1] %vm493_vm1, %v6287_v1 }
 0x138   : > { %546 = vst.msk [vmem:[#allocation3 + $0x138] sm:$0x1] %vm493_vm1, %v6287_v1  ;;  %547 = vst.msk [vmem:[#allocation3 + $0x150] sm:$0x1] %vm493_vm1, %v6287_v1 }
 0x139   : > { %548 = vst.msk [vmem:[#allocation3 + $0x168] sm:$0x1] %vm493_vm1, %v6287_v1  ;;  %549 = vst.msk [vmem:[#allocation3 + $0x180] sm:$0x1] %vm493_vm1, %v6287_v1 }
 0x13a   : > { %550 = vst.msk [vmem:[#allocation3 + $0x29] sm:$0x1] %vm493_vm1, %v6287_v1  ;;  %551 = vst.msk [vmem:[#allocation3 + $0x41] sm:$0x1] %vm493_vm1, %v6287_v1 }
 0x13b   : > { %552 = vst.msk [vmem:[#allocation3 + $0x59] sm:$0x1] %vm493_vm1, %v6287_v1  ;;  %553 = vst.msk [vmem:[#allocation3 + $0x71] sm:$0x1] %vm493_vm1, %v6287_v1 }
 0x13c   : > { %554 = vst.msk [vmem:[#allocation3 + $0x89] sm:$0x1] %vm493_vm1, %v6287_v1  ;;  %555 = vst.msk [vmem:[#allocation3 + $0xa1] sm:$0x1] %vm493_vm1, %v6287_v1 }
 0x13d   : > { %556 = vst.msk [vmem:[#allocation3 + $0xb9] sm:$0x1] %vm493_vm1, %v6287_v1  ;;  %557 = vst.msk [vmem:[#allocation3 + $0xd1] sm:$0x1] %vm493_vm1, %v6287_v1 }
 0x13e   : > { %558 = vst.msk [vmem:[#allocation3 + $0xe9] sm:$0x1] %vm493_vm1, %v6287_v1  ;;  %559 = vst.msk [vmem:[#allocation3 + $0x101] sm:$0x1] %vm493_vm1, %v6287_v1 }
 0x13f   : > { %560 = vst.msk [vmem:[#allocation3 + $0x119] sm:$0x1] %vm493_vm1, %v6287_v1  ;;  %561 = vst.msk [vmem:[#allocation3 + $0x131] sm:$0x1] %vm493_vm1, %v6287_v1 }
 0x140   : > { %562 = vst.msk [vmem:[#allocation3 + $0x149] sm:$0x1] %vm493_vm1, %v6287_v1  ;;  %563 = vst.msk [vmem:[#allocation3 + $0x161] sm:$0x1] %vm493_vm1, %v6287_v1 }
 0x141   : > { %564 = vst.msk [vmem:[#allocation3 + $0x179] sm:$0x1] %vm493_vm1, %v6287_v1  ;;  %565 = vst.msk [vmem:[#allocation3 + $0x191] sm:$0x1] %vm493_vm1, %v6287_v1 }
 0x142   : > { %v5847_v3 = vld [vmem:[#allocation7 + $0x10] ss:$0 sps:$4 sm:$0x33]   ;;  %484 = vst.msk [vmem:[#allocation2] sm:$0xff] %vm483_vm4, %v6287_v1  ;;  %485 = vst.msk [vmem:[#allocation2 + $0x8] sm:$0xff] %vm483_vm4, %v6287_v1 }
 0x143   : > { %489 = vst.msk [vmem:[#allocation2 + $0x198] sm:$0xff] %vm483_vm4, %v6287_v1  ;;  %490 = vst.msk [vmem:[#allocation2 + $0x1a0] sm:$0xff] %vm483_vm4, %v6287_v1  ;;  %5689 = vmatprep.subr.msk.bf16.mxu0 %vm754_vm2, %v5847_v3  ;;  %5690 = vmatprep.subr.msk.bf16.mxu1 %vm754_vm2, %v5847_v3  ;;  %v756_v6 = vsel %vm754_vm2, %v5847_v3, 0 }
 0x144   : > { %526 = vst.msk [vmem:[#allocation3] sm:$0xff] %vm483_vm4, %v6287_v1  ;;  %527 = vst.msk [vmem:[#allocation3 + $0x8] sm:$0xff] %vm483_vm4, %v6287_v1  ;;  %5570 = vmatpush3.bf16.msra.mxu0 %v756_v6  ;;  %5688 = vmatpush3.bf16.msra.mxu1 %v756_v6 }
 0x145   : > { %530 = vst.msk [vmem:[#allocation3 + $0x198] sm:$0xff] %vm483_vm4, %v6287_v1  ;;  %531 = vst.msk [vmem:[#allocation3 + $0x1a0] sm:$0xff] %vm483_vm4, %v6287_v1 }
 0x147   : > { %5572 = vmatmul.mubr.msk.bf16.vlgmr.msra.gmra.mrb[0].mxu0 %vm705_vm3, %v5850_v7  ;;  %5588 = vmatmul.mubr.msk.bf16.vlgmr.msra.gmra.mrb[0].mxu1 %vm705_vm3, %v5851_v8 }
 0x148   : > { %5575 = vmatprep.mubr.msk.bf16.mxu0 %vm705_vm3, %v5852_v9  ;;  %5591 = vmatprep.mubr.msk.bf16.mxu1 %vm705_vm3, %v5853_v10 }
 0x14f   : > { %5576 = vmatmul.mubr.msk.bf16.gmra.mrb[4].mxu0 %vm705_vm3, %v5854_v11  ;;  %5592 = vmatmul.mubr.msk.bf16.gmra.mrb[4].mxu1 %vm705_vm3, %v5855_v12 }
 0x150   : > { %5579 = vmatprep.mubr.msk.bf16.mxu0 %vm705_vm3, %v5856_v13  ;;  %5595 = vmatprep.mubr.msk.bf16.mxu1 %vm705_vm3, %v5857_v14 }
 0x157   : > { %5580 = vmatmul.mubr.msk.bf16.gmra.mrb[8].mxu0 %vm705_vm3, %v5858_v15  ;;  %5596 = vmatmul.mubr.msk.bf16.gmra.mrb[8].mxu1 %vm705_vm3, %v5859_v16 }
 0x158   : > { %5583 = vmatprep.mubr.msk.bf16.mxu0 %vm705_vm3, %v5860_v17  ;;  %5599 = vmatprep.mubr.msk.bf16.mxu1 %vm705_vm3, %v5861_v18 }
 0x15f   : > { %5584 = vmatmul.mubr.msk.bf16.gmra.mrb[12].mxu0 %vm705_vm3, %v5862_v19  ;;  %5600 = vmatmul.mubr.msk.bf16.gmra.mrb[12].mxu1 %vm705_vm3, %v5863_v20 }
 0x21a   : > { %v5573_v22 = vpop.f32.mrb[0].mxu0  ;;  %v5589_v23 = vpop.f32.mrb[0].mxu1 }
 0x21b   : > { %v801_v24 = vadd.f32 %v5573_v22, %v6940_v21  ;;  %v865_v25 = vadd.f32 %v5589_v23, %v6940_v21  ;;  %v792_v26 = vpop.f32.mrb[1].mxu0  ;;  %v856_v27 = vpop.f32.mrb[1].mxu1 }
 0x21c   : > { %v793_v28 = vadd.f32 %v6940_v21, %v792_v26  ;;  %v857_v29 = vadd.f32 %v6940_v21, %v856_v27  ;;  %v5574_v30 = vpop.f32.mrb[2].mxu0  ;;  %v5590_v31 = vpop.f32.mrb[2].mxu1 }
 0x21d   : > { %vm921_vm5 = vcmp.ge.f32.partialorder %v801_v24, 0.0  ;;  %v953_v32 = vmul.f32 0.1, %v801_v24  ;;  %vm937_vm6 = vcmp.ge.f32.partialorder %v865_v25, 0.0  ;;  %v969_v33 = vmul.f32 0.1, %v865_v25 }
 0x21e   : > { %vm919_vm7 = vcmp.ge.f32.partialorder %v793_v28, 0.0  ;;  %v951_v34 = vmul.f32 0.1, %v793_v28  ;;  %vm935_vm8 = vcmp.ge.f32.partialorder %v857_v29, 0.0  ;;  %v967_v35 = vmul.f32 0.1, %v857_v29 }
 0x21f   : > { %v985_v36 = vsel %vm921_vm5, %v801_v24, %v953_v32  ;;  %v1001_v37 = vsel %vm937_vm6, %v865_v25, %v969_v33  ;;  %v804_v38 = vadd.f32 %v5574_v30, %v6940_v21  ;;  %v868_v39 = vadd.f32 %v5590_v31, %v6940_v21  ;;  %v795_v40 = vpop.f32.mrb[3].mxu0  ;;  %v859_v41 = vpop.f32.mrb[3].mxu1 }
 0x220   : > { %1017 = vst.msk [vmem:[#allocation2 + $0x31] sm:$0xff] %vm483_vm4, %v985_v36  ;;  %1033 = vst.msk [vmem:[#allocation2 + $0xf1] sm:$0xff] %vm483_vm4, %v1001_v37  ;;  %v983_v42 = vsel %vm919_vm7, %v793_v28, %v951_v34  ;;  %v999_v43 = vsel %vm935_vm8, %v857_v29, %v967_v35  ;;  %v796_v44 = vadd.f32 %v6940_v21, %v795_v40 }
 0x221   : > { %v860_v45 = vadd.f32 %v6940_v21, %v859_v41  ;;  %1015 = vst.msk [vmem:[#allocation2 + $0x19] sm:$0xff] %vm483_vm4, %v983_v42  ;;  %1031 = vst.msk [vmem:[#allocation2 + $0xd9] sm:$0xff] %vm483_vm4, %v999_v43  ;;  %vm922_vm9 = vcmp.ge.f32.partialorder %v804_v38, 0.0  ;;  %v954_v46 = vmul.f32 0.1, %v804_v38  ;;  %vm938_vm10 = vcmp.ge.f32.partialorder %v868_v39, 0.0 }
 0x222   : > { %v970_v47 = vmul.f32 0.1, %v868_v39  ;;  %vm920_vm11 = vcmp.ge.f32.partialorder %v796_v44, 0.0  ;;  %v952_v48 = vmul.f32 0.1, %v796_v44  ;;  %v5577_v52 = vpop.f32.mrb[4].mxu0 }
 0x223   : > { %vm936_vm12 = vcmp.ge.f32.partialorder %v860_v45, 0.0  ;;  %v968_v49 = vmul.f32 0.1, %v860_v45  ;;  %v986_v50 = vsel %vm922_vm9, %v804_v38, %v954_v46  ;;  %v5593_v53 = vpop.f32.mrb[4].mxu1  ;;  %v817_v56 = vadd.f32 %v5577_v52, %v6940_v21  ;;  %v808_v58 = vpop.f32.mrb[5].mxu0 }
 0x224   : > { %v1002_v51 = vsel %vm938_vm10, %v868_v39, %v970_v47  ;;  %1018 = vst.msk [vmem:[#allocation2 + $0x39] sm:$0xff] %vm483_vm4, %v986_v50  ;;  %v984_v54 = vsel %vm920_vm11, %v796_v44, %v952_v48  ;;  %v881_v57 = vadd.f32 %v5593_v53, %v6940_v21  ;;  %v872_v59 = vpop.f32.mrb[5].mxu1  ;;  %v809_v60 = vadd.f32 %v6940_v21, %v808_v58  ;;  %v5578_v62 = vpop.f32.mrb[6].mxu0 }
 0x225   : > { %1034 = vst.msk [vmem:[#allocation2 + $0xf9] sm:$0xff] %vm483_vm4, %v1002_v51  ;;  %v1000_v55 = vsel %vm936_vm12, %v860_v45, %v968_v49  ;;  %1016 = vst.msk [vmem:[#allocation2 + $0x21] sm:$0xff] %vm483_vm4, %v984_v54  ;;  %v873_v61 = vadd.f32 %v6940_v21, %v872_v59  ;;  %v5594_v63 = vpop.f32.mrb[6].mxu1  ;;  %vm925_vm13 = vcmp.ge.f32.partialorder %v817_v56, 0.0  ;;  %v957_v0 = vmul.f32 0.1, %v817_v56 }
 0x226   : > { %1032 = vst.msk [vmem:[#allocation2 + $0xe1] sm:$0xff] %vm483_vm4, %v1000_v55  ;;  %vm941_vm14 = vcmp.ge.f32.partialorder %v881_v57, 0.0  ;;  %v973_v1 = vmul.f32 0.1, %v881_v57  ;;  %vm923_vm15 = vcmp.ge.f32.partialorder %v809_v60, 0.0  ;;  %v820_v6 = vadd.f32 %v5578_v62, %v6940_v21  ;;  %v811_v8 = vpop.f32.mrb[7].mxu0 }
 0x227   : > { %v955_v2 = vmul.f32 0.1, %v809_v60  ;;  %vm939_vm0 = vcmp.ge.f32.partialorder %v873_v61, 0.0  ;;  %v971_v3 = vmul.f32 0.1, %v873_v61  ;;  %v989_v4 = vsel %vm925_vm13, %v817_v56, %v957_v0  ;;  %v875_v9 = vpop.f32.mrb[7].mxu1 }
 0x228   : > { %v1005_v5 = vsel %vm941_vm14, %v881_v57, %v973_v1  ;;  %v884_v7 = vadd.f32 %v5594_v63, %v6940_v21  ;;  %1021 = vst.msk [vmem:[#allocation2 + $0x61] sm:$0xff] %vm483_vm4, %v989_v4  ;;  %v812_v12 = vadd.f32 %v6940_v21, %v811_v8  ;;  %v876_v13 = vadd.f32 %v6940_v21, %v875_v9 }
 0x229   : > { %1037 = vst.msk [vmem:[#allocation2 + $0x121] sm:$0xff] %vm483_vm4, %v1005_v5  ;;  %v987_v10 = vsel %vm923_vm15, %v809_v60, %v955_v2  ;;  %v1003_v11 = vsel %vm939_vm0, %v873_v61, %v971_v3  ;;  %vm926_vm1 = vcmp.ge.f32.partialorder %v820_v6, 0.0  ;;  %v958_v14 = vmul.f32 0.1, %v820_v6 }
 0x22a   : > { %1019 = vst.msk [vmem:[#allocation2 + $0x49] sm:$0xff] %vm483_vm4, %v987_v10  ;;  %1035 = vst.msk [vmem:[#allocation2 + $0x109] sm:$0xff] %vm483_vm4, %v1003_v11  ;;  %vm942_vm2 = vcmp.ge.f32.partialorder %v884_v7, 0.0  ;;  %v974_v15 = vmul.f32 0.1, %v884_v7  ;;  %vm924_vm3 = vcmp.ge.f32.partialorder %v812_v12, 0.0 }
 0x22b   : > { %v956_v16 = vmul.f32 0.1, %v812_v12  ;;  %vm940_vm5 = vcmp.ge.f32.partialorder %v876_v13, 0.0  ;;  %v972_v17 = vmul.f32 0.1, %v876_v13  ;;  %v990_v18 = vsel %vm926_vm1, %v820_v6, %v958_v14  ;;  %v5581_v20 = vpop.f32.mrb[8].mxu0 }
 0x22c   : > { %v1006_v19 = vsel %vm942_vm2, %v884_v7, %v974_v15  ;;  %v5597_v22 = vpop.f32.mrb[8].mxu1  ;;  %1022 = vst.msk [vmem:[#allocation2 + $0x69] sm:$0xff] %vm483_vm4, %v990_v18  ;;  %v833_v25 = vadd.f32 %v5581_v20, %v6940_v21  ;;  %v824_v27 = vpop.f32.mrb[9].mxu0 }
 0x22d   : > { %1038 = vst.msk [vmem:[#allocation2 + $0x129] sm:$0xff] %vm483_vm4, %v1006_v19  ;;  %v988_v23 = vsel %vm924_vm3, %v812_v12, %v956_v16  ;;  %v1004_v24 = vsel %vm940_vm5, %v876_v13, %v972_v17  ;;  %v897_v26 = vadd.f32 %v5597_v22, %v6940_v21  ;;  %v888_v28 = vpop.f32.mrb[9].mxu1  ;;  %v825_v29 = vadd.f32 %v6940_v21, %v824_v27  ;;  %v5582_v31 = vpop.f32.mrb[10].mxu0 }
 0x22e   : > { %1020 = vst.msk [vmem:[#allocation2 + $0x51] sm:$0xff] %vm483_vm4, %v988_v23  ;;  %1036 = vst.msk [vmem:[#allocation2 + $0x111] sm:$0xff] %vm483_vm4, %v1004_v24  ;;  %v889_v30 = vadd.f32 %v6940_v21, %v888_v28  ;;  %v5598_v32 = vpop.f32.mrb[10].mxu1  ;;  %vm929_vm6 = vcmp.ge.f32.partialorder %v833_v25, 0.0  ;;  %v961_v33 = vmul.f32 0.1, %v833_v25  ;;  %v836_v39 = vadd.f32 %v5582_v31, %v6940_v21 }
 0x22f   : > { %vm945_vm7 = vcmp.ge.f32.partialorder %v897_v26, 0.0  ;;  %v977_v34 = vmul.f32 0.1, %v897_v26  ;;  %vm927_vm8 = vcmp.ge.f32.partialorder %v825_v29, 0.0  ;;  %v959_v35 = vmul.f32 0.1, %v825_v29 }
 0x230   : > { %vm943_vm9 = vcmp.ge.f32.partialorder %v889_v30, 0.0  ;;  %v975_v36 = vmul.f32 0.1, %v889_v30  ;;  %v993_v37 = vsel %vm929_vm6, %v833_v25, %v961_v33  ;;  %v900_v40 = vadd.f32 %v5598_v32, %v6940_v21  ;;  %v827_v41 = vpop.f32.mrb[11].mxu0  ;;  %v891_v42 = vpop.f32.mrb[11].mxu1 }
 0x231   : > { %v1009_v38 = vsel %vm945_vm7, %v897_v26, %v977_v34  ;;  %1025 = vst.msk [vmem:[#allocation2 + $0x91] sm:$0xff] %vm483_vm4, %v993_v37  ;;  %v991_v43 = vsel %vm927_vm8, %v825_v29, %v959_v35  ;;  %v828_v45 = vadd.f32 %v6940_v21, %v827_v41  ;;  %v892_v46 = vadd.f32 %v6940_v21, %v891_v42 }
 0x232   : > { %1041 = vst.msk [vmem:[#allocation2 + $0x151] sm:$0xff] %vm483_vm4, %v1009_v38  ;;  %v1007_v44 = vsel %vm943_vm9, %v889_v30, %v975_v36  ;;  %v5585_v47 = vpop.f32.mrb[12].mxu0  ;;  %v5601_v48 = vpop.f32.mrb[12].mxu1  ;;  %1023 = vst.msk [vmem:[#allocation2 + $0x79] sm:$0xff] %vm483_vm4, %v991_v43  ;;  %vm930_vm10 = vcmp.ge.f32.partialorder %v836_v39, 0.0  ;;  %vm946_vm11 = vcmp.ge.f32.partialorder %v900_v40, 0.0 }
 0x233   : > { %1039 = vst.msk [vmem:[#allocation2 + $0x139] sm:$0xff] %vm483_vm4, %v1007_v44  ;;  %v962_v49 = vmul.f32 0.1, %v836_v39  ;;  %v978_v50 = vmul.f32 0.1, %v900_v40  ;;  %vm928_vm12 = vcmp.ge.f32.partialorder %v828_v45, 0.0  ;;  %v849_v55 = vadd.f32 %v5585_v47, %v6940_v21 }
 0x234   : > { %v960_v51 = vmul.f32 0.1, %v828_v45  ;;  %vm944_vm13 = vcmp.ge.f32.partialorder %v892_v46, 0.0  ;;  %v976_v52 = vmul.f32 0.1, %v892_v46  ;;  %v913_v56 = vadd.f32 %v5601_v48, %v6940_v21  ;;  %v840_v57 = vpop.f32.mrb[13].mxu0 }
 0x235   : > { %v994_v53 = vsel %vm930_vm10, %v836_v39, %v962_v49  ;;  %v1010_v54 = vsel %vm946_vm11, %v900_v40, %v978_v50  ;;  %v904_v58 = vpop.f32.mrb[13].mxu1  ;;  %v841_v61 = vadd.f32 %v6940_v21, %v840_v57  ;;  %v5586_v63 = vpop.f32.mrb[14].mxu0  ;;  %vm933_vm14 = vcmp.ge.f32.partialorder %v849_v55, 0.0 }
 0x236   : > { %1026 = vst.msk [vmem:[#allocation2 + $0x99] sm:$0xff] %vm483_vm4, %v994_v53  ;;  %1042 = vst.msk [vmem:[#allocation2 + $0x159] sm:$0xff] %vm483_vm4, %v1010_v54  ;;  %v992_v59 = vsel %vm928_vm12, %v828_v45, %v960_v51  ;;  %v1008_v60 = vsel %vm944_vm13, %v892_v46, %v976_v52  ;;  %v905_v62 = vadd.f32 %v6940_v21, %v904_v58  ;;  %v5602_v0 = vpop.f32.mrb[14].mxu1  ;;  %v965_v1 = vmul.f32 0.1, %v849_v55  ;;  %v843_v9 = vpop.f32.mrb[15].mxu0 }
 0x237   : > { %1024 = vst.msk [vmem:[#allocation2 + $0x81] sm:$0xff] %vm483_vm4, %v992_v59  ;;  %1040 = vst.msk [vmem:[#allocation2 + $0x141] sm:$0xff] %vm483_vm4, %v1008_v60  ;;  %vm949_vm15 = vcmp.ge.f32.partialorder %v913_v56, 0.0  ;;  %v981_v2 = vmul.f32 0.1, %v913_v56  ;;  %vm931_vm0 = vcmp.ge.f32.partialorder %v841_v61, 0.0  ;;  %v852_v7 = vadd.f32 %v5586_v63, %v6940_v21 }
 0x238   : > { %v963_v3 = vmul.f32 0.1, %v841_v61  ;;  %vm947_vm1 = vcmp.ge.f32.partialorder %v905_v62, 0.0  ;;  %v979_v4 = vmul.f32 0.1, %v905_v62  ;;  %v997_v5 = vsel %vm933_vm14, %v849_v55, %v965_v1  ;;  %v907_v10 = vpop.f32.mrb[15].mxu1 }
 0x239   : > { %v1013_v6 = vsel %vm949_vm15, %v913_v56, %v981_v2  ;;  %v916_v8 = vadd.f32 %v5602_v0, %v6940_v21  ;;  %1029 = vst.msk [vmem:[#allocation2 + $0xc1] sm:$0xff] %vm483_vm4, %v997_v5  ;;  %v844_v13 = vadd.f32 %v6940_v21, %v843_v9  ;;  %v908_v14 = vadd.f32 %v6940_v21, %v907_v10 }
 0x23a   : > { %1045 = vst.msk [vmem:[#allocation2 + $0x181] sm:$0xff] %vm483_vm4, %v1013_v6  ;;  %v995_v11 = vsel %vm931_vm0, %v841_v61, %v963_v3  ;;  %v1011_v12 = vsel %vm947_vm1, %v905_v62, %v979_v4  ;;  %vm934_vm2 = vcmp.ge.f32.partialorder %v852_v7, 0.0  ;;  %v966_v15 = vmul.f32 0.1, %v852_v7 }
 0x23b   : > { %1027 = vst.msk [vmem:[#allocation2 + $0xa9] sm:$0xff] %vm483_vm4, %v995_v11  ;;  %1043 = vst.msk [vmem:[#allocation2 + $0x169] sm:$0xff] %vm483_vm4, %v1011_v12  ;;  %vm950_vm3 = vcmp.ge.f32.partialorder %v916_v8, 0.0  ;;  %v982_v16 = vmul.f32 0.1, %v916_v8  ;;  %vm932_vm5 = vcmp.ge.f32.partialorder %v844_v13, 0.0 }
 0x23c   : > { %v964_v17 = vmul.f32 0.1, %v844_v13  ;;  %vm948_vm6 = vcmp.ge.f32.partialorder %v908_v14, 0.0  ;;  %v980_v18 = vmul.f32 0.1, %v908_v14  ;;  %v998_v19 = vsel %vm934_vm2, %v852_v7, %v966_v15 }
 0x23d   : > { %v1014_v20 = vsel %vm950_vm3, %v916_v8, %v982_v16  ;;  %1030 = vst.msk [vmem:[#allocation2 + $0xc9] sm:$0xff] %vm483_vm4, %v998_v19 }
 0x23e   : > { %1046 = vst.msk [vmem:[#allocation2 + $0x189] sm:$0xff] %vm483_vm4, %v1014_v20  ;;  %v996_v22 = vsel %vm932_vm5, %v844_v13, %v964_v17  ;;  %v1012_v21 = vsel %vm948_vm6, %v908_v14, %v980_v18 }
 0x23f   : > { %1028 = vst.msk [vmem:[#allocation2 + $0xb1] sm:$0xff] %vm483_vm4, %v996_v22  ;;  %1044 = vst.msk [vmem:[#allocation2 + $0x171] sm:$0xff] %vm483_vm4, %v1012_v21 }
 0x240 PF: > { %v1266_v24 = vld [vmem:[#allocation2 + $0x20] sm:$0xff]  ;;  %v1268_v27 = vld [vmem:[#allocation2 + $0x38] sm:$0xff]  ;;  %v1169_v29 = vld [vmem:[#allocation2 + $0x9] sm:$0xff]  ;;  %s6288_s17 = smov 64   ;;  %vm1746_vm4 = vcmask 523264   ;;  %s8497_s23 = sld [smem:[#allocation25_spill]] }
 0x241   : > { %v1265_v23 = vld [vmem:[#allocation2 + $0x18] sm:$0xff]  ;;  %v1267_v25 = vld [vmem:[#allocation2 + $0x30] sm:$0xff]  ;;  %v1168_v28 = vld [vmem:[#allocation2 + $0x1] sm:$0xff] }
 0x242   : > { %v7006_v26 = vpack.c.bf16 %v1266_v24, %v1265_v23  ;;  %v7008_v30 = vpack.c.bf16 %v1268_v27, %v1267_v25  ;;  %v1170_v31 = vld [vmem:[#allocation2 + $0x19] sm:$0xff]  ;;  %v1171_v32 = vld [vmem:[#allocation2 + $0x21] sm:$0xff]  ;;  %v1200_v33 = vpack.c.bf16 %v1169_v29, %v1168_v28  ;;  %v1270_v36 = vld [vmem:[#allocation2 + $0x50] sm:$0xff] }
 0x243   : > { %v7014_v34 = vpack.c.bf16 %v1171_v32, %v1170_v31  ;;  %v1269_v35 = vld [vmem:[#allocation2 + $0x48] sm:$0xff]  ;;  %v1172_v37 = vld [vmem:[#allocation2 + $0x31] sm:$0xff]  ;;  %v1173_v38 = vld [vmem:[#allocation2 + $0x39] sm:$0xff] }
 0x244   : > { %1618 = vrot.lane.b32.xlu0 %v7006_v26, %s6288_s17  ;;  %1620 = vrot.lane.b32.xlu1 %v7008_v30, %s6288_s17  ;;  %v7017_v39 = vpack.c.bf16 %v1270_v36, %v1269_v35  ;;  %v7021_v40 = vpack.c.bf16 %v1173_v38, %v1172_v37  ;;  %v1271_v41 = vld [vmem:[#allocation2 + $0x60] sm:$0xff]  ;;  %v1272_v42 = vld [vmem:[#allocation2 + $0x68] sm:$0xff]  ;;  %v1175_v44 = vld [vmem:[#allocation2 + $0x51] sm:$0xff] }
 0x245   : > { %v1174_v43 = vld [vmem:[#allocation2 + $0x49] sm:$0xff]  ;;  %v7025_v45 = vpack.c.bf16 %v1272_v42, %v1271_v41  ;;  %v1273_v47 = vld [vmem:[#allocation2 + $0x78] sm:$0xff]  ;;  %v1274_v48 = vld [vmem:[#allocation2 + $0x80] sm:$0xff] }
 0x246   : > { %v7029_v46 = vpack.c.bf16 %v1175_v44, %v1174_v43  ;;  %v1176_v49 = vld [vmem:[#allocation2 + $0x61] sm:$0xff]  ;;  %v1177_v50 = vld [vmem:[#allocation2 + $0x69] sm:$0xff]  ;;  %v7033_v51 = vpack.c.bf16 %v1274_v48, %v1273_v47  ;;  %v1276_v54 = vld [vmem:[#allocation2 + $0x98] sm:$0xff]  ;;  %p5050_p6 = scmp.ne.s32.totalorder %s8497_s23, 4 }
 0x247   : > { %v7037_v52 = vpack.c.bf16 %v1177_v50, %v1176_v49  ;;  %v1275_v53 = vld [vmem:[#allocation2 + $0x90] sm:$0xff]  ;;  %v1178_v55 = vld [vmem:[#allocation2 + $0x79] sm:$0xff]  ;;  %v1179_v56 = vld [vmem:[#allocation2 + $0x81] sm:$0xff] }
 0x248   : > { %1570 = vrot.lane.b32.xlu0 %v1200_v33, %s6288_s17  ;;  %1572 = vrot.lane.b32.xlu1 %v7014_v34, %s6288_s17  ;;  %v7041_v57 = vpack.c.bf16 %v1276_v54, %v1275_v53  ;;  %v7045_v58 = vpack.c.bf16 %v1179_v56, %v1178_v55  ;;  %v1277_v59 = vld [vmem:[#allocation2 + $0xa8] sm:$0xff]  ;;  %v1278_v60 = vld [vmem:[#allocation2 + $0xb0] sm:$0xff]  ;;  %v1181_v62 = vld [vmem:[#allocation2 + $0x99] sm:$0xff] }
 0x249   : > { %v1180_v61 = vld [vmem:[#allocation2 + $0x91] sm:$0xff]  ;;  %v1279_v63 = vld [vmem:[#allocation2 + $0xc0] sm:$0xff]  ;;  %v7049_v0 = vpack.c.bf16 %v1278_v60, %v1277_v59  ;;  %v1280_v1 = vld [vmem:[#allocation2 + $0xc8] sm:$0xff] }
 0x24a   : > { %v7053_v2 = vpack.c.bf16 %v1181_v62, %v1180_v61  ;;  %v5864_v3 = vld [vmem:[%s6729_s26 + $0x40] sm:$0xff]   ;;  %v1182_v4 = vld [vmem:[#allocation2 + $0xa9] sm:$0xff]  ;;  %v1282_v8 = vld [vmem:[#allocation2 + $0xe0] sm:$0xff]  ;;  %v7060_v10 = vpack.c.bf16 %v1280_v1, %v1279_v63 }
 0x24b   : > { %v1183_v5 = vld [vmem:[#allocation2 + $0xb1] sm:$0xff]  ;;  %5077 = vmatprep.subr.bf16.mxu0 %v5864_v3  ;;  %v5866_v9 = vld [vmem:[%s6729_s26 + $0x48] sm:$0xff]   ;;  %v5868_v14 = vld [vmem:[%s6729_s26 + $0x50] sm:$0xff]  }
 0x24c   : > { %1622 = vrot.lane.b32.xlu0 %v7017_v39, %s6288_s17  ;;  %1574 = vrot.lane.b32.xlu1 %v7021_v40, %s6288_s17  ;;  %v5865_v6 = vld [vmem:[%s6729_s26] sm:$0xff]   ;;  %v1184_v11 = vld [vmem:[#allocation2 + $0xc1] sm:$0xff]  ;;  %v7065_v13 = vpack.c.bf16 %v1183_v5, %v1182_v4  ;;  %v1185_v15 = vld [vmem:[#allocation2 + $0xc9] sm:$0xff] }
 0x24d   : > { %v1281_v7 = vld [vmem:[#allocation2 + $0xd8] sm:$0xff]  ;;  %5078 = vmatpush3.bf16.msra.mxu0 %v5865_v6  ;;  %v1283_v16 = vld [vmem:[#allocation2 + $0xf0] sm:$0xff]  ;;  %v5869_v20 = vld [vmem:[%s6729_s26 + $0x10] sm:$0xff]   ;;  %v7075_v22 = vpack.c.bf16 %v1185_v15, %v1184_v11 }
 0x24e   : > { %v5867_v12 = vld [vmem:[%s6729_s26 + $0x8] sm:$0xff]   ;;  %5079 = vmatprep.subr.bf16.mxu0 %v5866_v9  ;;  %v7070_v18 = vpack.c.bf16 %v1282_v8, %v1281_v7  ;;  %v5870_v21 = vld [vmem:[%s6729_s26 + $0x58] sm:$0xff]   ;;  %v5872_v32 = vld [vmem:[%s6729_s26 + $0x60] sm:$0xff]  }
 0x24f   : > { %v1284_v17 = vld [vmem:[#allocation2 + $0xf8] sm:$0xff]  ;;  %v1187_v23 = vld [vmem:[#allocation2 + $0xe1] sm:$0xff]  ;;  %v1286_v25 = vld [vmem:[#allocation2 + $0x110] sm:$0xff] }
 0x250   : > { %1624 = vrot.lane.b32.xlu0 %v7025_v45, %s6288_s17  ;;  %1576 = vrot.lane.b32.xlu1 %v7029_v46, %s6288_s17  ;;  %v1186_v19 = vld [vmem:[#allocation2 + $0xd9] sm:$0xff]  ;;  %v1285_v24 = vld [vmem:[#allocation2 + $0x108] sm:$0xff]  ;;  %v7080_v27 = vpack.c.bf16 %v1284_v17, %v1283_v16  ;;  %v1188_v28 = vld [vmem:[#allocation2 + $0xf1] sm:$0xff] }
 0x251   : > { %5080 = vmatpush3.bf16.msra.mxu0 %v5867_v12  ;;  %v5871_v29 = vld [vmem:[%s6729_s26 + $0x18] sm:$0xff]   ;;  %v7085_v31 = vpack.c.bf16 %v1187_v23, %v1186_v19  ;;  %v1189_v33 = vld [vmem:[#allocation2 + $0xf9] sm:$0xff]  ;;  %v1307_v36 = vpack.c.bf16 %v1286_v25, %v1285_v24  ;;  %v5876_v54 = vld [vmem:[%s6729_s26 + $0x70] sm:$0xff]  }
 0x252   : > { %5081 = vmatprep.subr.bf16.mxu0 %v5868_v14  ;;  %v1287_v35 = vld [vmem:[#allocation2 + $0x120] sm:$0xff]  ;;  %v1288_v37 = vld [vmem:[#allocation2 + $0x128] sm:$0xff]  ;;  %v5873_v41 = vld [vmem:[%s6729_s26 + $0x20] sm:$0xff]   ;;  %v7093_v42 = vpack.c.bf16 %v1189_v33, %v1188_v28 }
 0x253   : > { %v1190_v38 = vld [vmem:[#allocation2 + $0x109] sm:$0xff]  ;;  %v5874_v43 = vld [vmem:[%s6729_s26 + $0x68] sm:$0xff]   ;;  %v1191_v44 = vld [vmem:[#allocation2 + $0x111] sm:$0xff]  ;;  %v1308_v47 = vpack.c.bf16 %v1288_v37, %v1287_v35 }
 0x254   : > { %1626 = vrot.lane.b32.xlu0 %v7033_v51, %s6288_s17  ;;  %1578 = vrot.lane.b32.xlu1 %v7037_v52, %s6288_s17  ;;  %v5875_v48 = vld [vmem:[%s6729_s26 + $0x28] sm:$0xff]   ;;  %v7100_v49 = vpack.c.bf16 %v1191_v44, %v1190_v38  ;;  %v1193_v56 = vld [vmem:[#allocation2 + $0x129] sm:$0xff]  ;;  %v5881_v3 = vld [vmem:[%s6729_s26 + $0xc0] sm:$0xff]  }
 0x255   : > { %5082 = vmatpush3.bf16.msra.mxu0 %v5869_v20  ;;  %v1289_v50 = vld [vmem:[#allocation2 + $0x138] sm:$0xff]  ;;  %v1290_v53 = vld [vmem:[#allocation2 + $0x140] sm:$0xff]  ;;  %v1291_v59 = vld [vmem:[#allocation2 + $0x150] sm:$0xff]  ;;  %5189 = vmatprep.subr.bf16.mxu1 %v5881_v3 }
 0x256   : > { %5083 = vmatprep.subr.bf16.mxu0 %v5870_v21  ;;  %v1192_v55 = vld [vmem:[#allocation2 + $0x121] sm:$0xff]  ;;  %v1292_v60 = vld [vmem:[#allocation2 + $0x158] sm:$0xff]  ;;  %v5878_v62 = vld [vmem:[%s6729_s26 + $0x78] sm:$0xff]   ;;  %v1309_v63 = vpack.c.bf16 %v1290_v53, %v1289_v50 }
 0x257   : > { %v5877_v61 = vld [vmem:[%s6729_s26 + $0x30] sm:$0xff]   ;;  %v1194_v1 = vld [vmem:[#allocation2 + $0x139] sm:$0xff]  ;;  %v7109_v4 = vpack.c.bf16 %v1193_v56, %v1192_v55  ;;  %v1294_v8 = vld [vmem:[#allocation2 + $0x170] sm:$0xff]  ;;  %v1310_v12 = vpack.c.bf16 %v1292_v60, %v1291_v59 }
 0x258   : > { %1628 = vrot.lane.b32.xlu0 %v7041_v57, %s6288_s17  ;;  %1580 = vrot.lane.b32.xlu1 %v7045_v58, %s6288_s17  ;;  %v5882_v5 = vld [vmem:[%s6729_s26 + $0x80] sm:$0xff]   ;;  %v1195_v6 = vld [vmem:[#allocation2 + $0x141] sm:$0xff]  ;;  %v5879_v9 = vld [vmem:[%s6729_s26 + $0x38] sm:$0xff]  }
 0x259   : > { %5084 = vmatpush3.bf16.msra.mxu0 %v5871_v29  ;;  %v1293_v7 = vld [vmem:[#allocation2 + $0x168] sm:$0xff]  ;;  %v7114_v11 = vld [vmem:[%s6729_s26 + $0x100] sm:$0xff]   ;;  %5190 = vmatpush3.bf16.msra.mxu1 %v5882_v5  ;;  %v5884_v16 = vld [vmem:[%s6729_s26 + $0xc8] sm:$0xff]   ;;  %v7120_v17 = vpack.c.bf16 %v1195_v6, %v1194_v1 }
 0x25a   : > { %5085 = vmatprep.subr.bf16.mxu0 %v5872_v32  ;;  %v1196_v14 = vld [vmem:[#allocation2 + $0x151] sm:$0xff]  ;;  %v1197_v15 = vld [vmem:[#allocation2 + $0x159] sm:$0xff]  ;;  %5191 = vmatprep.subr.bf16.mxu1 %v5884_v16  ;;  %v5886_v20 = vld [vmem:[%s6729_s26 + $0xd0] sm:$0xff]   ;;  %v1311_v25 = vpack.c.bf16 %v1294_v8, %v1293_v7 }
 0x25b   : > { %v5885_v19 = vld [vmem:[%s6729_s26 + $0x88] sm:$0xff]   ;;  %v1296_v23 = vld [vmem:[#allocation2 + $0x188] sm:$0xff]  ;;  %v7128_v29 = vpack.c.bf16 %v1197_v15, %v1196_v14  ;;  %v1199_v33 = vld [vmem:[#allocation2 + $0x171] sm:$0xff] }
 0x25c   : > { %1630 = vrot.lane.b32.xlu0 %v7049_v0, %s6288_s17  ;;  %1582 = vrot.lane.b32.xlu1 %v7053_v2, %s6288_s17  ;;  %v1295_v21 = vld [vmem:[#allocation2 + $0x180] sm:$0xff]  ;;  %v1198_v28 = vld [vmem:[#allocation2 + $0x169] sm:$0xff]  ;;  %v5890_v37 = vld [vmem:[%s6729_s26 + $0xe0] sm:$0xff]  }
 0x25d   : > { %5086 = vmatpush3.bf16.msra.mxu0 %v5873_v41  ;;  %5192 = vmatpush3.bf16.msra.mxu1 %v5885_v19  ;;  %v5887_v24 = vld [vmem:[%s6729_s26 + $0x90] sm:$0xff]   ;;  %v5888_v32 = vld [vmem:[%s6729_s26 + $0xd8] sm:$0xff]   ;;  %v7137_v38 = vpack.c.bf16 %v1199_v33, %v1198_v28  ;;  %v1361_v41 = vld [vmem:[#allocation2 + $0x1a] sm:$0xff] }
 0x25e   : > { %5087 = vmatprep.subr.bf16.mxu0 %v5874_v43  ;;  %5193 = vmatprep.subr.bf16.mxu1 %v5886_v20  ;;  %v5889_v35 = vld [vmem:[%s6729_s26 + $0x98] sm:$0xff]   ;;  %v1362_v43 = vld [vmem:[#allocation2 + $0x22] sm:$0xff]  ;;  %v5891_v44 = vld [vmem:[%s6729_s26 + $0xa0] sm:$0xff]  }
 0x25f   : > { %v1363_v50 = vld [vmem:[#allocation2 + $0x32] sm:$0xff]  ;;  %v1364_v53 = vld [vmem:[#allocation2 + $0x3a] sm:$0xff]  ;;  %v5894_v55 = vld [vmem:[%s6729_s26 + $0xf0] sm:$0xff]  }
 0x260   : > { %1632 = vrot.lane.b32.xlu0 %v7060_v10, %s6288_s17  ;;  %1584 = vrot.lane.b32.xlu1 %v7065_v13, %s6288_s17  ;;  %v7152_v56 = vpack.c.bf16 %v1364_v53, %v1363_v50  ;;  %v1365_v59 = vld [vmem:[#allocation2 + $0x4a] sm:$0xff]  ;;  %v1366_v60 = vld [vmem:[#allocation2 + $0x52] sm:$0xff]  ;;  %v1369_v5 = vld [vmem:[#allocation2 + $0x7a] sm:$0xff] }
 0x261   : > { %5088 = vmatpush3.bf16.msra.mxu0 %v5875_v48  ;;  %5194 = vmatpush3.bf16.msra.mxu1 %v5887_v24  ;;  %v7144_v48 = vpack.c.bf16 %v1362_v43, %v1361_v41  ;;  %v5896_v1 = vld [vmem:[%s6729_s26 + $0xf8] sm:$0xff]   ;;  %v1370_v6 = vld [vmem:[#allocation2 + $0x82] sm:$0xff]  ;;  %v1372_v8 = vld [vmem:[#allocation2 + $0x9a] sm:$0xff] }
 0x262   : > { %5089 = vmatprep.subr.bf16.mxu0 %v5876_v54  ;;  %5195 = vmatprep.subr.bf16.mxu1 %v5888_v32  ;;  %v5893_v54 = vld [vmem:[%s6729_s26 + $0xa8] sm:$0xff]   ;;  %v5897_v3 = vld [vmem:[%s6729_s26 + $0xb8] sm:$0xff]  }
 0x263   : > { %v1371_v7 = vld [vmem:[#allocation2 + $0x92] sm:$0xff]  ;;  %v1376_v16 = vld [vmem:[#allocation2 + $0xca] sm:$0xff]  ;;  %v1378_v20 = vld [vmem:[#allocation2 + $0xe2] sm:$0xff] }
 0x264   : > { %1634 = vrot.lane.b32.xlu0 %v7070_v18, %s6288_s17  ;;  %1586 = vrot.lane.b32.xlu1 %v7075_v22, %s6288_s17  ;;  %v1374_v14 = vld [vmem:[#allocation2 + $0xb2] sm:$0xff]  ;;  %v1383_v28 = vld [vmem:[#allocation2 + $0x122] sm:$0xff]  ;;  %v1384_v32 = vld [vmem:[#allocation2 + $0x12a] sm:$0xff] }
 0x265   : > { %5090 = vmatpush3.bf16.msra.mxu0 %v5877_v61  ;;  %5196 = vmatpush3.bf16.msra.mxu1 %v5889_v35  ;;  %v5895_v61 = vld [vmem:[%s6729_s26 + $0xb0] sm:$0xff]   ;;  %v1385_v33 = vld [vmem:[#allocation2 + $0x13a] sm:$0xff]  ;;  %v1387_v41 = vld [vmem:[#allocation2 + $0x152] sm:$0xff] }
 0x266   : > { %5091 = vmatprep.subr.bf16.mxu0 %v5878_v62  ;;  %5197 = vmatprep.subr.bf16.mxu1 %v5890_v37  ;;  %v1367_v62 = vld [vmem:[#allocation2 + $0x62] sm:$0xff]  ;;  %v1217_v37 = vld [vmem:[#allocation2 + $0xa] sm:$0xff]  ;;  %v1388_v43 = vld [vmem:[#allocation2 + $0x15a] sm:$0xff] }
 0x267   : > { %v1386_v35 = vld [vmem:[#allocation2 + $0x142] sm:$0xff]  ;;  %v7227_v50 = vpack.c.bf16 %v1388_v43, %v1387_v41 }
 0x268   : > { %1636 = vrot.lane.b32.xlu0 %v7080_v27, %s6288_s17  ;;  %1588 = vrot.lane.b32.xlu1 %v7085_v31, %s6288_s17  ;;  %v1487_v53 = vld [vmem:[#allocation2 + $0x189] sm:$0xff] }
 0x269   : > { %5092 = vmatpush3.bf16.msra.mxu0 %v5879_v9  ;;  %5198 = vmatpush3.bf16.msra.mxu1 %v5891_v44  ;;  %v7173_v9 = vpack.c.bf16 %v1370_v6, %v1369_v5  ;;  %v1120_v44 = vld [vmem:[#allocation2] sm:$0xff] }
 0x26a   : > { %5603 = vmatprep.subr.bf16.mxu0 %v7114_v11  ;;  %v5883_v6 = vld [vmem:[%s6729_s26 + $0x108] sm:$0xff]  }
 0x26c   : > { %1638 = vrot.lane.b32.xlu0 %v1307_v36, %s6288_s17  ;;  %1590 = vrot.lane.b32.xlu1 %v7093_v42, %s6288_s17  ;;  %v1312_v36 = vpack.c.bf16 %v1296_v23, %v1295_v21  ;;  %v1380_v21 = vld [vmem:[#allocation2 + $0xfa] sm:$0xff] }
 0x270   : > { %1640 = vrot.lane.b32.xlu0 %v1308_v47, %s6288_s17  ;;  %1592 = vrot.lane.b32.xlu1 %v7100_v49, %s6288_s17  ;;  %v5892_v47 = vld [vmem:[%s6729_s26 + $0xe8] sm:$0xff]  }
 0x271   : > { %5199 = vmatprep.subr.bf16.mxu1 %v5892_v47  ;;  %v1121_v47 = vld [vmem:[#allocation2 + $0x8] sm:$0xff] }
 0x272   : > { %5200 = vmatpush3.bf16.msra.mxu1 %v5893_v54 }
 0x273   : > { %5201 = vmatprep.subr.bf16.mxu1 %v5894_v55 }
 0x274   : > { %1642 = vrot.lane.b32.xlu0 %v1309_v63, %s6288_s17  ;;  %1594 = vrot.lane.b32.xlu1 %v7109_v4, %s6288_s17  ;;  %v1368_v63 = vld [vmem:[#allocation2 + $0x6a] sm:$0xff] }
 0x276   : > { %5202 = vmatpush3.bf16.msra.mxu1 %v5895_v61  ;;  %v1389_v61 = vld [vmem:[#allocation2 + $0x16a] sm:$0xff] }
 0x277   : > { %5203 = vmatprep.subr.bf16.mxu1 %v5896_v1  ;;  %v1489_v1 = vld [vmem:[#allocation2 + $0x1a1] sm:$0xff] }
 0x278   : > { %1644 = vrot.lane.b32.xlu0 %v1310_v12, %s6288_s17  ;;  %1596 = vrot.lane.b32.xlu1 %v7120_v17, %s6288_s17  ;;  %v7179_v12 = vpack.c.bf16 %v1372_v8, %v1371_v7 }
 0x27a   : > { %5204 = vmatpush3.bf16.msra.mxu1 %v5897_v3 }
 0x27c   : > { %1646 = vrot.lane.b32.xlu0 %v1311_v25, %s6288_s17  ;;  %1598 = vrot.lane.b32.xlu1 %v7128_v29, %s6288_s17  ;;  %v1382_v25 = vld [vmem:[#allocation2 + $0x112] sm:$0xff] }
 0x280   : > { %1648 = vrot.lane.b32.xlu0 %v1312_v36, %s6288_s17  ;;  %1600 = vrot.lane.b32.xlu1 %v7137_v38, %s6288_s17  ;;  %v1216_v36 = vld [vmem:[#allocation2 + $0x2] sm:$0xff] }
 0x284   : > { %1714 = vrot.lane.b32.xlu0 %v7021_v40, %s6288_s17  ;;  %1666 = vrot.lane.b32.xlu1 %v7144_v48, %s6288_s17  ;;  %v7160_v40 = vpack.c.bf16 %v1366_v60, %v1365_v59  ;;  %v1152_v60 = vpack.c.bf16 %v1121_v47, %v1120_v44 }
 0x288   : > { %1716 = vrot.lane.b32.xlu0 %v7029_v46, %s6288_s17  ;;  %1668 = vrot.lane.b32.xlu1 %v7152_v56, %s6288_s17  ;;  %v7167_v46 = vpack.c.bf16 %v1368_v63, %v1367_v62  ;;  %v1390_v62 = vld [vmem:[#allocation2 + $0x172] sm:$0xff] }
 0x289   : > { %v1488_v63 = vld [vmem:[#allocation2 + $0x199] sm:$0xff]  ;;  %v7239_v7 = vpack.c.bf16 %v1390_v62, %v1389_v61 }
 0x28c   : > { %1718 = vrot.lane.b32.xlu0 %v7037_v52, %s6288_s17  ;;  %1670 = vrot.lane.b32.xlu1 %v7160_v40, %s6288_s17  ;;  %v1373_v52 = vld [vmem:[#allocation2 + $0xaa] sm:$0xff] }
 0x28d   : > { %v7185_v15 = vpack.c.bf16 %v1374_v14, %v1373_v52  ;;  %v1391_v14 = vld [vmem:[#allocation2 + $0x182] sm:$0xff] }
 0x290   : > { %1720 = vrot.lane.b32.xlu0 %v7045_v58, %s6288_s17  ;;  %1672 = vrot.lane.b32.xlu1 %v7167_v46, %s6288_s17  ;;  %v1375_v58 = vld [vmem:[#allocation2 + $0xc2] sm:$0xff] }
 0x291   : > { %v7191_v19 = vpack.c.bf16 %v1376_v16, %v1375_v58  ;;  %v1505_v58 = vpack.c.bf16 %v1489_v1, %v1488_v63 }
 0x294   : > { %1722 = vrot.lane.b32.xlu0 %v7053_v2, %s6288_s17  ;;  %1674 = vrot.lane.b32.xlu1 %v7173_v9, %s6288_s17  ;;  %v1377_v2 = vld [vmem:[#allocation2 + $0xda] sm:$0xff] }
 0x295   : > { %v7197_v23 = vpack.c.bf16 %v1378_v20, %v1377_v2 }
 0x298   : > { %1724 = vrot.lane.b32.xlu0 %v7065_v13, %s6288_s17  ;;  %1676 = vrot.lane.b32.xlu1 %v7179_v12, %s6288_s17  ;;  %v1379_v13 = vld [vmem:[#allocation2 + $0xf2] sm:$0xff] }
 0x299   : > { %v7203_v24 = vpack.c.bf16 %v1380_v21, %v1379_v13 }
 0x29c   : > { %1726 = vrot.lane.b32.xlu0 %v7075_v22, %s6288_s17  ;;  %1678 = vrot.lane.b32.xlu1 %v7185_v15, %s6288_s17  ;;  %v1381_v22 = vld [vmem:[#allocation2 + $0x10a] sm:$0xff] }
 0x2a0   : > { %1728 = vrot.lane.b32.xlu0 %v7085_v31, %s6288_s17  ;;  %1680 = vrot.lane.b32.xlu1 %v7191_v19, %s6288_s17  ;;  %v7209_v31 = vpack.c.bf16 %v1382_v25, %v1381_v22  ;;  %v5899_v22 = vld [vmem:[%s6729_s26 + $0x118] sm:$0xff]  }
 0x2a4   : > { %1730 = vrot.lane.b32.xlu0 %v7093_v42, %s6288_s17  ;;  %1682 = vrot.lane.b32.xlu1 %v7197_v23, %s6288_s17  ;;  %v7215_v42 = vpack.c.bf16 %v1384_v32, %v1383_v28 }
 0x2a8   : > { %1732 = vrot.lane.b32.xlu0 %v7100_v49, %s6288_s17  ;;  %1684 = vrot.lane.b32.xlu1 %v7203_v24, %s6288_s17  ;;  %v7221_v49 = vpack.c.bf16 %v1386_v35, %v1385_v33 }
 0x2ac   : > { %1734 = vrot.lane.b32.xlu0 %v7109_v4, %s6288_s17  ;;  %1686 = vrot.lane.b32.xlu1 %v7209_v31, %s6288_s17  ;;  %v1248_v4 = vpack.c.bf16 %v1217_v37, %v1216_v36 }
 0x2b0   : > { %1736 = vrot.lane.b32.xlu0 %v7120_v17, %s6288_s17  ;;  %1688 = vrot.lane.b32.xlu1 %v7215_v42, %s6288_s17  ;;  %v1486_v17 = vld [vmem:[#allocation2 + $0x181] sm:$0xff] }
 0x2b4   : > { %1738 = vrot.lane.b32.xlu0 %v7128_v29, %s6288_s17  ;;  %1690 = vrot.lane.b32.xlu1 %v7221_v49, %s6288_s17  ;;  %v7232_v29 = vpack.c.bf16 %v1487_v53, %v1486_v17 }
 0x2b6   : > { %v1619_v54 = vpop.permute.xlu0 %1618  ;;  %v1621_v55 = vpop.permute.xlu1 %1620 }
 0x2b7   : > { %v1813_v59 = vsel %vm1746_vm4, %v1248_v4, %v1619_v54  ;;  %v1817_v5 = vsel %vm1746_vm4, %v7144_v48, %v1621_v55  ;;  %v5898_v48 = vld [vmem:[%s6729_s26 + $0x110] sm:$0xff]  }
 0x2b8   : > { %2305 = vmatprep.mubr.bf16.mxu0 %v1813_v59  ;;  %1740 = vrot.lane.b32.xlu0 %v7137_v38, %s6288_s17  ;;  %v1392_v38 = vld [vmem:[#allocation2 + $0x18a] sm:$0xff] }
 0x2b9   : > { %1692 = vrot.lane.b32.xlu1 %v7227_v50, %s6288_s17  ;;  %v7248_v2 = vpack.c.bf16 %v1392_v38, %v1391_v14  ;;  %v1413_v14 = vld [vmem:[#allocation2 + $0x50] sm:$0xff] }
 0x2ba   : > { %v1571_v3 = vpop.permute.xlu0 %1570  ;;  %v1573_v8 = vpop.permute.xlu1 %1572 }
 0x2bb   : > { %v1749_v52 = vsel %vm1746_vm4, %v1152_v60, %v1571_v3  ;;  %v1753_v13 = vsel %vm1746_vm4, %v7006_v26, %v1573_v8 }
 0x2bc   : > { %2306 = vmatmul.mubr.bf16.vlgmr.msra.gmra.mrb[0].mxu0 %v1749_v52  ;;  %1742 = vrot.lane.b32.xlu0 %v7232_v29, %s6288_s17 }
 0x2bd   : > { %5604 = vmatpush3.bf16.msra.mxu0 %v7114_v11  ;;  %2313 = vmatprep.mubr.bf16.mxu0 %v1817_v5 }
 0x2be   : > { %v1623_v16 = vpop.permute.xlu0 %1622  ;;  %5605 = vmatprep.subr.bf16.mxu0 %v5883_v6  ;;  %1694 = vrot.lane.b32.xlu1 %v7239_v7, %s6288_s17  ;;  %v1575_v20 = vpop.permute.xlu1 %1574 }
 0x2bf   : > { %v1821_v11 = vsel %vm1746_vm4, %v7152_v56, %v1623_v16  ;;  %v1757_v26 = vsel %vm1746_vm4, %v7008_v30, %v1575_v20  ;;  %v1315_v20 = vld [vmem:[#allocation2 + $0x31] sm:$0xff] }
 0x2c0   : > { %1744 = vrot.lane.b32.xlu0 %v1505_v58, %s6288_s17 }
 0x2c1   : > { %5606 = vmatpush3.bf16.msra.mxu0 %v5883_v6 }
 0x2c2   : > { %v1625_v21 = vpop.permute.xlu0 %1624  ;;  %5607 = vmatprep.subr.bf16.mxu0 %v5898_v48  ;;  %1696 = vrot.lane.b32.xlu1 %v7248_v2, %s6288_s17  ;;  %v1577_v25 = vpop.permute.xlu1 %1576 }
 0x2c3   : > { %v1825_v56 = vsel %vm1746_vm4, %v7160_v40, %v1625_v21  ;;  %v1761_v41 = vsel %vm1746_vm4, %v7017_v39, %v1577_v25  ;;  %v1414_v21 = vld [vmem:[#allocation2 + $0x60] sm:$0xff] }
 0x2c4   : > { %2314 = vmatmul.mubr.bf16.gmra.mrb[4].mxu0 %v1753_v13  ;;  %v1316_v13 = vld [vmem:[#allocation2 + $0x39] sm:$0xff] }
 0x2c5   : > { %2321 = vmatprep.mubr.bf16.mxu0 %v1821_v11  ;;  %5608 = vmatpush3.bf16.msra.mxu0 %v5898_v48  ;;  %v1415_v11 = vld [vmem:[#allocation2 + $0x68] sm:$0xff] }
 0x2c6   : > { %v1627_v28 = vpop.permute.xlu0 %1626  ;;  %5609 = vmatprep.subr.bf16.mxu0 %v5899_v22  ;;  %v1579_v32 = vpop.permute.xlu1 %1578 }
 0x2c7   : > { %v1829_v4 = vsel %vm1746_vm4, %v7167_v46, %v1627_v28  ;;  %v1765_v40 = vsel %vm1746_vm4, %v7025_v45, %v1579_v32  ;;  %v1346_v28 = vpack.c.bf16 %v1316_v13, %v1315_v20  ;;  %v1420_v20 = vld [vmem:[#allocation2 + $0xa8] sm:$0xff]  ;;  %v1421_v13 = vld [vmem:[#allocation2 + $0xb0] sm:$0xff] }
 0x2c9   : > { %5610 = vmatpush3.bf16.msra.mxu0 %v5899_v22 }
 0x2ca   : > { %v1629_v33 = vpop.permute.xlu0 %1628  ;;  %v1581_v35 = vpop.permute.xlu1 %1580 }
 0x2cb   : > { %v1833_v54 = vsel %vm1746_vm4, %v7173_v9, %v1629_v33  ;;  %v1769_v46 = vsel %vm1746_vm4, %v7033_v51, %v1581_v35  ;;  %v1444_v33 = vpack.c.bf16 %v1415_v11, %v1414_v21  ;;  %v1144_v11 = vld [vmem:[#allocation2 + $0x120] sm:$0xff] }
 0x2cc   : > { %2322 = vmatmul.mubr.bf16.gmra.mrb[8].mxu0 %v1757_v26 }
 0x2cd   : > { %2329 = vmatprep.mubr.bf16.mxu0 %v1825_v56 }
 0x2ce   : > { %v1631_v36 = vpop.permute.xlu0 %1630  ;;  %v1583_v37 = vpop.permute.xlu1 %1582 }
 0x2cf   : > { %v1837_v61 = vsel %vm1746_vm4, %v7179_v12, %v1631_v36  ;;  %v1773_v63 = vsel %vm1746_vm4, %v7041_v57, %v1583_v37  ;;  %v1317_v36 = vld [vmem:[#allocation2 + $0x49] sm:$0xff]  ;;  %v1318_v37 = vld [vmem:[#allocation2 + $0x51] sm:$0xff] }
 0x2d2   : > { %v1633_v43 = vpop.permute.xlu0 %1632  ;;  %v1585_v44 = vpop.permute.xlu1 %1584 }
 0x2d3   : > { %v1841_v51 = vsel %vm1746_vm4, %v7185_v15, %v1633_v43  ;;  %v1777_v6 = vsel %vm1746_vm4, %v7049_v0, %v1585_v44  ;;  %v1412_v15 = vld [vmem:[#allocation2 + $0x48] sm:$0xff] }
 0x2d4   : > { %2330 = vmatmul.mubr.bf16.gmra.mrb[12].mxu0 %v1761_v41  ;;  %v1443_v48 = vpack.c.bf16 %v1413_v14, %v1412_v15  ;;  %v1417_v41 = vld [vmem:[#allocation2 + $0x80] sm:$0xff] }
 0x2d5   : > { %2337 = vmatprep.mubr.bf16.mxu0 %v1829_v4  ;;  %v1347_v4 = vpack.c.bf16 %v1318_v37, %v1317_v36 }
 0x2d6   : > { %v1635_v47 = vpop.permute.xlu0 %1634  ;;  %v1587_v17 = vpop.permute.xlu1 %1586 }
 0x2d7   : > { %v1845_v57 = vsel %vm1746_vm4, %v7191_v19, %v1635_v47  ;;  %v1781_v22 = vsel %vm1746_vm4, %v7060_v10, %v1587_v17  ;;  %v1416_v10 = vld [vmem:[#allocation2 + $0x78] sm:$0xff] }
 0x2d8   : > { %v1445_v17 = vpack.c.bf16 %v1417_v41, %v1416_v10  ;;  %v1146_v10 = vld [vmem:[#allocation2 + $0x138] sm:$0xff]  ;;  %v1147_v41 = vld [vmem:[#allocation2 + $0x140] sm:$0xff] }
 0x2da   : > { %v1637_v53 = vpop.permute.xlu0 %1636  ;;  %v1589_v55 = vpop.permute.xlu1 %1588 }
 0x2db   : > { %v1849_v32 = vsel %vm1746_vm4, %v7197_v23, %v1637_v53  ;;  %v1785_v43 = vsel %vm1746_vm4, %v7070_v18, %v1589_v55 }
 0x2dc   : > { %2338 = vmatmul.mubr.bf16.gmra.mrb[16].mxu0 %v1765_v40 }
 0x2dd   : > { %2345 = vmatprep.mubr.bf16.mxu0 %v1833_v54 }
 0x2de   : > { %v1639_v39 = vpop.permute.xlu0 %1638  ;;  %v7270_v59 = vpop.permute.xlu1 %1590 }
 0x2df   : > { %v1853_v44 = vsel %vm1746_vm4, %v7203_v24, %v1639_v39  ;;  %v1789_v18 = vsel %vm1746_vm4, %v7080_v27, %v7270_v59  ;;  %v1321_v27 = vld [vmem:[#allocation2 + $0x79] sm:$0xff]  ;;  %v1322_v59 = vld [vmem:[#allocation2 + $0x81] sm:$0xff] }
 0x2e2   : > { %v7274_v60 = vpop.permute.xlu0 %1640  ;;  %v7278_v62 = vpop.permute.xlu1 %1592 }
 0x2e3   : > { %v1857_v39 = vsel %vm1746_vm4, %v7209_v31, %v7274_v60 }
 0x2e4   : > { %2346 = vmatmul.mubr.bf16.gmra.mrb[20].mxu0 %v1769_v46  ;;  %v1319_v46 = vld [vmem:[#allocation2 + $0x61] sm:$0xff] }
 0x2e5   : > { %2353 = vmatprep.mubr.bf16.mxu0 %v1837_v61  ;;  %v1320_v61 = vld [vmem:[#allocation2 + $0x69] sm:$0xff] }
 0x2e6   : > { %v7280_v45 = vpop.permute.xlu0 %1642  ;;  %v7282_v9 = vpop.permute.xlu1 %1594  ;;  %v1348_v55 = vpack.c.bf16 %v1320_v61, %v1319_v46  ;;  %v1425_v46 = vld [vmem:[#allocation2 + $0xe0] sm:$0xff] }
 0x2e7   : > { %v1861_v21 = vsel %vm1746_vm4, %v7215_v42, %v7280_v45 }
 0x2ea   : > { %v7286_v1 = vpop.permute.xlu0 %1644  ;;  %v7290_v3 = vpop.permute.xlu1 %1596 }
 0x2eb   : > { %v1865_v37 = vsel %vm1746_vm4, %v7221_v49, %v7286_v1 }
 0x2ec   : > { %2354 = vmatmul.mubr.bf16.gmra.mrb[24].mxu0 %v1773_v63  ;;  %v1418_v63 = vld [vmem:[#allocation2 + $0x90] sm:$0xff] }
 0x2ed   : > { %2361 = vmatprep.mubr.bf16.mxu0 %v1841_v51  ;;  %v1419_v51 = vld [vmem:[#allocation2 + $0x98] sm:$0xff] }
 0x2ee   : > { %v7292_v12 = vpop.permute.xlu0 %1646  ;;  %v7294_v5 = vpop.permute.xlu1 %1598  ;;  %v1446_v14 = vpack.c.bf16 %v1419_v51, %v1418_v63  ;;  %v1148_v51 = vld [vmem:[#allocation2 + $0x150] sm:$0xff] }
 0x2ef   : > { %v1869_v63 = vsel %vm1746_vm4, %v7227_v50, %v7292_v12 }
 0x2f2   : > { %v7298_v8 = vpop.permute.xlu0 %1648  ;;  %v7302_v52 = vpop.permute.xlu1 %1600 }
 0x2f4   : > { %2362 = vmatmul.mubr.bf16.gmra.mrb[28].mxu0 %v1777_v6  ;;  %v1142_v6 = vld [vmem:[#allocation2 + $0x108] sm:$0xff] }
 0x2f5   : > { %2369 = vmatprep.mubr.bf16.mxu0 %v1845_v57  ;;  %v1143_v57 = vld [vmem:[#allocation2 + $0x110] sm:$0xff] }
 0x2f6   : > { %v1715_v38 = vpop.permute.xlu0 %1714  ;;  %v1667_v58 = vpop.permute.xlu1 %1666 }
 0x2f7   : > { %v1941_v16 = vsel %vm1746_vm4, %v7008_v30, %v1715_v38  ;;  %v1877_v0 = vsel %vm1746_vm4, %v7014_v34, %v1667_v58  ;;  %v7327_v58 = vpack.c.bf16 %v1143_v57, %v1142_v6 }
 0x2f8   : > { %2466 = vmatprep.mubr.bf16.mxu1 %v1941_v16 }
 0x2f9   : > { %2467 = vmatmul.mubr.bf16.vlgmr.msra.gmra.mrb[0].mxu1 %v1877_v0  ;;  %v1793_v60 = vsel %vm1746_vm4, %v7327_v58, %v7278_v62  ;;  %v1349_v0 = vpack.c.bf16 %v1322_v59, %v1321_v27  ;;  %v1323_v62 = vld [vmem:[#allocation2 + $0x91] sm:$0xff]  ;;  %v1873_v59 = vsel %vm1746_vm4, %v7239_v7, %v7298_v8 }
 0x2fa   : > { %v1717_v25 = vpop.permute.xlu0 %1716  ;;  %v1669_v26 = vpop.permute.xlu1 %1668 }
 0x2fb   : > { %v1945_v30 = vsel %vm1746_vm4, %v1443_v48, %v1717_v25  ;;  %v1881_v34 = vsel %vm1746_vm4, %v1346_v28, %v1669_v26  ;;  %v1447_v28 = vpack.c.bf16 %v1421_v13, %v1420_v20  ;;  %v1150_v20 = vld [vmem:[#allocation2 + $0x168] sm:$0xff]  ;;  %v1151_v13 = vld [vmem:[#allocation2 + $0x170] sm:$0xff] }
 0x2fc   : > { %2370 = vmatmul.mubr.bf16.gmra.mrb[32].mxu0 %v1781_v22  ;;  %2474 = vmatprep.mubr.bf16.mxu1 %v1945_v30  ;;  %v1145_v22 = vld [vmem:[#allocation2 + $0x128] sm:$0xff] }
 0x2fd   : > { %2377 = vmatprep.mubr.bf16.mxu0 %v1849_v32  ;;  %v7337_v26 = vpack.c.bf16 %v1145_v22, %v1144_v11  ;;  %v7367_v11 = vpack.c.bf16 %v1151_v13, %v1150_v20 }
 0x2fe   : > { %v1719_v56 = vpop.permute.xlu0 %1718  ;;  %v1671_v47 = vpop.permute.xlu1 %1670 }
 0x2ff   : > { %v1949_v35 = vsel %vm1746_vm4, %v1444_v33, %v1719_v56  ;;  %v1885_v53 = vsel %vm1746_vm4, %v1347_v4, %v1671_v47  ;;  %v1422_v56 = vld [vmem:[#allocation2 + $0xc0] sm:$0xff]  ;;  %v1797_v45 = vsel %vm1746_vm4, %v7337_v26, %v7282_v9  ;;  %v7347_v47 = vpack.c.bf16 %v1147_v41, %v1146_v10  ;;  %v1325_v9 = vld [vmem:[#allocation2 + $0xa9] sm:$0xff] }
 0x300   : > { %v1809_v8 = vsel %vm1746_vm4, %v7367_v11, %v7302_v52  ;;  %v1511_v10 = vld [vmem:[#allocation2 + $0x6a] sm:$0xff] }
 0x301   : > { %2475 = vmatmul.mubr.bf16.gmra.mrb[4].mxu1 %v1881_v34  ;;  %v1324_v34 = vld [vmem:[#allocation2 + $0x99] sm:$0xff]  ;;  %v1801_v1 = vsel %vm1746_vm4, %v7347_v47, %v7290_v3  ;;  %v1327_v3 = vld [vmem:[#allocation2 + $0xc1] sm:$0xff] }
 0x302   : > { %2482 = vmatprep.mubr.bf16.mxu1 %v1949_v35  ;;  %v1721_v40 = vpop.permute.xlu0 %1720  ;;  %v1673_v15 = vpop.permute.xlu1 %1672  ;;  %v1423_v35 = vld [vmem:[#allocation2 + $0xc8] sm:$0xff]  ;;  %v1350_v36 = vpack.c.bf16 %v1324_v34, %v1323_v62 }
 0x303   : > { %v1953_v54 = vsel %vm1746_vm4, %v1445_v17, %v1721_v40  ;;  %v1889_v16 = vsel %vm1746_vm4, %v1348_v55, %v1673_v15  ;;  %v1448_v4 = vpack.c.bf16 %v1423_v35, %v1422_v56  ;;  %v1508_v35 = vld [vmem:[#allocation2 + $0x4a] sm:$0xff] }
 0x304   : > { %2378 = vmatmul.mubr.bf16.gmra.mrb[36].mxu0 %v1785_v43 }
 0x305   : > { %2385 = vmatprep.mubr.bf16.mxu0 %v1853_v44 }
 0x306   : > { %v1723_v38 = vpop.permute.xlu0 %1722  ;;  %v1675_v25 = vpop.permute.xlu1 %1674 }
 0x307   : > { %v1957_v48 = vsel %vm1746_vm4, %v1446_v14, %v1723_v38  ;;  %v1893_v30 = vsel %vm1746_vm4, %v1349_v0, %v1675_v25  ;;  %v1328_v38 = vld [vmem:[#allocation2 + $0xc9] sm:$0xff]  ;;  %v1506_v25 = vld [vmem:[#allocation2 + $0x32] sm:$0xff] }
 0x308   : > { %v1352_v27 = vpack.c.bf16 %v1328_v38, %v1327_v3  ;;  %v1517_v3 = vld [vmem:[#allocation2 + $0xb2] sm:$0xff] }
 0x309   : > { %2483 = vmatmul.mubr.bf16.gmra.mrb[8].mxu1 %v1885_v53  ;;  %v1326_v53 = vld [vmem:[#allocation2 + $0xb1] sm:$0xff] }
 0x30a   : > { %2490 = vmatprep.mubr.bf16.mxu1 %v1953_v54  ;;  %v1725_v32 = vpop.permute.xlu0 %1724  ;;  %v1677_v43 = vpop.permute.xlu1 %1676  ;;  %v1424_v54 = vld [vmem:[#allocation2 + $0xd8] sm:$0xff]  ;;  %v1351_v61 = vpack.c.bf16 %v1326_v53, %v1325_v9 }
 0x30b   : > { %v1961_v33 = vsel %vm1746_vm4, %v1447_v28, %v1725_v32  ;;  %v1897_v17 = vsel %vm1746_vm4, %v1350_v36, %v1677_v43  ;;  %v1507_v28 = vld [vmem:[#allocation2 + $0x3a] sm:$0xff]  ;;  %v1331_v43 = vld [vmem:[#allocation2 + $0xf1] sm:$0xff] }
 0x30c   : > { %2386 = vmatmul.mubr.bf16.gmra.mrb[40].mxu0 %v1789_v18  ;;  %v1149_v18 = vld [vmem:[#allocation2 + $0x158] sm:$0xff] }
 0x30d   : > { %2393 = vmatprep.mubr.bf16.mxu0 %v1857_v39  ;;  %v1449_v39 = vpack.c.bf16 %v1425_v46, %v1424_v54  ;;  %v7357_v57 = vpack.c.bf16 %v1149_v18, %v1148_v51  ;;  %v1329_v32 = vld [vmem:[#allocation2 + $0xd9] sm:$0xff]  ;;  %v1513_v54 = vld [vmem:[#allocation2 + $0x82] sm:$0xff]  ;;  %v1334_v51 = vld [vmem:[#allocation2 + $0x111] sm:$0xff] }
 0x30e   : > { %v1727_v44 = vpop.permute.xlu0 %1726  ;;  %v1679_v55 = vpop.permute.xlu1 %1678  ;;  %v1512_v53 = vld [vmem:[#allocation2 + $0x7a] sm:$0xff] }
 0x30f   : > { %v1965_v40 = vsel %vm1746_vm4, %v1448_v4, %v1727_v44  ;;  %v1901_v15 = vsel %vm1746_vm4, %v1351_v61, %v1679_v55  ;;  %v1805_v12 = vsel %vm1746_vm4, %v7357_v57, %v7294_v5  ;;  %v1332_v4 = vld [vmem:[#allocation2 + $0xf9] sm:$0xff]  ;;  %v1541_v18 = vpack.c.bf16 %v1513_v54, %v1512_v53 }
 0x310   : > { %v1515_v61 = vld [vmem:[#allocation2 + $0x9a] sm:$0xff] }
 0x311   : > { %2491 = vmatmul.mubr.bf16.gmra.mrb[12].mxu1 %v1889_v16  ;;  %v1426_v16 = vld [vmem:[#allocation2 + $0xf0] sm:$0xff] }
 0x312   : > { %2498 = vmatprep.mubr.bf16.mxu1 %v1957_v48  ;;  %v1729_v6 = vpop.permute.xlu0 %1728  ;;  %v1427_v48 = vld [vmem:[#allocation2 + $0xf8] sm:$0xff] }
 0x313   : > { %v1969_v14 = vsel %vm1746_vm4, %v1449_v39, %v1729_v6  ;;  %v1450_v0 = vpack.c.bf16 %v1427_v48, %v1426_v16  ;;  %v1335_v16 = vld [vmem:[#allocation2 + $0x121] sm:$0xff]  ;;  %v1336_v48 = vld [vmem:[#allocation2 + $0x129] sm:$0xff] }
 0x314   : > { %2394 = vmatmul.mubr.bf16.gmra.mrb[44].mxu0 %v1793_v60  ;;  %v1681_v60 = vpop.permute.xlu1 %1680 }
 0x315   : > { %2401 = vmatprep.mubr.bf16.mxu0 %v1861_v21  ;;  %v1905_v22 = vsel %vm1746_vm4, %v1352_v27, %v1681_v60  ;;  %v1356_v27 = vpack.c.bf16 %v1336_v48, %v1335_v16  ;;  %v5902_v16 = vld [vmem:[%s6736_s21 + $0x48] sm:$0xff]  }
 0x316   : > { %v1731_v21 = vpop.permute.xlu0 %1730  ;;  %v5903_v48 = vld [vmem:[%s6736_s21 + $0x8] sm:$0xff]  }
 0x317   : > { %v1973_v5 = vsel %vm1746_vm4, %v1450_v0, %v1731_v21  ;;  %v1337_v0 = vld [vmem:[#allocation2 + $0x139] sm:$0xff] }
 0x318   : > { %v1683_v34 = vpop.permute.xlu1 %1682 }
 0x319   : > { %2499 = vmatmul.mubr.bf16.gmra.mrb[16].mxu1 %v1893_v30  ;;  %v1330_v30 = vld [vmem:[#allocation2 + $0xe1] sm:$0xff] }
 0x31a   : > { %2506 = vmatprep.mubr.bf16.mxu1 %v1961_v33  ;;  %v1538_v33 = vpack.c.bf16 %v1507_v28, %v1506_v25  ;;  %v1353_v62 = vpack.c.bf16 %v1330_v30, %v1329_v32  ;;  %v1733_v56 = vpop.permute.xlu0 %1732  ;;  %v1438_v32 = vld [vmem:[#allocation2 + $0x180] sm:$0xff]  ;;  %v1439_v30 = vld [vmem:[#allocation2 + $0x188] sm:$0xff] }
 0x31b   : > { %v1977_v41 = vsel %vm1746_vm4, %v7327_v58, %v1733_v56  ;;  %v1342_v56 = vld [vmem:[#allocation2 + $0x171] sm:$0xff] }
 0x31c   : > { %2402 = vmatmul.mubr.bf16.gmra.mrb[48].mxu0 %v1797_v45  ;;  %v1509_v45 = vld [vmem:[#allocation2 + $0x52] sm:$0xff]  ;;  %v1909_v36 = vsel %vm1746_vm4, %v1353_v62, %v1683_v34  ;;  %v1456_v62 = vpack.c.bf16 %v1439_v30, %v1438_v32  ;;  %v1341_v34 = vld [vmem:[#allocation2 + $0x169] sm:$0xff] }
 0x31d   : > { %2409 = vmatprep.mubr.bf16.mxu0 %v1865_v37  ;;  %v1510_v37 = vld [vmem:[#allocation2 + $0x62] sm:$0xff]  ;;  %v1539_v52 = vpack.c.bf16 %v1509_v45, %v1508_v35  ;;  %v1440_v35 = vld [vmem:[#allocation2 + $0x198] sm:$0xff] }
 0x31e   : > { %v1540_v44 = vpack.c.bf16 %v1511_v10, %v1510_v37  ;;  %v1735_v9 = vpop.permute.xlu0 %1734  ;;  %v1441_v45 = vld [vmem:[#allocation2 + $0x1a0] sm:$0xff] }
 0x31f   : > { %v1981_v58 = vsel %vm1746_vm4, %v7337_v26, %v1735_v9  ;;  %v1457_v10 = vpack.c.bf16 %v1441_v45, %v1440_v35  ;;  %v5906_v45 = vld [vmem:[%s6736_s21 + $0x58] sm:$0xff]  }
 0x321   : > { %2507 = vmatmul.mubr.bf16.gmra.mrb[20].mxu1 %v1897_v17  ;;  %v1354_v17 = vpack.c.bf16 %v1332_v4, %v1331_v43  ;;  %v1537_v4 = vld [vmem:[#allocation2 + $0x1a2] sm:$0xff] }
 0x322   : > { %2514 = vmatprep.mubr.bf16.mxu1 %v1965_v40  ;;  %v1685_v40 = vpop.permute.xlu1 %1684 }
 0x323   : > { %v1913_v46 = vsel %vm1746_vm4, %v1354_v17, %v1685_v40 }
 0x324   : > { %2410 = vmatmul.mubr.bf16.gmra.mrb[52].mxu0 %v1801_v1  ;;  %v1514_v1 = vld [vmem:[#allocation2 + $0x92] sm:$0xff] }
 0x325   : > { %2417 = vmatprep.mubr.bf16.mxu0 %v1869_v63  ;;  %v1333_v63 = vld [vmem:[#allocation2 + $0x109] sm:$0xff]  ;;  %v1542_v55 = vpack.c.bf16 %v1515_v61, %v1514_v1 }
 0x326   : > { %v1355_v39 = vpack.c.bf16 %v1334_v51, %v1333_v63  ;;  %v1687_v6 = vpop.permute.xlu1 %1686  ;;  %v2942_v63 = vld [vmem:[#allocation3 + $0x1] sm:$0xff]  ;;  %v2943_v51 = vld [vmem:[#allocation3 + $0x9] sm:$0xff] }
 0x328   : > { %v1917_v38 = vsel %vm1746_vm4, %v1355_v39, %v1687_v6 }
 0x329   : > { %2515 = vmatmul.mubr.bf16.gmra.mrb[24].mxu1 %v1901_v15  ;;  %v1737_v15 = vpop.permute.xlu0 %1736 }
 0x32a   : > { %2522 = vmatprep.mubr.bf16.mxu1 %v1969_v14  ;;  %v1516_v14 = vld [vmem:[#allocation2 + $0xaa] sm:$0xff]  ;;  %v1985_v26 = vsel %vm1746_vm4, %v7347_v47, %v1737_v15  ;;  %v1338_v47 = vld [vmem:[#allocation2 + $0x141] sm:$0xff] }
 0x32b   : > { %v1357_v21 = vpack.c.bf16 %v1338_v47, %v1337_v0 }
 0x32c   : > { %2418 = vmatmul.mubr.bf16.gmra.mrb[56].mxu0 %v1805_v12  ;;  %v1543_v12 = vpack.c.bf16 %v1517_v3, %v1516_v14 }
 0x32d   : > { %2425 = vmatprep.mubr.bf16.mxu0 %v1873_v59  ;;  %v1689_v59 = vpop.permute.xlu1 %1688  ;;  %v1739_v20 = vpop.permute.xlu0 %1738 }
 0x32e   : > { %v1921_v13 = vsel %vm1746_vm4, %v1356_v27, %v1689_v59  ;;  %v1989_v60 = vsel %vm1746_vm4, %v7357_v57, %v1739_v20  ;;  %v1340_v57 = vld [vmem:[#allocation2 + $0x159] sm:$0xff] }
 0x331   : > { %2523 = vmatmul.mubr.bf16.gmra.mrb[28].mxu1 %v1905_v22  ;;  %v1691_v22 = vpop.permute.xlu1 %1690  ;;  %v1741_v25 = vpop.permute.xlu0 %1740 }
 0x332   : > { %2530 = vmatprep.mubr.bf16.mxu1 %v1973_v5  ;;  %v1993_v28 = vsel %vm1746_vm4, %v7367_v11, %v1741_v25  ;;  %v1339_v5 = vld [vmem:[#allocation2 + $0x151] sm:$0xff] }
 0x334   : > { %2426 = vmatmul.mubr.bf16.gmra.mrb[60].mxu0 %v1809_v8  ;;  %v1358_v8 = vpack.c.bf16 %v1340_v57, %v1339_v5  ;;  %v5905_v5 = vld [vmem:[%s6736_s21 + $0x10] sm:$0xff]  }
 0x335   : > { %5611 = vmatprep.mubr.msk.bf16.mxu0 %vm1746_vm4, %v1538_v33  ;;  %v1693_v33 = vpop.permute.xlu1 %1692 }
 0x339   : > { %2531 = vmatmul.mubr.bf16.gmra.mrb[32].mxu1 %v1909_v36  ;;  %v1359_v36 = vpack.c.bf16 %v1342_v56, %v1341_v34  ;;  %v1695_v37 = vpop.permute.xlu1 %1694 }
 0x33a   : > { %2538 = vmatprep.mubr.bf16.mxu1 %v1977_v41 }
 0x33c   : > { %5612 = vmatmul.mubr.msk.bf16.vlgmr.msra.gmra.mrb[64].mxu0 %vm1746_vm4, %v1539_v52 }
 0x33d   : > { %5615 = vmatprep.mubr.msk.bf16.mxu0 %vm1746_vm4, %v1540_v44  ;;  %v1697_v43 = vpop.permute.xlu1 %1696 }
 0x341   : > { %2539 = vmatmul.mubr.bf16.gmra.mrb[36].mxu1 %v1913_v46  ;;  %v5900_v46 = vld [vmem:[%s6736_s21 + $0x40] sm:$0xff]  }
 0x342   : > { %2546 = vmatprep.mubr.bf16.mxu1 %v1981_v58  ;;  %5321 = vmatprep.subr.bf16.mxu1 %v5900_v46 }
 0x344   : > { %5616 = vmatmul.mubr.msk.bf16.gmra.mrb[68].mxu0 %vm1746_vm4, %v1541_v18 }
 0x345   : > { %5619 = vmatprep.mubr.msk.bf16.mxu0 %vm1746_vm4, %v1542_v55  ;;  %v2974_v55 = vpack.c.bf16 %v2943_v51, %v2942_v63 }
 0x347   : > { %3343 = vrot.lane.b32.xlu1 %v2974_v55, %s6288_s17 }
 0x349   : > { %2547 = vmatmul.mubr.bf16.gmra.mrb[40].mxu1 %v1917_v38 }
 0x34a   : > { %2554 = vmatprep.mubr.bf16.mxu1 %v1985_v26 }
 0x34c   : > { %5620 = vmatmul.mubr.msk.bf16.gmra.mrb[72].mxu0 %vm1746_vm4, %v1543_v12 }
 0x34d   : > { %5623 = vmatprep.mubr.msk.bf16.mxu0 %vm1746_vm4, %v7191_v19  ;;  %v1925_v19 = vsel %vm1746_vm4, %v1357_v21, %v1691_v22 }
 0x351   : > { %2555 = vmatmul.mubr.bf16.gmra.mrb[44].mxu1 %v1921_v13 }
 0x352   : > { %2562 = vmatprep.mubr.bf16.mxu1 %v1989_v60 }
 0x354   : > { %5624 = vmatmul.mubr.msk.bf16.gmra.mrb[76].mxu0 %vm1746_vm4, %v7197_v23  ;;  %v1743_v23 = vpop.permute.xlu0 %1742 }
 0x355   : > { %5627 = vmatprep.mubr.msk.bf16.mxu0 %vm1746_vm4, %v7203_v24  ;;  %v1929_v24 = vsel %vm1746_vm4, %v1358_v8, %v1693_v33  ;;  %v1997_v11 = vsel %vm1746_vm4, %v1456_v62, %v1743_v23 }
 0x359   : > { %2563 = vmatmul.mubr.bf16.gmra.mrb[48].mxu1 %v1925_v19 }
 0x35a   : > { %2570 = vmatprep.mubr.bf16.mxu1 %v1993_v28  ;;  %v5904_v28 = vld [vmem:[%s6736_s21 + $0x50] sm:$0xff]  }
 0x35c   : > { %5628 = vmatmul.mubr.msk.bf16.gmra.mrb[80].mxu0 %vm1746_vm4, %v7209_v31  ;;  %v1745_v31 = vpop.permute.xlu0 %1744 }
 0x35d   : > { %5631 = vmatprep.mubr.msk.bf16.mxu0 %vm1746_vm4, %v7215_v42  ;;  %v1933_v42 = vsel %vm1746_vm4, %v1359_v36, %v1695_v37  ;;  %v2001_v41 = vsel %vm1746_vm4, %v1457_v10, %v1745_v31  ;;  %v5907_v36 = vld [vmem:[%s6736_s21 + $0x18] sm:$0xff]  }
 0x361   : > { %2571 = vmatmul.mubr.bf16.gmra.mrb[52].mxu1 %v1929_v24 }
 0x362   : > { %2578 = vmatprep.mubr.bf16.mxu1 %v1997_v11 }
 0x364   : > { %5632 = vmatmul.mubr.msk.bf16.gmra.mrb[84].mxu0 %vm1746_vm4, %v7221_v49  ;;  %v1536_v49 = vld [vmem:[#allocation2 + $0x19a] sm:$0xff] }
 0x365   : > { %5635 = vmatprep.mubr.msk.bf16.mxu0 %vm1746_vm4, %v7227_v50  ;;  %v1937_v50 = vsel %vm1746_vm4, %v7232_v29, %v1697_v43  ;;  %v1553_v52 = vpack.c.bf16 %v1537_v4, %v1536_v49 }
 0x369   : > { %2579 = vmatmul.mubr.bf16.gmra.mrb[56].mxu1 %v1933_v42 }
 0x36a   : > { %2586 = vmatprep.mubr.bf16.mxu1 %v2001_v41  ;;  %v7461_v41 = vld [vmem:[%s412_s22] ss:$0 sm:$0xff] }
 0x36c   : > { %5636 = vmatmul.mubr.msk.bf16.gmra.mrb[88].mxu0 %vm1746_vm4, %v7239_v7 }
 0x36d   : > { %5639 = vmatprep.mubr.msk.bf16.mxu0 %vm1746_vm4, %v7248_v2  ;;  %v5901_v2 = vld [vmem:[%s6736_s21] sm:$0xff]  }
 0x36e   : > { %5322 = vmatpush3.bf16.msra.mxu1 %v5901_v2 }
 0x36f   : > { %5323 = vmatprep.subr.bf16.mxu1 %v5902_v16 }
 0x371   : > { %2587 = vmatmul.mubr.bf16.gmra.mrb[60].mxu1 %v1937_v50 }
 0x372   : > { %5324 = vmatpush3.bf16.msra.mxu1 %v5903_v48 }
 0x373   : > { %5325 = vmatprep.subr.bf16.mxu1 %v5904_v28 }
 0x374   : > { %5640 = vmatmul.mubr.msk.bf16.gmra.mrb[92].mxu0 %vm1746_vm4, %v1553_v52 }
 0x376   : > { %5326 = vmatpush3.bf16.msra.mxu1 %v5905_v5 }
 0x377   : > { %5327 = vmatprep.subr.bf16.mxu1 %v5906_v45 }
 0x37a   : > { %5328 = vmatpush3.bf16.msra.mxu1 %v5907_v36  ;;  %v5910_v36 = vld [vmem:[%s6736_s21 + $0x68] sm:$0xff]  }
 0x38f   : > { %v5093_v44 = vpop.f32.mrb[0].mxu0 }
 0x390   : > { %v5094_v17 = vpop.f32.mrb[1].mxu0 }
 0x391   : > { %v7420_v40 = vadd.f32 %v5094_v17, %v5093_v44  ;;  %v5096_v9 = vpop.f32.mrb[2].mxu0 }
 0x392   : > { %v5097_v53 = vpop.f32.mrb[3].mxu0 }
 0x393   : > { %v7422_v7 = vadd.f32 %v5097_v53, %v5096_v9  ;;  %v2308_v50 = vadd.f32 %v7420_v40, %v7461_v41 }
 0x395   : > { %v2311_v53 = vadd.f32 %v7422_v7, %v7461_v41 }
 0x397   : > { %v5099_v54 = vpop.f32.mrb[4].mxu0 }
 0x398   : > { %v5100_v1 = vpop.f32.mrb[5].mxu0 }
 0x399   : > { %v7426_v61 = vadd.f32 %v5100_v1, %v5099_v54  ;;  %v5102_v58 = vpop.f32.mrb[6].mxu0 }
 0x39a   : > { %v5103_v29 = vpop.f32.mrb[7].mxu0 }
 0x39b   : > { %v7428_v18 = vadd.f32 %v5103_v29, %v5102_v58  ;;  %v5908_v29 = vld [vmem:[%s6736_s21 + $0x60] sm:$0xff]   ;;  %v2316_v7 = vadd.f32 %v7426_v61, %v7461_v41 }
 0x39c   : > { %5329 = vmatprep.subr.bf16.mxu1 %v5908_v29 }
 0x39d   : > { %v2319_v48 = vadd.f32 %v7428_v18, %v7461_v41 }
 0x39f   : > { %v5105_v39 = vpop.f32.mrb[8].mxu0 }
 0x3a0   : > { %v5106_v6 = vpop.f32.mrb[9].mxu0 }
 0x3a1   : > { %v7431_v15 = vadd.f32 %v5106_v6, %v5105_v39  ;;  %v5108_v14 = vpop.f32.mrb[10].mxu0  ;;  %v5909_v6 = vld [vmem:[%s6736_s21 + $0x20] sm:$0xff]  }
 0x3a2   : > { %v5109_v3 = vpop.f32.mrb[11].mxu0  ;;  %5330 = vmatpush3.bf16.msra.mxu1 %v5909_v6 }
 0x3a3   : > { %v7433_v38 = vadd.f32 %v5109_v3, %v5108_v14  ;;  %v2324_v5 = vadd.f32 %v7431_v15, %v7461_v41  ;;  %5331 = vmatprep.subr.bf16.mxu1 %v5910_v36 }
 0x3a7   : > { %v5111_v26 = vpop.f32.mrb[12].mxu0 }
 0x3a8   : > { %v5112_v12 = vpop.f32.mrb[13].mxu0 }
 0x3a9   : > { %v7437_v27 = vadd.f32 %v5112_v12, %v5111_v26  ;;  %v5114_v59 = vpop.f32.mrb[14].mxu0 }
 0x3aa   : > { %v5115_v20 = vpop.f32.mrb[15].mxu0 }
 0x3ab   : > { %v7439_v13 = vadd.f32 %v5115_v20, %v5114_v59 }
 0x3af   : > { %v5117_v60 = vpop.f32.mrb[16].mxu0 }
 0x3b0   : > { %v5118_v0 = vpop.f32.mrb[17].mxu0 }
 0x3b1   : > { %v7441_v47 = vadd.f32 %v5118_v0, %v5117_v60  ;;  %v5120_v21 = vpop.f32.mrb[18].mxu0 }
 0x3b2   : > { %v5121_v22 = vpop.f32.mrb[19].mxu0 }
 0x3b3   : > { %v7443_v25 = vadd.f32 %v5121_v22, %v5120_v21 }
 0x3b7   : > { %v5123_v19 = vpop.f32.mrb[20].mxu0 }
 0x3b8   : > { %v5124_v57 = vpop.f32.mrb[21].mxu0 }
 0x3b9   : > { %v7447_v32 = vadd.f32 %v5124_v57, %v5123_v19  ;;  %v5126_v30 = vpop.f32.mrb[22].mxu0 }
 0x3ba   : > { %v5127_v8 = vpop.f32.mrb[23].mxu0 }
 0x3bb   : > { %v7449_v33 = vadd.f32 %v5127_v8, %v5126_v30 }
 0x3bf   : > { %v5129_v62 = vpop.f32.mrb[24].mxu0 }
 0x3c0   : > { %v5130_v23 = vpop.f32.mrb[25].mxu0 }
 0x3c1   : > { %v7451_v24 = vadd.f32 %v5130_v23, %v5129_v62  ;;  %v5132_v11 = vpop.f32.mrb[26].mxu0  ;;  %v2327_v62 = vadd.f32 %v7433_v38, %v7461_v41  ;;  %v2332_v38 = vadd.f32 %v7437_v27, %v7461_v41 }
 0x3c2   : > { %v5133_v34 = vpop.f32.mrb[27].mxu0 }
 0x3c3   : > { %v7453_v56 = vadd.f32 %v5133_v34, %v5132_v11 }
 0x3c7   : > { %v5135_v35 = vpop.f32.mrb[28].mxu0 }
 0x3c8   : > { %v5136_v37 = vpop.f32.mrb[29].mxu0 }
 0x3c9   : > { %v7457_v10 = vadd.f32 %v5136_v37, %v5135_v35  ;;  %v5138_v31 = vpop.f32.mrb[30].mxu0 }
 0x3ca   : > { %v5139_v42 = vpop.f32.mrb[31].mxu0 }
 0x3cb   : > { %v7463_v43 = vadd.f32 %v5139_v42, %v5138_v31 }
 0x3cc   : > { %v5205_v49 = vpop.f32.mrb[0].mxu1 }
 0x3cd   : > { %v5206_v4 = vpop.f32.mrb[1].mxu1 }
 0x3ce   : > { %v5207_v52 = vadd.f32 %v5206_v4, %v5205_v49  ;;  %v5208_v44 = vpop.f32.mrb[2].mxu1  ;;  %v5911_v4 = vld [vmem:[%s6736_s21 + $0x28] sm:$0xff]  }
 0x3cf   : > { %v5141_v17 = vpop.f32.mrb[32].mxu0  ;;  %v5209_v9 = vpop.f32.mrb[3].mxu1  ;;  %5332 = vmatpush3.bf16.msra.mxu1 %v5911_v4 }
 0x3d0   : > { %v5210_v54 = vadd.f32 %v5209_v9, %v5208_v44  ;;  %v5142_v46 = vpop.f32.mrb[33].mxu0  ;;  %v7469_v2 = vadd.f32 %v5207_v52, %v2308_v50  ;;  %v2335_v9 = vadd.f32 %v7439_v13, %v7461_v41 }
 0x3d1   : > { %v7471_v1 = vadd.f32 %v5142_v46, %v5141_v17  ;;  %v5144_v58 = vpop.f32.mrb[34].mxu0 }
 0x3d2   : > { %v5145_v63 = vpop.f32.mrb[35].mxu0  ;;  %v7474_v51 = vadd.f32 %v5210_v54, %v2311_v53 }
 0x3d3   : > { %v7476_v40 = vadd.f32 %v5145_v63, %v5144_v58 }
 0x3d4   : > { %v5211_v55 = vpop.f32.mrb[4].mxu1 }
 0x3d5   : > { %v5212_v39 = vpop.f32.mrb[5].mxu1 }
 0x3d6   : > { %v5213_v14 = vadd.f32 %v5212_v39, %v5211_v55  ;;  %v5214_v3 = vpop.f32.mrb[6].mxu1 }
 0x3d7   : > { %v5147_v26 = vpop.f32.mrb[36].mxu0  ;;  %v5215_v16 = vpop.f32.mrb[7].mxu1 }
 0x3d8   : > { %v5216_v12 = vadd.f32 %v5215_v16, %v5214_v3  ;;  %v5148_v59 = vpop.f32.mrb[37].mxu0  ;;  %v7483_v20 = vadd.f32 %v5213_v14, %v2316_v7  ;;  %v2340_v7 = vadd.f32 %v7441_v47, %v7461_v41  ;;  %v2343_v16 = vadd.f32 %v7443_v25, %v7461_v41 }
 0x3d9   : > { %v7485_v60 = vadd.f32 %v5148_v59, %v5147_v26  ;;  %v5150_v0 = vpop.f32.mrb[38].mxu0  ;;  %v2348_v25 = vadd.f32 %v7447_v32, %v7461_v41 }
 0x3da   : > { %v5151_v21 = vpop.f32.mrb[39].mxu0  ;;  %v7487_v22 = vadd.f32 %v5216_v12, %v2319_v48 }
 0x3db   : > { %v7489_v61 = vadd.f32 %v5151_v21, %v5150_v0 }
 0x3dc   : > { %v5217_v19 = vpop.f32.mrb[8].mxu1 }
 0x3dd   : > { %v5218_v28 = vpop.f32.mrb[9].mxu1 }
 0x3de   : > { %v5219_v57 = vadd.f32 %v5218_v28, %v5217_v19  ;;  %v5220_v18 = vpop.f32.mrb[10].mxu1  ;;  %v5912_v19 = vld [vmem:[%s6736_s21 + $0x70] sm:$0xff]  }
 0x3df   : > { %v5153_v30 = vpop.f32.mrb[40].mxu0  ;;  %v5221_v8 = vpop.f32.mrb[11].mxu1  ;;  %5333 = vmatprep.subr.bf16.mxu1 %v5912_v19 }
 0x3e0   : > { %v5222_v23 = vadd.f32 %v5221_v8, %v5220_v18  ;;  %v5154_v11 = vpop.f32.mrb[41].mxu0  ;;  %v7495_v34 = vadd.f32 %v5219_v57, %v2324_v5 }
 0x3e1   : > { %v7497_v35 = vadd.f32 %v5154_v11, %v5153_v30  ;;  %v5156_v45 = vpop.f32.mrb[42].mxu0  ;;  %v5913_v30 = vld [vmem:[%s6736_s21 + $0x30] sm:$0xff]  }
 0x3e2   : > { %v5157_v37 = vpop.f32.mrb[43].mxu0  ;;  %v7500_v31 = vadd.f32 %v5222_v23, %v2327_v62  ;;  %5334 = vmatpush3.bf16.msra.mxu1 %v5913_v30 }
 0x3e3   : > { %v7502_v15 = vadd.f32 %v5157_v37, %v5156_v45  ;;  %v2351_v45 = vadd.f32 %v7449_v33, %v7461_v41 }
 0x3e4   : > { %v5223_v42 = vpop.f32.mrb[12].mxu1 }
 0x3e5   : > { %v5224_v49 = vpop.f32.mrb[13].mxu1 }
 0x3e6   : > { %v5225_v50 = vadd.f32 %v5224_v49, %v5223_v42  ;;  %v5226_v52 = vpop.f32.mrb[14].mxu1 }
 0x3e7   : > { %v5159_v44 = vpop.f32.mrb[44].mxu0  ;;  %v5227_v17 = vpop.f32.mrb[15].mxu1 }
 0x3e8   : > { %v5228_v53 = vadd.f32 %v5227_v17, %v5226_v52  ;;  %v5160_v54 = vpop.f32.mrb[45].mxu0  ;;  %v7509_v46 = vadd.f32 %v5225_v50, %v2332_v38  ;;  %v2356_v17 = vadd.f32 %v7451_v24, %v7461_v41 }
 0x3e9   : > { %v7511_v58 = vadd.f32 %v5160_v54, %v5159_v44  ;;  %v5162_v29 = vpop.f32.mrb[46].mxu0 }
 0x3ea   : > { %v5163_v63 = vpop.f32.mrb[47].mxu0  ;;  %v7513_v55 = vadd.f32 %v5228_v53, %v2335_v9 }
 0x3eb   : > { %v7515_v27 = vadd.f32 %v5163_v63, %v5162_v29  ;;  %v2359_v29 = vadd.f32 %v7453_v56, %v7461_v41  ;;  %v2364_v56 = vadd.f32 %v7457_v10, %v7461_v41 }
 0x3ec   : > { %v5229_v39 = vpop.f32.mrb[16].mxu1 }
 0x3ed   : > { %v5230_v6 = vpop.f32.mrb[17].mxu1 }
 0x3ee   : > { %v5231_v14 = vadd.f32 %v5230_v6, %v5229_v39  ;;  %v5232_v13 = vpop.f32.mrb[18].mxu1 }
 0x3ef   : > { %v5165_v3 = vpop.f32.mrb[48].mxu0  ;;  %v5233_v26 = vpop.f32.mrb[19].mxu1 }
 0x3f0   : > { %v5234_v48 = vadd.f32 %v5233_v26, %v5232_v13  ;;  %v5166_v12 = vpop.f32.mrb[49].mxu0  ;;  %v7521_v59 = vadd.f32 %v5231_v14, %v2340_v7  ;;  %v5914_v13 = vld [vmem:[%s6736_s21 + $0x78] sm:$0xff]  }
 0x3f1   : > { %v7523_v0 = vadd.f32 %v5166_v12, %v5165_v3  ;;  %v5168_v21 = vpop.f32.mrb[50].mxu0  ;;  %5335 = vmatprep.subr.bf16.mxu1 %v5914_v13  ;;  %v5915_v12 = vld [vmem:[%s6736_s21 + $0x38] sm:$0xff]  }
 0x3f2   : > { %v5169_v28 = vpop.f32.mrb[51].mxu0  ;;  %v7526_v5 = vadd.f32 %v5234_v48, %v2343_v16  ;;  %5336 = vmatpush3.bf16.msra.mxu1 %v5915_v12 }
 0x3f3   : > { %v7528_v47 = vadd.f32 %v5169_v28, %v5168_v21 }
 0x3f4   : > { %v5235_v57 = vpop.f32.mrb[20].mxu1 }
 0x3f5   : > { %v5236_v18 = vpop.f32.mrb[21].mxu1 }
 0x3f6   : > { %v5237_v8 = vadd.f32 %v5236_v18, %v5235_v57  ;;  %v5238_v62 = vpop.f32.mrb[22].mxu1  ;;  %v2367_v18 = vadd.f32 %v7463_v43, %v7461_v41 }
 0x3f7   : > { %v5171_v23 = vpop.f32.mrb[52].mxu0  ;;  %v5239_v11 = vpop.f32.mrb[23].mxu1 }
 0x3f8   : > { %v5240_v36 = vadd.f32 %v5239_v11, %v5238_v62  ;;  %v5172_v37 = vpop.f32.mrb[53].mxu0  ;;  %v7535_v42 = vadd.f32 %v5237_v8, %v2348_v25 }
 0x3f9   : > { %v7537_v49 = vadd.f32 %v5172_v37, %v5171_v23  ;;  %v5174_v4 = vpop.f32.mrb[54].mxu0 }
 0x3fa   : > { %v5175_v38 = vpop.f32.mrb[55].mxu0  ;;  %v7539_v50 = vadd.f32 %v5240_v36, %v2351_v45 }
 0x3fb   : > { %v7541_v32 = vadd.f32 %v5175_v38, %v5174_v4  ;;  %v5916_v4 = vld [vmem:[%s6736_s21 + $0xc0] sm:$0xff]   ;;  %v2372_v38 = vadd.f32 %v7471_v1, %v7461_v41 }
 0x3fc   : > { %v5241_v52 = vpop.f32.mrb[24].mxu1  ;;  %5433 = vmatprep.subr.bf16.mxu0 %v5916_v4 }
 0x3fd   : > { %v5242_v44 = vpop.f32.mrb[25].mxu1 }
 0x3fe   : > { %v5243_v9 = vadd.f32 %v5242_v44, %v5241_v52  ;;  %v5244_v33 = vpop.f32.mrb[26].mxu1 }
 0x3ff   : > { %v5177_v53 = vpop.f32.mrb[56].mxu0  ;;  %v5245_v54 = vpop.f32.mrb[27].mxu1 }
 0x400   : > { %v5246_v63 = vadd.f32 %v5245_v54, %v5244_v33  ;;  %v5178_v39 = vpop.f32.mrb[57].mxu0  ;;  %v7547_v6 = vadd.f32 %v5243_v9, %v2356_v17  ;;  %v2375_v9 = vadd.f32 %v7476_v40, %v7461_v41  ;;  %v7584_v40 = vld [vmem:[%s6736_s21 + $0x100] sm:$0xff]  }
 0x401   : > { %v7549_v7 = vadd.f32 %v5178_v39, %v5177_v53  ;;  %v5180_v14 = vpop.f32.mrb[58].mxu0  ;;  %5643 = vmatprep.subr.bf16.mxu1 %v7584_v40 }
 0x402   : > { %v5181_v3 = vpop.f32.mrb[59].mxu0  ;;  %v7552_v26 = vadd.f32 %v5246_v63, %v2359_v29 }
 0x403   : > { %v7554_v24 = vadd.f32 %v5181_v3, %v5180_v14  ;;  %v5917_v14 = vld [vmem:[%s6736_s21 + $0x80] sm:$0xff]  }
 0x404   : > { %v5247_v16 = vpop.f32.mrb[28].mxu1  ;;  %5434 = vmatpush3.bf16.msra.mxu0 %v5917_v14 }
 0x405   : > { %v5248_v48 = vpop.f32.mrb[29].mxu1 }
 0x406   : > { %v5249_v21 = vadd.f32 %v5248_v48, %v5247_v16  ;;  %v5250_v19 = vpop.f32.mrb[30].mxu1 }
 0x407   : > { %v5183_v28 = vpop.f32.mrb[60].mxu0  ;;  %v5251_v57 = vpop.f32.mrb[31].mxu1 }
 0x408   : > { %v5252_v30 = vadd.f32 %v5251_v57, %v5250_v19  ;;  %v5184_v25 = vpop.f32.mrb[61].mxu0  ;;  %v7561_v8 = vadd.f32 %v5249_v21, %v2364_v56 }
 0x409   : > { %v7563_v62 = vadd.f32 %v5184_v25, %v5183_v28  ;;  %v5186_v23 = vpop.f32.mrb[62].mxu0 }
 0x40a   : > { %v5187_v11 = vpop.f32.mrb[63].mxu0  ;;  %v7565_v45 = vadd.f32 %v5252_v30, %v2367_v18  ;;  %v5919_v18 = vld [vmem:[%s6736_s21 + $0xc8] sm:$0xff]   ;;  %v2383_v30 = vadd.f32 %v7489_v61, %v7461_v41 }
 0x40b   : > { %v7567_v10 = vadd.f32 %v5187_v11, %v5186_v23  ;;  %5435 = vmatprep.subr.bf16.mxu0 %v5919_v18 }
 0x40c   : > { %v5253_v36 = vpop.f32.mrb[32].mxu1 }
 0x40d   : > { %v5254_v37 = vpop.f32.mrb[33].mxu1 }
 0x40e   : > { %v5255_v43 = vadd.f32 %v5254_v37, %v5253_v36  ;;  %v5256_v52 = vpop.f32.mrb[34].mxu1 }
 0x40f   : > { %v5257_v44 = vpop.f32.mrb[35].mxu1  ;;  %v5613_v17 = vpop.f32.mrb[64].mxu0 }
 0x410   : > { %v5258_v33 = vadd.f32 %v5257_v44, %v5256_v52  ;;  %v2638_v53 = vadd.f32 %v5613_v17, %v7483_v20  ;;  %v2629_v54 = vpop.f32.mrb[65].mxu0  ;;  %v7575_v29 = vadd.f32 %v5255_v43, %v2372_v38  ;;  %v5920_v44 = vld [vmem:[%s6736_s21 + $0x88] sm:$0xff]  }
 0x411   : > { %v2630_v63 = vadd.f32 %v2629_v54, %v7469_v2  ;;  %v5614_v39 = vpop.f32.mrb[66].mxu0  ;;  %5436 = vmatpush3.bf16.msra.mxu0 %v5920_v44 }
 0x412   : > { %v2758_v1 = vmax.f32 %v2638_v53, 0.0  ;;  %v2641_v13 = vadd.f32 %v5614_v39, %v7487_v22  ;;  %v2632_v3 = vpop.f32.mrb[67].mxu0  ;;  %v7580_v16 = vadd.f32 %v5258_v33, %v2375_v9  ;;  %v2380_v22 = vadd.f32 %v7485_v60, %v7461_v41 }
 0x413   : > { %v2756_v48 = vmax.f32 %v2630_v63, 0.0  ;;  %v2633_v12 = vadd.f32 %v2632_v3, %v7474_v51 }
 0x414   : > { %2791 = vst.msk [vmem:[#allocation3 + $0x31] sm:$0xff] %vm1746_vm4, %v2758_v1  ;;  %v2759_v20 = vmax.f32 %v2641_v13, 0.0  ;;  %v5259_v56 = vpop.f32.mrb[36].mxu1 }
 0x415   : > { %2789 = vst.msk [vmem:[#allocation3 + $0x19] sm:$0xff] %vm1746_vm4, %v2756_v48  ;;  %v2757_v2 = vmax.f32 %v2633_v12, 0.0  ;;  %v5260_v21 = vpop.f32.mrb[37].mxu1 }
 0x416   : > { %2792 = vst.msk [vmem:[#allocation3 + $0x39] sm:$0xff] %vm1746_vm4, %v2759_v20  ;;  %v5261_v51 = vadd.f32 %v5260_v21, %v5259_v56  ;;  %v5262_v19 = vpop.f32.mrb[38].mxu1  ;;  %v5921_v20 = vld [vmem:[%s6736_s21 + $0xd0] sm:$0xff]  }
 0x417   : > { %2790 = vst.msk [vmem:[#allocation3 + $0x21] sm:$0xff] %vm1746_vm4, %v2757_v2  ;;  %v5263_v28 = vpop.f32.mrb[39].mxu1  ;;  %v5617_v57 = vpop.f32.mrb[68].mxu0  ;;  %5437 = vmatprep.subr.bf16.mxu0 %v5921_v20 }
 0x418   : > { %v5264_v25 = vadd.f32 %v5263_v28, %v5262_v19  ;;  %v2654_v23 = vadd.f32 %v5617_v57, %v7509_v46  ;;  %v2645_v11 = vpop.f32.mrb[69].mxu0  ;;  %v7597_v36 = vadd.f32 %v5261_v51, %v2380_v22  ;;  %v5922_v19 = vld [vmem:[%s6736_s21 + $0x90] sm:$0xff]   ;;  %v5923_v28 = vld [vmem:[%s6736_s21 + $0xd8] sm:$0xff]  }
 0x419   : > { %v2646_v60 = vadd.f32 %v2645_v11, %v7495_v34  ;;  %v5618_v37 = vpop.f32.mrb[70].mxu0  ;;  %5438 = vmatpush3.bf16.msra.mxu0 %v5922_v19 }
 0x41a   : > { %v2762_v4 = vmax.f32 %v2654_v23, 0.0  ;;  %v2657_v38 = vadd.f32 %v5618_v37, %v7513_v55  ;;  %v2648_v43 = vpop.f32.mrb[71].mxu0  ;;  %v7601_v52 = vadd.f32 %v5264_v25, %v2383_v30  ;;  %v2388_v55 = vadd.f32 %v7497_v35, %v7461_v41  ;;  %5439 = vmatprep.subr.bf16.mxu0 %v5923_v28 }
 0x41b   : > { %v2760_v17 = vmax.f32 %v2646_v60, 0.0  ;;  %v2649_v61 = vadd.f32 %v2648_v43, %v7500_v31  ;;  %v2391_v35 = vadd.f32 %v7502_v15, %v7461_v41  ;;  %v2946_v23 = vld [vmem:[#allocation3 + $0x31] sm:$0xff] }
 0x41c   : > { %2795 = vst.msk [vmem:[#allocation3 + $0x61] sm:$0xff] %vm1746_vm4, %v2762_v4  ;;  %v2763_v46 = vmax.f32 %v2657_v38, 0.0  ;;  %v5265_v9 = vpop.f32.mrb[40].mxu1  ;;  %v3038_v53 = vld [vmem:[#allocation3 + $0x18] sm:$0xff]  ;;  %v5924_v38 = vld [vmem:[%s6736_s21 + $0x98] sm:$0xff]  }
 0x41d   : > { %2793 = vst.msk [vmem:[#allocation3 + $0x49] sm:$0xff] %vm1746_vm4, %v2760_v17  ;;  %v2761_v34 = vmax.f32 %v2649_v61, 0.0  ;;  %v5266_v33 = vpop.f32.mrb[41].mxu1  ;;  %v2944_v31 = vld [vmem:[#allocation3 + $0x19] sm:$0xff]  ;;  %v2396_v61 = vadd.f32 %v7511_v58, %v7461_v41  ;;  %5440 = vmatpush3.bf16.msra.mxu0 %v5924_v38  ;;  %v5925_v58 = vld [vmem:[%s6736_s21 + $0xe0] sm:$0xff]  }
 0x41e   : > { %2796 = vst.msk [vmem:[#allocation3 + $0x69] sm:$0xff] %vm1746_vm4, %v2763_v46  ;;  %v5267_v54 = vadd.f32 %v5266_v33, %v5265_v9  ;;  %v5268_v63 = vpop.f32.mrb[42].mxu1  ;;  %v3039_v39 = vld [vmem:[#allocation3 + $0x20] sm:$0xff]  ;;  %v3041_v12 = vld [vmem:[#allocation3 + $0x38] sm:$0xff]  ;;  %5441 = vmatprep.subr.bf16.mxu0 %v5925_v58 }
 0x41f   : > { %v2945_v14 = vld [vmem:[#allocation3 + $0x21] sm:$0xff]  ;;  %2794 = vst.msk [vmem:[#allocation3 + $0x51] sm:$0xff] %vm1746_vm4, %v2761_v34  ;;  %v5269_v1 = vpop.f32.mrb[43].mxu1  ;;  %v5621_v13 = vpop.f32.mrb[72].mxu0  ;;  %v7611_v3 = vpack.c.bf16 %v3039_v39, %v3038_v53  ;;  %v2947_v22 = vld [vmem:[#allocation3 + $0x39] sm:$0xff] }
 0x420   : > { %v2975_v48 = vpack.c.bf16 %v2945_v14, %v2944_v31  ;;  %v5270_v56 = vadd.f32 %v5269_v1, %v5268_v63  ;;  %v2670_v2 = vadd.f32 %v5621_v13, %v7535_v42  ;;  %v2661_v21 = vpop.f32.mrb[73].mxu0  ;;  %v7617_v51 = vadd.f32 %v5267_v54, %v2388_v55  ;;  %v3040_v42 = vld [vmem:[#allocation3 + $0x30] sm:$0xff] }
 0x421   : > { %v2662_v57 = vadd.f32 %v2661_v21, %v7521_v59  ;;  %v5622_v18 = vpop.f32.mrb[74].mxu0  ;;  %3391 = vrot.lane.b32.xlu0 %v7611_v3, %s6288_s17  ;;  %v7629_v59 = vpack.c.bf16 %v3041_v12, %v3040_v42  ;;  %v7631_v4 = vpack.c.bf16 %v2947_v22, %v2946_v23  ;;  %v2399_v14 = vadd.f32 %v7515_v27, %v7461_v41 }
 0x422   : > { %3345 = vrot.lane.b32.xlu1 %v2975_v48, %s6288_s17  ;;  %v2766_v30 = vmax.f32 %v2670_v2, 0.0  ;;  %v2673_v15 = vadd.f32 %v5622_v18, %v7539_v50  ;;  %v2664_v25 = vpop.f32.mrb[75].mxu0  ;;  %v7626_v11 = vadd.f32 %v5270_v56, %v2391_v35  ;;  %v5926_v35 = vld [vmem:[%s6736_s21 + $0xa0] sm:$0xff]   ;;  %v5927_v56 = vld [vmem:[%s6736_s21 + $0xe8] sm:$0xff]  }
 0x423   : > { %v2764_v60 = vmax.f32 %v2662_v57, 0.0  ;;  %v2665_v37 = vadd.f32 %v2664_v25, %v7526_v5  ;;  %v3044_v19 = vld [vmem:[#allocation3 + $0x60] sm:$0xff]  ;;  %5442 = vmatpush3.bf16.msra.mxu0 %v5926_v35  ;;  %v5928_v25 = vld [vmem:[%s6736_s21 + $0xa8] sm:$0xff]  }
 0x424   : > { %2799 = vst.msk [vmem:[#allocation3 + $0x91] sm:$0xff] %vm1746_vm4, %v2766_v30  ;;  %v2767_v43 = vmax.f32 %v2673_v15, 0.0  ;;  %v5271_v44 = vpop.f32.mrb[44].mxu1  ;;  %v3042_v5 = vld [vmem:[#allocation3 + $0x48] sm:$0xff]  ;;  %5443 = vmatprep.subr.bf16.mxu0 %v5927_v56 }
 0x425   : > { %2797 = vst.msk [vmem:[#allocation3 + $0x79] sm:$0xff] %vm1746_vm4, %v2764_v60  ;;  %v2765_v50 = vmax.f32 %v2665_v37, 0.0  ;;  %v5272_v17 = vpop.f32.mrb[45].mxu1  ;;  %3393 = vrot.lane.b32.xlu0 %v7629_v59, %s6288_s17  ;;  %v2948_v33 = vld [vmem:[#allocation3 + $0x49] sm:$0xff]  ;;  %v2950_v28 = vld [vmem:[#allocation3 + $0x61] sm:$0xff]  ;;  %v2404_v37 = vadd.f32 %v7523_v0, %v7461_v41  ;;  %v2407_v0 = vadd.f32 %v7528_v47, %v7461_v41 }
 0x426   : > { %3347 = vrot.lane.b32.xlu1 %v7631_v4, %s6288_s17  ;;  %2800 = vst.msk [vmem:[#allocation3 + $0x99] sm:$0xff] %vm1746_vm4, %v2767_v43  ;;  %v5273_v46 = vadd.f32 %v5272_v17, %v5271_v44  ;;  %v5274_v9 = vpop.f32.mrb[46].mxu1  ;;  %v3043_v34 = vld [vmem:[#allocation3 + $0x50] sm:$0xff]  ;;  %v3045_v31 = vld [vmem:[#allocation3 + $0x68] sm:$0xff] }
 0x427   : > { %v2949_v53 = vld [vmem:[#allocation3 + $0x51] sm:$0xff]  ;;  %2798 = vst.msk [vmem:[#allocation3 + $0x81] sm:$0xff] %vm1746_vm4, %v2765_v50  ;;  %v5275_v55 = vpop.f32.mrb[47].mxu1  ;;  %v5625_v54 = vpop.f32.mrb[76].mxu0  ;;  %v7644_v63 = vpack.c.bf16 %v3043_v34, %v3042_v5  ;;  %v2951_v12 = vld [vmem:[#allocation3 + $0x69] sm:$0xff]  ;;  %v3073_v30 = vpack.c.bf16 %v3045_v31, %v3044_v19  ;;  %5444 = vmatpush3.bf16.msra.mxu0 %v5928_v25 }
 0x428   : > { %v7646_v39 = vpack.c.bf16 %v2949_v53, %v2948_v33  ;;  %v5276_v1 = vadd.f32 %v5275_v55, %v5274_v9  ;;  %v2686_v13 = vadd.f32 %v5625_v54, %v7561_v8  ;;  %v2677_v48 = vpop.f32.mrb[77].mxu0  ;;  %v7652_v20 = vadd.f32 %v5273_v46, %v2396_v61  ;;  %v5929_v33 = vld [vmem:[%s6736_s21 + $0xf0] sm:$0xff]  }
 0x429   : > { %v2678_v2 = vadd.f32 %v2677_v48, %v7547_v6  ;;  %v5626_v21 = vpop.f32.mrb[78].mxu0  ;;  %3395 = vrot.lane.b32.xlu0 %v7644_v63, %s6288_s17  ;;  %v7665_v15 = vpack.c.bf16 %v2951_v12, %v2950_v28  ;;  %5445 = vmatprep.subr.bf16.mxu0 %v5929_v33 }
 0x42a   : > { %3349 = vrot.lane.b32.xlu1 %v7646_v39, %s6288_s17  ;;  %v2770_v27 = vmax.f32 %v2686_v13, 0.0  ;;  %v2689_v22 = vadd.f32 %v5626_v21, %v7565_v45  ;;  %v2680_v8 = vpop.f32.mrb[79].mxu0  ;;  %v7662_v57 = vadd.f32 %v5276_v1, %v2399_v14  ;;  %v5930_v14 = vld [vmem:[%s6736_s21 + $0xb0] sm:$0xff]   ;;  %v5931_v1 = vld [vmem:[%s6736_s21 + $0xf8] sm:$0xff]  }
 0x42b   : > { %v2768_v18 = vmax.f32 %v2678_v2, 0.0  ;;  %v2681_v6 = vadd.f32 %v2680_v8, %v7552_v26  ;;  %v2954_v56 = vld [vmem:[#allocation3 + $0x91] sm:$0xff]  ;;  %5446 = vmatpush3.bf16.msra.mxu0 %v5930_v14  ;;  %v5932_v8 = vld [vmem:[%s6736_s21 + $0xb8] sm:$0xff]  }
 0x42c   : > { %2803 = vst.msk [vmem:[#allocation3 + $0xc1] sm:$0xff] %vm1746_vm4, %v2770_v27  ;;  %v2771_v42 = vmax.f32 %v2689_v22, 0.0  ;;  %v5277_v23 = vpop.f32.mrb[48].mxu1  ;;  %v3046_v26 = vld [vmem:[#allocation3 + $0x78] sm:$0xff]  ;;  %5447 = vmatprep.subr.bf16.mxu0 %v5931_v1 }
 0x42d   : > { %2801 = vst.msk [vmem:[#allocation3 + $0xa9] sm:$0xff] %vm1746_vm4, %v2768_v18  ;;  %v2769_v45 = vmax.f32 %v2681_v6, 0.0  ;;  %v5278_v60 = vpop.f32.mrb[49].mxu1  ;;  %3397 = vrot.lane.b32.xlu0 %v3073_v30, %s6288_s17  ;;  %v2952_v50 = vld [vmem:[#allocation3 + $0x79] sm:$0xff]  ;;  %v2412_v6 = vadd.f32 %v7537_v49, %v7461_v41 }
 0x42e   : > { %3351 = vrot.lane.b32.xlu1 %v7665_v15, %s6288_s17  ;;  %2804 = vst.msk [vmem:[#allocation3 + $0xc9] sm:$0xff] %vm1746_vm4, %v2771_v42  ;;  %v5279_v38 = vadd.f32 %v5278_v60, %v5277_v23  ;;  %v5280_v43 = vpop.f32.mrb[50].mxu1  ;;  %v3047_v44 = vld [vmem:[#allocation3 + $0x80] sm:$0xff]  ;;  %v3049_v34 = vld [vmem:[#allocation3 + $0x98] sm:$0xff] }
 0x42f   : > { %v2953_v17 = vld [vmem:[#allocation3 + $0x81] sm:$0xff]  ;;  %2802 = vst.msk [vmem:[#allocation3 + $0xb1] sm:$0xff] %vm1746_vm4, %v2769_v45  ;;  %v5281_v5 = vpop.f32.mrb[51].mxu1  ;;  %v5629_v61 = vpop.f32.mrb[80].mxu0  ;;  %v3074_v46 = vpack.c.bf16 %v3047_v44, %v3046_v26  ;;  %v2955_v31 = vld [vmem:[#allocation3 + $0x99] sm:$0xff]  ;;  %5448 = vmatpush3.bf16.msra.mxu0 %v5932_v8 }
 0x430   : > { %v7677_v9 = vpack.c.bf16 %v2953_v17, %v2952_v50  ;;  %v5282_v53 = vadd.f32 %v5281_v5, %v5280_v43  ;;  %v2702_v55 = vadd.f32 %v5629_v61, %v7597_v36  ;;  %v2693_v54 = vpop.f32.mrb[81].mxu0  ;;  %v7683_v58 = vadd.f32 %v5279_v38, %v2404_v37  ;;  %v3048_v36 = vld [vmem:[#allocation3 + $0x90] sm:$0xff]  ;;  %v3134_v5 = vld [vmem:[#allocation3 + $0x1a] sm:$0xff]  ;;  %v3135_v61 = vld [vmem:[#allocation3 + $0x22] sm:$0xff] }
 0x431   : > { %v2694_v13 = vadd.f32 %v2693_v54, %v7575_v29  ;;  %v5630_v48 = vpop.f32.mrb[82].mxu0  ;;  %3399 = vrot.lane.b32.xlu0 %v3074_v46, %s6288_s17  ;;  %v3075_v29 = vpack.c.bf16 %v3049_v34, %v3048_v36  ;;  %v7695_v22 = vpack.c.bf16 %v2955_v31, %v2954_v56  ;;  %v2415_v43 = vadd.f32 %v7541_v32, %v7461_v41 }
 0x432   : > { %3353 = vrot.lane.b32.xlu1 %v7677_v9, %s6288_s17  ;;  %v2774_v12 = vmax.f32 %v2702_v55, 0.0  ;;  %v2705_v47 = vadd.f32 %v5630_v48, %v7601_v52  ;;  %v2696_v35 = vpop.f32.mrb[83].mxu0  ;;  %v7692_v2 = vadd.f32 %v5282_v53, %v2407_v0  ;;  %v7718_v1 = vpack.c.bf16 %v3135_v61, %v3134_v5 }
 0x433   : > { %v2772_v21 = vmax.f32 %v2694_v13, 0.0  ;;  %v2697_v27 = vadd.f32 %v2696_v35, %v7580_v16  ;;  %v3052_v55 = vld [vmem:[#allocation3 + $0xc0] sm:$0xff] }
 0x434   : > { %2807 = vst.msk [vmem:[#allocation3 + $0xf1] sm:$0xff] %vm1746_vm4, %v2774_v12  ;;  %v2775_v19 = vmax.f32 %v2705_v47, 0.0  ;;  %v5283_v28 = vpop.f32.mrb[52].mxu1  ;;  %v3050_v16 = vld [vmem:[#allocation3 + $0xa8] sm:$0xff] }
 0x435   : > { %2805 = vst.msk [vmem:[#allocation3 + $0xd9] sm:$0xff] %vm1746_vm4, %v2772_v21  ;;  %v2773_v52 = vmax.f32 %v2697_v27, 0.0  ;;  %v5284_v18 = vpop.f32.mrb[53].mxu1  ;;  %3401 = vrot.lane.b32.xlu0 %v3075_v29, %s6288_s17  ;;  %v2956_v23 = vld [vmem:[#allocation3 + $0xa9] sm:$0xff]  ;;  %v2958_v36 = vld [vmem:[#allocation3 + $0xc1] sm:$0xff]  ;;  %v2423_v29 = vadd.f32 %v7554_v24, %v7461_v41 }
 0x436   : > { %3355 = vrot.lane.b32.xlu1 %v7695_v22, %s6288_s17  ;;  %2808 = vst.msk [vmem:[#allocation3 + $0xf9] sm:$0xff] %vm1746_vm4, %v2775_v19  ;;  %v5285_v30 = vadd.f32 %v5284_v18, %v5283_v28  ;;  %v5286_v25 = vpop.f32.mrb[54].mxu1  ;;  %v3051_v42 = vld [vmem:[#allocation3 + $0xb0] sm:$0xff]  ;;  %v3053_v17 = vld [vmem:[#allocation3 + $0xc8] sm:$0xff] }
 0x437   : > { %v2957_v45 = vld [vmem:[#allocation3 + $0xb1] sm:$0xff]  ;;  %2806 = vst.msk [vmem:[#allocation3 + $0xe1] sm:$0xff] %vm1746_vm4, %v2773_v52  ;;  %v5287_v60 = vpop.f32.mrb[55].mxu1  ;;  %v5633_v26 = vpop.f32.mrb[84].mxu0  ;;  %v3076_v37 = vpack.c.bf16 %v3051_v42, %v3050_v16  ;;  %v3077_v14 = vpack.c.bf16 %v3053_v17, %v3052_v55  ;;  %v2959_v48 = vld [vmem:[#allocation3 + $0xc9] sm:$0xff] }
 0x438   : > { %v7707_v38 = vpack.c.bf16 %v2957_v45, %v2956_v23  ;;  %v5288_v44 = vadd.f32 %v5287_v60, %v5286_v25  ;;  %v2718_v49 = vadd.f32 %v5633_v26, %v7652_v20  ;;  %v2709_v50 = vpop.f32.mrb[85].mxu0  ;;  %v2573_v46 = vadd.f32 %v5285_v30, %v2412_v6  ;;  %v3136_v18 = vld [vmem:[#allocation3 + $0x32] sm:$0xff] }
 0x439   : > { %v2710_v34 = vadd.f32 %v2709_v50, %v7617_v51  ;;  %v5634_v33 = vpop.f32.mrb[86].mxu0  ;;  %3403 = vrot.lane.b32.xlu0 %v3076_v37, %s6288_s17  ;;  %v7729_v27 = vpack.c.bf16 %v2959_v48, %v2958_v36 }
 0x43a   : > { %3357 = vrot.lane.b32.xlu1 %v7707_v38, %s6288_s17  ;;  %v2778_v0 = vmax.f32 %v2718_v49, 0.0  ;;  %v2721_v53 = vadd.f32 %v5634_v33, %v7662_v57  ;;  %v2712_v32 = vpop.f32.mrb[87].mxu0  ;;  %v2576_v54 = vadd.f32 %v5288_v44, %v2415_v43 }
 0x43b   : > { %v2776_v20 = vmax.f32 %v2710_v34, 0.0  ;;  %v2713_v31 = vadd.f32 %v2712_v32, %v7626_v11  ;;  %v2420_v11 = vadd.f32 %v7549_v7, %v7461_v41  ;;  %v3137_v7 = vld [vmem:[#allocation3 + $0x3a] sm:$0xff] }
 0x43c   : > { %2811 = vst.msk [vmem:[#allocation3 + $0x121] sm:$0xff] %vm1746_vm4, %v2778_v0  ;;  %v2779_v51 = vmax.f32 %v2721_v53, 0.0  ;;  %v5289_v13 = vpop.f32.mrb[56].mxu1  ;;  %v3054_v24 = vld [vmem:[#allocation3 + $0xd8] sm:$0xff]  ;;  %v7741_v43 = vpack.c.bf16 %v3137_v7, %v3136_v18  ;;  %v2431_v0 = vadd.f32 %v7567_v10, %v7461_v41 }
 0x43d   : > { %2809 = vst.msk [vmem:[#allocation3 + $0x109] sm:$0xff] %vm1746_vm4, %v2776_v20  ;;  %v2777_v12 = vmax.f32 %v2713_v31, 0.0  ;;  %v5290_v47 = vpop.f32.mrb[57].mxu1  ;;  %3405 = vrot.lane.b32.xlu0 %v3077_v14, %s6288_s17  ;;  %v2960_v61 = vld [vmem:[#allocation3 + $0xd9] sm:$0xff]  ;;  %v3138_v20 = vld [vmem:[#allocation3 + $0x4a] sm:$0xff] }
 0x43e   : > { %3439 = vrot.lane.b32.xlu1 %v7718_v1, %s6288_s17  ;;  %2812 = vst.msk [vmem:[#allocation3 + $0x129] sm:$0xff] %vm1746_vm4, %v2779_v51  ;;  %v5291_v57 = vadd.f32 %v5290_v47, %v5289_v13  ;;  %v5292_v35 = vpop.f32.mrb[58].mxu1  ;;  %v3055_v52 = vld [vmem:[#allocation3 + $0xe0] sm:$0xff] }
 0x43f   : > { %2810 = vst.msk [vmem:[#allocation3 + $0x111] sm:$0xff] %vm1746_vm4, %v2777_v12  ;;  %v5293_v56 = vpop.f32.mrb[59].mxu1  ;;  %v5637_v21 = vpop.f32.mrb[88].mxu0  ;;  %v7739_v37 = vpack.c.bf16 %v3055_v52, %v3054_v24  ;;  %v3056_v12 = vld [vmem:[#allocation3 + $0xf0] sm:$0xff]  ;;  %v2963_v36 = vld [vmem:[#allocation3 + $0xf9] sm:$0xff] }
 0x440   : > { %v5294_v8 = vadd.f32 %v5293_v56, %v5292_v35  ;;  %v2734_v19 = vadd.f32 %v5637_v21, %v2573_v46  ;;  %v2725_v28 = vpop.f32.mrb[89].mxu0  ;;  %v2581_v16 = vadd.f32 %v5291_v57, %v2420_v11  ;;  %v2962_v21 = vld [vmem:[#allocation3 + $0xf1] sm:$0xff] }
 0x441   : > { %v2726_v6 = vadd.f32 %v2725_v28, %v7683_v58  ;;  %v5638_v30 = vpop.f32.mrb[90].mxu0  ;;  %3487 = vrot.lane.b32.xlu0 %v7631_v4, %s6288_s17  ;;  %v2961_v4 = vld [vmem:[#allocation3 + $0xe1] sm:$0xff]  ;;  %v3141_v28 = vld [vmem:[#allocation3 + $0x6a] sm:$0xff] }
 0x442   : > { %3359 = vrot.lane.b32.xlu1 %v7729_v27, %s6288_s17  ;;  %v2782_v25 = vmax.f32 %v2734_v19, 0.0  ;;  %v2737_v42 = vadd.f32 %v5638_v30, %v2576_v54  ;;  %v2728_v23 = vpop.f32.mrb[91].mxu0  ;;  %v2584_v45 = vadd.f32 %v5294_v8, %v2423_v29  ;;  %v7753_v33 = vpack.c.bf16 %v2961_v4, %v2960_v61  ;;  %v3057_v54 = vld [vmem:[#allocation3 + $0xf8] sm:$0xff]  ;;  %v3140_v19 = vld [vmem:[#allocation3 + $0x62] sm:$0xff] }
 0x443   : > { %v2780_v60 = vmax.f32 %v2726_v6, 0.0  ;;  %v2729_v26 = vadd.f32 %v2728_v23, %v7692_v2  ;;  %v2428_v2 = vadd.f32 %v7563_v62, %v7461_v41  ;;  %v3139_v62 = vld [vmem:[#allocation3 + $0x52] sm:$0xff]  ;;  %v7761_v10 = vpack.c.bf16 %v3057_v54, %v3056_v12  ;;  %v3060_v23 = vld [vmem:[#allocation3 + $0x120] sm:$0xff] }
 0x444   : > { %2815 = vst.msk [vmem:[#allocation3 + $0x151] sm:$0xff] %vm1746_vm4, %v2782_v25  ;;  %v2783_v58 = vmax.f32 %v2737_v42, 0.0  ;;  %v5295_v44 = vpop.f32.mrb[60].mxu1  ;;  %v7763_v11 = vpack.c.bf16 %v3139_v62, %v3138_v20  ;;  %v7772_v29 = vpack.c.bf16 %v2963_v36, %v2962_v21  ;;  %v3058_v52 = vld [vmem:[#allocation3 + $0x108] sm:$0xff]  ;;  %v7781_v7 = vpack.c.bf16 %v3141_v28, %v3140_v19  ;;  %v3145_v4 = vld [vmem:[#allocation3 + $0x9a] sm:$0xff] }
 0x445   : > { %2813 = vst.msk [vmem:[#allocation3 + $0x139] sm:$0xff] %vm1746_vm4, %v2780_v60  ;;  %v2781_v49 = vmax.f32 %v2729_v26, 0.0  ;;  %v5296_v50 = vpop.f32.mrb[61].mxu1  ;;  %3407 = vrot.lane.b32.xlu0 %v7739_v37, %s6288_s17  ;;  %v2964_v6 = vld [vmem:[#allocation3 + $0x109] sm:$0xff]  ;;  %v2966_v26 = vld [vmem:[#allocation3 + $0x121] sm:$0xff] }
 0x446   : > { %3441 = vrot.lane.b32.xlu1 %v7741_v43, %s6288_s17  ;;  %2816 = vst.msk [vmem:[#allocation3 + $0x159] sm:$0xff] %vm1746_vm4, %v2783_v58  ;;  %v5297_v17 = vadd.f32 %v5296_v50, %v5295_v44  ;;  %v5298_v5 = vpop.f32.mrb[62].mxu1  ;;  %v3059_v8 = vld [vmem:[#allocation3 + $0x110] sm:$0xff]  ;;  %v3061_v25 = vld [vmem:[#allocation3 + $0x128] sm:$0xff]  ;;  %v3153_v21 = vld [vmem:[#allocation3 + $0xfa] sm:$0xff] }
 0x447   : > { %2814 = vst.msk [vmem:[#allocation3 + $0x141] sm:$0xff] %vm1746_vm4, %v2781_v49  ;;  %v5299_v46 = vpop.f32.mrb[63].mxu1  ;;  %v5641_v34 = vpop.f32.mrb[92].mxu0  ;;  %v7779_v18 = vpack.c.bf16 %v3059_v8, %v3058_v52  ;;  %v3143_v42 = vld [vmem:[#allocation3 + $0x82] sm:$0xff]  ;;  %v7793_v24 = vpack.c.bf16 %v3061_v25, %v3060_v23  ;;  %v3154_v19 = vld [vmem:[#allocation3 + $0x10a] sm:$0xff]  ;;  %v3155_v28 = vld [vmem:[#allocation3 + $0x112] sm:$0xff] }
 0x448   : > { %v5300_v53 = vadd.f32 %v5299_v46, %v5298_v5  ;;  %v2589_v32 = vadd.f32 %v5297_v17, %v2428_v2  ;;  %v2741_v55 = vpop.f32.mrb[93].mxu0  ;;  %v2967_v60 = vld [vmem:[#allocation3 + $0x129] sm:$0xff] }
 0x449   : > { %v2742_v31 = vadd.f32 %v2741_v55, %v2581_v16  ;;  %v5642_v14 = vpop.f32.mrb[94].mxu0  ;;  %3489 = vrot.lane.b32.xlu0 %v7646_v39, %s6288_s17  ;;  %v2965_v16 = vld [vmem:[#allocation3 + $0x111] sm:$0xff]  ;;  %v7801_v58 = vpack.c.bf16 %v2967_v60, %v2966_v26  ;;  %v3156_v52 = vld [vmem:[#allocation3 + $0x122] sm:$0xff] }
 0x44a   : > { %3361 = vrot.lane.b32.xlu1 %v7753_v33, %s6288_s17  ;;  %v2750_v51 = vadd.f32 %v5641_v34, %v2589_v32  ;;  %v2592_v13 = vadd.f32 %v5300_v53, %v2431_v0  ;;  %v2744_v48 = vpop.f32.mrb[95].mxu0  ;;  %v7787_v30 = vpack.c.bf16 %v2965_v16, %v2964_v6  ;;  %v3146_v34 = vld [vmem:[#allocation3 + $0xaa] sm:$0xff] }
 0x44b   : > { %v2784_v47 = vmax.f32 %v2742_v31, 0.0  ;;  %v2745_v41 = vadd.f32 %v2744_v48, %v2584_v45  ;;  %v3064_v0 = vld [vmem:[#allocation3 + $0x150] sm:$0xff]  ;;  %v3148_v31 = vld [vmem:[#allocation3 + $0xc2] sm:$0xff] }
 0x44c   : > { %v2786_v57 = vmax.f32 %v2750_v51, 0.0  ;;  %v2753_v35 = vadd.f32 %v5642_v14, %v2592_v13  ;;  %v3062_v49 = vld [vmem:[#allocation3 + $0x138] sm:$0xff]  ;;  %v3149_v14 = vld [vmem:[#allocation3 + $0xca] sm:$0xff] }
 0x44d   : > { %2817 = vst.msk [vmem:[#allocation3 + $0x169] sm:$0xff] %vm1746_vm4, %v2784_v47  ;;  %v2785_v56 = vmax.f32 %v2745_v41, 0.0  ;;  %3409 = vrot.lane.b32.xlu0 %v7761_v10, %s6288_s17  ;;  %v2968_v5 = vld [vmem:[#allocation3 + $0x139] sm:$0xff]  ;;  %v2970_v54 = vld [vmem:[#allocation3 + $0x151] sm:$0xff]  ;;  %v7829_v13 = vpack.c.bf16 %v3149_v14, %v3148_v31  ;;  %v2895_v23 = vld [vmem:[#allocation3 + $0x8] sm:$0xff] }
 0x44e   : > { %3443 = vrot.lane.b32.xlu1 %v7763_v11, %s6288_s17  ;;  %2819 = vst.msk [vmem:[#allocation3 + $0x181] sm:$0xff] %vm1746_vm4, %v2786_v57  ;;  %v2787_v39 = vmax.f32 %v2753_v35, 0.0  ;;  %v3063_v44 = vld [vmem:[#allocation3 + $0x140] sm:$0xff]  ;;  %v3065_v46 = vld [vmem:[#allocation3 + $0x158] sm:$0xff]  ;;  %v3157_v16 = vld [vmem:[#allocation3 + $0x12a] sm:$0xff] }
 0x44f   : > { %2818 = vst.msk [vmem:[#allocation3 + $0x171] sm:$0xff] %vm1746_vm4, %v2785_v56  ;;  %v7807_v50 = vpack.c.bf16 %v3063_v44, %v3062_v49  ;;  %v2969_v17 = vld [vmem:[#allocation3 + $0x141] sm:$0xff]  ;;  %v7818_v53 = vpack.c.bf16 %v3065_v46, %v3064_v0  ;;  %v2971_v55 = vld [vmem:[#allocation3 + $0x159] sm:$0xff]  ;;  %v7854_v6 = vpack.c.bf16 %v3157_v16, %v3156_v52 }
 0x450   : > { %2820 = vst.msk [vmem:[#allocation3 + $0x189] sm:$0xff] %vm1746_vm4, %v2787_v39  ;;  %v2987_v61 = vpack.c.bf16 %v2969_v17, %v2968_v5  ;;  %v2988_v20 = vpack.c.bf16 %v2971_v55, %v2970_v54  ;;  %v3150_v57 = vld [vmem:[#allocation3 + $0xda] sm:$0xff]  ;;  %v3151_v35 = vld [vmem:[#allocation3 + $0xe2] sm:$0xff]  ;;  %v3152_v39 = vld [vmem:[#allocation3 + $0xf2] sm:$0xff] }
 0x451   : > { %3491 = vrot.lane.b32.xlu0 %v7665_v15, %s6288_s17  ;;  %v3142_v15 = vld [vmem:[#allocation3 + $0x7a] sm:$0xff]  ;;  %v7837_v56 = vpack.c.bf16 %v3151_v35, %v3150_v57  ;;  %v7842_v8 = vpack.c.bf16 %v3153_v21, %v3152_v39  ;;  %v3160_v60 = vld [vmem:[#allocation3 + $0x152] sm:$0xff]  ;;  %v2990_v44 = vld [vmem:[#allocation3 + $0x2] sm:$0xff] }
 0x452   : > { %3363 = vrot.lane.b32.xlu1 %v7772_v29, %s6288_s17  ;;  %v7795_v45 = vpack.c.bf16 %v3143_v42, %v3142_v15  ;;  %v3158_v25 = vld [vmem:[#allocation3 + $0x13a] sm:$0xff]  ;;  %v3159_v15 = vld [vmem:[#allocation3 + $0x142] sm:$0xff]  ;;  %v5933_v54 = vld [vmem:[%s6736_s21 + $0x108] sm:$0xff]  }
 0x453   : > { %v2894_v42 = vld [vmem:[#allocation3] sm:$0xff]  ;;  %v5934_v57 = vld [vmem:[%s6736_s21 + $0x110] sm:$0xff]  }
 0x454   : > { %v2972_v12 = vld [vmem:[#allocation3 + $0x169] sm:$0xff]  ;;  %v3161_v26 = vld [vmem:[#allocation3 + $0x15a] sm:$0xff] }
 0x455   : > { %3411 = vrot.lane.b32.xlu0 %v7779_v18, %s6288_s17  ;;  %v3259_v31 = vld [vmem:[#allocation3 + $0x181] sm:$0xff]  ;;  %v3261_v14 = vld [vmem:[#allocation3 + $0x199] sm:$0xff] }
 0x456   : > { %3445 = vrot.lane.b32.xlu1 %v7781_v7, %s6288_s17  ;;  %v3067_v62 = vld [vmem:[#allocation3 + $0x170] sm:$0xff] }
 0x457   : > { %v2973_v48 = vld [vmem:[#allocation3 + $0x171] sm:$0xff]  ;;  %v3069_v41 = vld [vmem:[#allocation3 + $0x188] sm:$0xff] }
 0x458   : > { %v2989_v47 = vpack.c.bf16 %v2973_v48, %v2972_v12  ;;  %v3162_v17 = vld [vmem:[#allocation3 + $0x16a] sm:$0xff]  ;;  %v3163_v5 = vld [vmem:[#allocation3 + $0x172] sm:$0xff] }
 0x459   : > { %3493 = vrot.lane.b32.xlu0 %v7677_v9, %s6288_s17  ;;  %v3144_v9 = vld [vmem:[#allocation3 + $0x92] sm:$0xff]  ;;  %v7872_v0 = vpack.c.bf16 %v3163_v5, %v3162_v17  ;;  %v3260_v55 = vld [vmem:[#allocation3 + $0x189] sm:$0xff]  ;;  %v2902_v17 = vld [vmem:[#allocation3 + $0x60] sm:$0xff] }
 0x45a   : > { %3365 = vrot.lane.b32.xlu1 %v7787_v30, %s6288_s17  ;;  %v7809_v2 = vpack.c.bf16 %v3145_v4, %v3144_v9  ;;  %v2991_v9 = vld [vmem:[#allocation3 + $0xa] sm:$0xff]  ;;  %v2926_v4 = vpack.c.bf16 %v2895_v23, %v2894_v42  ;;  %v7879_v12 = vpack.c.bf16 %v3260_v55, %v3259_v31  ;;  %v2905_v31 = vld [vmem:[#allocation3 + $0x80] sm:$0xff] }
 0x45b   : > { %v3022_v49 = vpack.c.bf16 %v2991_v9, %v2990_v44  ;;  %v3087_v44 = vld [vmem:[#allocation3 + $0x21] sm:$0xff]  ;;  %v3183_v9 = vld [vmem:[#allocation3 + $0x30] sm:$0xff] }
 0x45d   : > { %3413 = vrot.lane.b32.xlu0 %v7793_v24, %s6288_s17 }
 0x45e   : > { %3447 = vrot.lane.b32.xlu1 %v7795_v45, %s6288_s17 }
 0x461   : > { %3495 = vrot.lane.b32.xlu0 %v7695_v22, %s6288_s17  ;;  %v3147_v22 = vld [vmem:[#allocation3 + $0xb2] sm:$0xff] }
 0x462   : > { %3367 = vrot.lane.b32.xlu1 %v7801_v58, %s6288_s17  ;;  %v7820_v32 = vpack.c.bf16 %v3147_v22, %v3146_v34 }
 0x465   : > { %3415 = vrot.lane.b32.xlu0 %v7807_v50, %s6288_s17 }
 0x466   : > { %3449 = vrot.lane.b32.xlu1 %v7809_v2, %s6288_s17 }
 0x469   : > { %3497 = vrot.lane.b32.xlu0 %v7707_v38, %s6288_s17  ;;  %v3066_v38 = vld [vmem:[#allocation3 + $0x168] sm:$0xff] }
 0x46a   : > { %3369 = vrot.lane.b32.xlu1 %v2987_v61, %s6288_s17  ;;  %v3084_v51 = vpack.c.bf16 %v3067_v62, %v3066_v38  ;;  %v3165_v62 = vld [vmem:[#allocation3 + $0x18a] sm:$0xff]  ;;  %v3262_v38 = vld [vmem:[#allocation3 + $0x1a1] sm:$0xff] }
 0x46b   : > { %v3278_v35 = vpack.c.bf16 %v3262_v38, %v3261_v14  ;;  %v3089_v14 = vld [vmem:[#allocation3 + $0x39] sm:$0xff]  ;;  %v3185_v38 = vld [vmem:[#allocation3 + $0x48] sm:$0xff] }
 0x46d   : > { %3417 = vrot.lane.b32.xlu0 %v7818_v53, %s6288_s17 }
 0x46e   : > { %3451 = vrot.lane.b32.xlu1 %v7820_v32, %s6288_s17 }
 0x471   : > { %3499 = vrot.lane.b32.xlu0 %v7729_v27, %s6288_s17  ;;  %v3068_v27 = vld [vmem:[#allocation3 + $0x180] sm:$0xff] }
 0x472   : > { %3371 = vrot.lane.b32.xlu1 %v2988_v20, %s6288_s17  ;;  %v3085_v36 = vpack.c.bf16 %v3069_v41, %v3068_v27 }
 0x475   : > { %3419 = vrot.lane.b32.xlu0 %v3084_v51, %s6288_s17 }
 0x476   : > { %3453 = vrot.lane.b32.xlu1 %v7829_v13, %s6288_s17 }
 0x479   : > { %3501 = vrot.lane.b32.xlu0 %v7753_v33, %s6288_s17  ;;  %v7848_v33 = vpack.c.bf16 %v3155_v28, %v3154_v19 }
 0x47a   : > { %3373 = vrot.lane.b32.xlu1 %v2989_v47, %s6288_s17 }
 0x47d   : > { %3421 = vrot.lane.b32.xlu0 %v3085_v36, %s6288_s17  ;;  %v5935_v36 = vld [vmem:[%s6736_s21 + $0x118] sm:$0xff]  }
 0x47e   : > { %3455 = vrot.lane.b32.xlu1 %v7837_v56, %s6288_s17 }
 0x481   : > { %3503 = vrot.lane.b32.xlu0 %v7772_v29, %s6288_s17  ;;  %v7860_v29 = vpack.c.bf16 %v3159_v15, %v3158_v25 }
 0x482   : > { %3457 = vrot.lane.b32.xlu1 %v7842_v8, %s6288_s17 }
 0x485   : > { %3505 = vrot.lane.b32.xlu0 %v7787_v30, %s6288_s17  ;;  %v3344_v30 = vpop.permute.xlu1 %3343 }
 0x486   : > { %3459 = vrot.lane.b32.xlu1 %v7848_v33, %s6288_s17 }
 0x489   : > { %3507 = vrot.lane.b32.xlu0 %v7801_v58, %s6288_s17  ;;  %v7865_v58 = vpack.c.bf16 %v3161_v26, %v3160_v60 }
 0x48a   : > { %3461 = vrot.lane.b32.xlu1 %v7854_v6, %s6288_s17 }
 0x48d   : > { %3509 = vrot.lane.b32.xlu0 %v2987_v61, %s6288_s17  ;;  %v3521_v61 = vsel %vm1746_vm4, %v2926_v4, %v3344_v30  ;;  %v3184_v30 = vld [vmem:[#allocation3 + $0x38] sm:$0xff] }
 0x48e   : > { %3463 = vrot.lane.b32.xlu1 %v7860_v29, %s6288_s17  ;;  %v3086_v4 = vld [vmem:[#allocation3 + $0x19] sm:$0xff] }
 0x48f   : > { %v3118_v5 = vpack.c.bf16 %v3087_v44, %v3086_v4  ;;  %v2909_v4 = vld [vmem:[#allocation3 + $0xb0] sm:$0xff] }
 0x491   : > { %3511 = vrot.lane.b32.xlu0 %v2988_v20, %s6288_s17  ;;  %v3164_v20 = vld [vmem:[#allocation3 + $0x182] sm:$0xff] }
 0x492   : > { %3465 = vrot.lane.b32.xlu1 %v7865_v58, %s6288_s17  ;;  %v7883_v41 = vpack.c.bf16 %v3165_v62, %v3164_v20  ;;  %v3186_v62 = vld [vmem:[#allocation3 + $0x50] sm:$0xff] }
 0x493   : > { %v3392_v46 = vpop.permute.xlu0 %3391 }
 0x494   : > { %v3346_v34 = vpop.permute.xlu1 %3345  ;;  %v3585_v22 = vsel %vm1746_vm4, %v3022_v49, %v3392_v46  ;;  %v3215_v49 = vpack.c.bf16 %v3184_v30, %v3183_v9 }
 0x495   : > { %3513 = vrot.lane.b32.xlu0 %v2989_v47, %s6288_s17  ;;  %4077 = vmatprep.mubr.bf16.mxu1 %v3585_v22 }
 0x496   : > { %3467 = vrot.lane.b32.xlu1 %v7872_v0, %s6288_s17  ;;  %4078 = vmatmul.mubr.bf16.vlgmr.msra.gmra.mrb[64].mxu1 %v3521_v61 }
 0x497   : > { %5644 = vmatpush3.bf16.msra.mxu1 %v7584_v40  ;;  %v3394_v51 = vpop.permute.xlu0 %3393 }
 0x498   : > { %v3348_v48 = vpop.permute.xlu1 %3347  ;;  %v3589_v47 = vsel %vm1746_vm4, %v7718_v1, %v3394_v51  ;;  %5645 = vmatprep.subr.bf16.mxu1 %v5933_v54  ;;  %v3525_v1 = vsel %vm1746_vm4, %v7611_v3, %v3346_v34  ;;  %v3216_v51 = vpack.c.bf16 %v3186_v62, %v3185_v38  ;;  %v2911_v62 = vld [vmem:[#allocation3 + $0xc8] sm:$0xff]  ;;  %v3094_v38 = vld [vmem:[#allocation3 + $0x79] sm:$0xff] }
 0x499   : > { %3515 = vrot.lane.b32.xlu0 %v7879_v12, %s6288_s17  ;;  %4085 = vmatprep.mubr.bf16.mxu1 %v3589_v47  ;;  %v3529_v16 = vsel %vm1746_vm4, %v7629_v59, %v3348_v48  ;;  %v2904_v48 = vld [vmem:[#allocation3 + $0x78] sm:$0xff] }
 0x49a   : > { %3469 = vrot.lane.b32.xlu1 %v7883_v41, %s6288_s17  ;;  %v3088_v47 = vld [vmem:[#allocation3 + $0x31] sm:$0xff] }
 0x49b   : > { %v3396_v40 = vpop.permute.xlu0 %3395  ;;  %5646 = vmatpush3.bf16.msra.mxu1 %v5933_v54 }
 0x49c   : > { %v3350_v27 = vpop.permute.xlu1 %3349  ;;  %5647 = vmatprep.subr.bf16.mxu1 %v5934_v57  ;;  %v3593_v39 = vsel %vm1746_vm4, %v7741_v43, %v3396_v40  ;;  %v2931_v40 = vpack.c.bf16 %v2905_v31, %v2904_v48  ;;  %v3095_v31 = vld [vmem:[#allocation3 + $0x81] sm:$0xff] }
 0x49d   : > { %3517 = vrot.lane.b32.xlu0 %v3278_v35, %s6288_s17  ;;  %v3533_v23 = vsel %vm1746_vm4, %v7644_v63, %v3350_v27  ;;  %v3119_v27 = vpack.c.bf16 %v3089_v14, %v3088_v47  ;;  %v2910_v14 = vld [vmem:[#allocation3 + $0xc0] sm:$0xff] }
 0x49e   : > { %4086 = vmatmul.mubr.bf16.gmra.mrb[68].mxu1 %v3525_v1  ;;  %v2934_v47 = vpack.c.bf16 %v2911_v62, %v2910_v14 }
 0x49f   : > { %v3398_v21 = vpop.permute.xlu0 %3397  ;;  %4093 = vmatprep.mubr.bf16.mxu1 %v3593_v39  ;;  %5648 = vmatpush3.bf16.msra.mxu1 %v5934_v57 }
 0x4a0   : > { %v3352_v19 = vpop.permute.xlu1 %3351  ;;  %5649 = vmatprep.subr.bf16.mxu1 %v5935_v36  ;;  %v3597_v3 = vsel %vm1746_vm4, %v7763_v11, %v3398_v21  ;;  %v2903_v11 = vld [vmem:[#allocation3 + $0x68] sm:$0xff] }
 0x4a1   : > { %v2930_v34 = vpack.c.bf16 %v2903_v11, %v2902_v17  ;;  %v2908_v17 = vld [vmem:[#allocation3 + $0xa8] sm:$0xff] }
 0x4a3   : > { %v3400_v28 = vpop.permute.xlu0 %3399  ;;  %5650 = vmatpush3.bf16.msra.mxu1 %v5935_v36 }
 0x4a4   : > { %v3354_v52 = vpop.permute.xlu1 %3353  ;;  %v3601_v60 = vsel %vm1746_vm4, %v7781_v7, %v3400_v28  ;;  %v3537_v7 = vsel %vm1746_vm4, %v2930_v34, %v3352_v19  ;;  %v2907_v28 = vld [vmem:[#allocation3 + $0x98] sm:$0xff] }
 0x4a6   : > { %4094 = vmatmul.mubr.bf16.gmra.mrb[72].mxu1 %v3529_v16  ;;  %v3091_v16 = vld [vmem:[#allocation3 + $0x51] sm:$0xff] }
 0x4a7   : > { %v3402_v25 = vpop.permute.xlu0 %3401  ;;  %4101 = vmatprep.mubr.bf16.mxu1 %v3597_v3  ;;  %v2906_v3 = vld [vmem:[#allocation3 + $0x90] sm:$0xff] }
 0x4a8   : > { %v7900_v15 = vpop.permute.xlu1 %3355  ;;  %v3605_v55 = vsel %vm1746_vm4, %v7795_v45, %v3402_v25  ;;  %v3541_v45 = vsel %vm1746_vm4, %v2931_v40, %v3354_v52  ;;  %v3090_v25 = vld [vmem:[#allocation3 + $0x49] sm:$0xff] }
 0x4a9   : > { %v3120_v30 = vpack.c.bf16 %v3091_v16, %v3090_v25 }
 0x4ab   : > { %v3404_v43 = vpop.permute.xlu0 %3403 }
 0x4ac   : > { %v7902_v42 = vpop.permute.xlu1 %3357  ;;  %v3609_v39 = vsel %vm1746_vm4, %v7809_v2, %v3404_v43 }
 0x4ae   : > { %4102 = vmatmul.mubr.bf16.gmra.mrb[76].mxu1 %v3533_v23 }
 0x4af   : > { %v3406_v26 = vpop.permute.xlu0 %3405  ;;  %4109 = vmatprep.mubr.bf16.mxu1 %v3601_v60 }
 0x4b0   : > { %v3440_v59 = vpop.permute.xlu1 %3439  ;;  %v3613_v43 = vsel %vm1746_vm4, %v7820_v32, %v3406_v26 }
 0x4b1   : > { %v3649_v22 = vsel %vm1746_vm4, %v3118_v5, %v3440_v59  ;;  %v2932_v59 = vpack.c.bf16 %v2907_v28, %v2906_v3  ;;  %v3092_v5 = vld [vmem:[#allocation3 + $0x61] sm:$0xff] }
 0x4b3   : > { %v3488_v61 = vpop.permute.xlu0 %3487  ;;  %v3545_v44 = vsel %vm1746_vm4, %v2932_v59, %v7900_v15 }
 0x4b4   : > { %v7908_v46 = vpop.permute.xlu1 %3359  ;;  %v3713_v63 = vsel %vm1746_vm4, %v3215_v49, %v3488_v61  ;;  %v3093_v49 = vld [vmem:[#allocation3 + $0x69] sm:$0xff] }
 0x4b5   : > { %4238 = vmatprep.mubr.bf16.mxu0 %v3713_v63  ;;  %v2933_v63 = vpack.c.bf16 %v2909_v4, %v2908_v17  ;;  %v3101_v4 = vld [vmem:[#allocation3 + $0xc9] sm:$0xff] }
 0x4b6   : > { %4110 = vmatmul.mubr.bf16.gmra.mrb[80].mxu1 %v3537_v7  ;;  %4239 = vmatmul.mubr.bf16.vlgmr.msra.gmra.mrb[96].mxu0 %v3649_v22  ;;  %v3121_v22 = vpack.c.bf16 %v3093_v49, %v3092_v5  ;;  %v3197_v49 = vld [vmem:[#allocation3 + $0xd8] sm:$0xff]  ;;  %v3100_v5 = vld [vmem:[#allocation3 + $0xc1] sm:$0xff] }
 0x4b7   : > { %v3408_v54 = vpop.permute.xlu0 %3407  ;;  %4117 = vmatprep.mubr.bf16.mxu1 %v3605_v55  ;;  %v3549_v7 = vsel %vm1746_vm4, %v2933_v63, %v7902_v42 }
 0x4b8   : > { %v3442_v20 = vpop.permute.xlu1 %3441  ;;  %v3617_v26 = vsel %vm1746_vm4, %v7829_v13, %v3408_v54 }
 0x4b9   : > { %v3653_v1 = vsel %vm1746_vm4, %v3119_v27, %v3442_v20 }
 0x4bb   : > { %v3490_v57 = vpop.permute.xlu0 %3489 }
 0x4bc   : > { %v7915_v35 = vpop.permute.xlu1 %3361  ;;  %v3717_v36 = vsel %vm1746_vm4, %v3216_v51, %v3490_v57  ;;  %v3122_v57 = vpack.c.bf16 %v3095_v31, %v3094_v38  ;;  %v3102_v31 = vld [vmem:[#allocation3 + $0xd9] sm:$0xff] }
 0x4bd   : > { %4246 = vmatprep.mubr.bf16.mxu0 %v3717_v36 }
 0x4be   : > { %4118 = vmatmul.mubr.bf16.gmra.mrb[84].mxu1 %v3541_v45  ;;  %4247 = vmatmul.mubr.bf16.gmra.mrb[100].mxu0 %v3653_v1  ;;  %v3097_v45 = vld [vmem:[#allocation3 + $0x99] sm:$0xff]  ;;  %v3096_v1 = vld [vmem:[#allocation3 + $0x91] sm:$0xff] }
 0x4bf   : > { %v3410_v21 = vpop.permute.xlu0 %3409  ;;  %4125 = vmatprep.mubr.bf16.mxu1 %v3609_v39  ;;  %v3123_v28 = vpack.c.bf16 %v3097_v45, %v3096_v1  ;;  %v3104_v45 = vld [vmem:[#allocation3 + $0xf1] sm:$0xff] }
 0x4c0   : > { %v3444_v19 = vpop.permute.xlu1 %3443  ;;  %v3621_v54 = vsel %vm1746_vm4, %v7837_v56, %v3410_v21 }
 0x4c1   : > { %v3657_v2 = vsel %vm1746_vm4, %v3120_v30, %v3444_v19 }
 0x4c3   : > { %v3492_v23 = vpop.permute.xlu0 %3491 }
 0x4c4   : > { %v7922_v60 = vpop.permute.xlu1 %3363  ;;  %v3721_v52 = vsel %vm1746_vm4, %v2930_v34, %v3492_v23  ;;  %v3099_v23 = vld [vmem:[#allocation3 + $0xb1] sm:$0xff] }
 0x4c5   : > { %4254 = vmatprep.mubr.bf16.mxu0 %v3721_v52 }
 0x4c6   : > { %4126 = vmatmul.mubr.bf16.gmra.mrb[88].mxu1 %v3545_v44  ;;  %4255 = vmatmul.mubr.bf16.gmra.mrb[104].mxu0 %v3657_v2 }
 0x4c7   : > { %v3412_v11 = vpop.permute.xlu0 %3411  ;;  %4133 = vmatprep.mubr.bf16.mxu1 %v3613_v43 }
 0x4c8   : > { %v3446_v9 = vpop.permute.xlu1 %3445  ;;  %v3625_v56 = vsel %vm1746_vm4, %v7842_v8, %v3412_v11 }
 0x4c9   : > { %v3661_v32 = vsel %vm1746_vm4, %v3121_v22, %v3446_v9  ;;  %v3198_v9 = vld [vmem:[#allocation3 + $0xe0] sm:$0xff] }
 0x4ca   : > { %v3222_v17 = vpack.c.bf16 %v3198_v9, %v3197_v49  ;;  %v2924_v9 = vld [vmem:[#allocation3 + $0x168] sm:$0xff]  ;;  %v3280_v49 = vld [vmem:[#allocation3 + $0x3a] sm:$0xff] }
 0x4cb   : > { %v3494_v61 = vpop.permute.xlu0 %3493 }
 0x4cc   : > { %v7930_v34 = vpop.permute.xlu1 %3365  ;;  %v3725_v15 = vsel %vm1746_vm4, %v2931_v40, %v3494_v61  ;;  %v3553_v40 = vsel %vm1746_vm4, %v2934_v47, %v7908_v46  ;;  %v3557_v46 = vsel %vm1746_vm4, %v7739_v37, %v7915_v35  ;;  %v3561_v37 = vsel %vm1746_vm4, %v7761_v10, %v7922_v60 }
 0x4cd   : > { %4262 = vmatprep.mubr.bf16.mxu0 %v3725_v15  ;;  %v3565_v60 = vsel %vm1746_vm4, %v7779_v18, %v7930_v34 }
 0x4ce   : > { %4134 = vmatmul.mubr.bf16.gmra.mrb[92].mxu1 %v3549_v7  ;;  %4263 = vmatmul.mubr.bf16.gmra.mrb[108].mxu0 %v3661_v32  ;;  %v3200_v32 = vld [vmem:[#allocation3 + $0xf8] sm:$0xff] }
 0x4cf   : > { %v3414_v55 = vpop.permute.xlu0 %3413  ;;  %4141 = vmatprep.mubr.bf16.mxu1 %v3617_v26  ;;  %v3103_v26 = vld [vmem:[#allocation3 + $0xe1] sm:$0xff] }
 0x4d0   : > { %v3448_v20 = vpop.permute.xlu1 %3447  ;;  %v3629_v8 = vsel %vm1746_vm4, %v7848_v33, %v3414_v55  ;;  %v3199_v55 = vld [vmem:[#allocation3 + $0xf0] sm:$0xff]  ;;  %v3126_v38 = vpack.c.bf16 %v3103_v26, %v3102_v31 }
 0x4d1   : > { %v3665_v13 = vsel %vm1746_vm4, %v3122_v57, %v3448_v20  ;;  %v3223_v62 = vpack.c.bf16 %v3200_v32, %v3199_v55  ;;  %v3282_v32 = vld [vmem:[#allocation3 + $0x52] sm:$0xff] }
 0x4d2   : > { %v3110_v55 = vld [vmem:[#allocation3 + $0x139] sm:$0xff] }
 0x4d3   : > { %v3496_v51 = vpop.permute.xlu0 %3495 }
 0x4d4   : > { %v7938_v48 = vpop.permute.xlu1 %3367  ;;  %v3729_v42 = vsel %vm1746_vm4, %v2932_v59, %v3496_v51  ;;  %v3098_v59 = vld [vmem:[#allocation3 + $0xa9] sm:$0xff] }
 0x4d5   : > { %4270 = vmatprep.mubr.bf16.mxu0 %v3729_v42  ;;  %v3124_v44 = vpack.c.bf16 %v3099_v23, %v3098_v59  ;;  %v3202_v51 = vld [vmem:[#allocation3 + $0x110] sm:$0xff]  ;;  %v3569_v34 = vsel %vm1746_vm4, %v7793_v24, %v7938_v48  ;;  %v3203_v48 = vld [vmem:[#allocation3 + $0x120] sm:$0xff] }
 0x4d6   : > { %4142 = vmatmul.mubr.bf16.gmra.mrb[96].mxu1 %v3553_v40  ;;  %4271 = vmatmul.mubr.bf16.gmra.mrb[112].mxu0 %v3665_v13 }
 0x4d7   : > { %v3416_v27 = vpop.permute.xlu0 %3415  ;;  %4149 = vmatprep.mubr.bf16.mxu1 %v3621_v54  ;;  %v3105_v54 = vld [vmem:[#allocation3 + $0xf9] sm:$0xff] }
 0x4d8   : > { %v3450_v36 = vpop.permute.xlu1 %3449  ;;  %v3633_v15 = vsel %vm1746_vm4, %v7854_v6, %v3416_v27  ;;  %v3204_v27 = vld [vmem:[#allocation3 + $0x128] sm:$0xff]  ;;  %v3127_v24 = vpack.c.bf16 %v3105_v54, %v3104_v45  ;;  %v3288_v54 = vld [vmem:[#allocation3 + $0x9a] sm:$0xff] }
 0x4d9   : > { %v3669_v3 = vsel %vm1746_vm4, %v3123_v28, %v3450_v36  ;;  %v3211_v45 = vld [vmem:[#allocation3 + $0x180] sm:$0xff] }
 0x4db   : > { %v3498_v39 = vpop.permute.xlu0 %3497 }
 0x4dc   : > { %v7946_v19 = vpop.permute.xlu1 %3369  ;;  %v3733_v16 = vsel %vm1746_vm4, %v2933_v63, %v3498_v39  ;;  %v3125_v63 = vpack.c.bf16 %v3101_v4, %v3100_v5  ;;  %v3225_v39 = vpack.c.bf16 %v3204_v27, %v3203_v48  ;;  %v3108_v4 = vld [vmem:[#allocation3 + $0x121] sm:$0xff]  ;;  %v3207_v5 = vld [vmem:[#allocation3 + $0x150] sm:$0xff] }
 0x4dd   : > { %4278 = vmatprep.mubr.bf16.mxu0 %v3733_v16  ;;  %v3573_v28 = vsel %vm1746_vm4, %v7807_v50, %v7946_v19 }
 0x4de   : > { %4150 = vmatmul.mubr.bf16.gmra.mrb[100].mxu1 %v3557_v46  ;;  %4279 = vmatmul.mubr.bf16.gmra.mrb[116].mxu0 %v3669_v3  ;;  %v3107_v3 = vld [vmem:[#allocation3 + $0x111] sm:$0xff] }
 0x4df   : > { %v3418_v21 = vpop.permute.xlu0 %3417  ;;  %4157 = vmatprep.mubr.bf16.mxu1 %v3625_v56  ;;  %v3206_v56 = vld [vmem:[#allocation3 + $0x140] sm:$0xff] }
 0x4e0   : > { %v3452_v25 = vpop.permute.xlu1 %3451  ;;  %v3637_v57 = vsel %vm1746_vm4, %v7860_v29, %v3418_v21 }
 0x4e1   : > { %v3673_v35 = vsel %vm1746_vm4, %v3124_v44, %v3452_v25  ;;  %v3106_v25 = vld [vmem:[#allocation3 + $0x109] sm:$0xff] }
 0x4e2   : > { %v3128_v59 = vpack.c.bf16 %v3107_v3, %v3106_v25 }
 0x4e3   : > { %v3500_v30 = vpop.permute.xlu0 %3499 }
 0x4e4   : > { %v7955_v52 = vpop.permute.xlu1 %3371  ;;  %v3737_v2 = vsel %vm1746_vm4, %v2934_v47, %v3500_v30  ;;  %v3201_v47 = vld [vmem:[#allocation3 + $0x108] sm:$0xff]  ;;  %v3205_v30 = vld [vmem:[#allocation3 + $0x138] sm:$0xff] }
 0x4e5   : > { %4286 = vmatprep.mubr.bf16.mxu0 %v3737_v2  ;;  %v3224_v42 = vpack.c.bf16 %v3202_v51, %v3201_v47  ;;  %v3226_v44 = vpack.c.bf16 %v3206_v56, %v3205_v30  ;;  %v3577_v50 = vsel %vm1746_vm4, %v7818_v53, %v7955_v52  ;;  %v3286_v47 = vld [vmem:[#allocation3 + $0x82] sm:$0xff]  ;;  %v3289_v56 = vld [vmem:[#allocation3 + $0xaa] sm:$0xff] }
 0x4e6   : > { %4158 = vmatmul.mubr.bf16.gmra.mrb[104].mxu1 %v3561_v37  ;;  %4287 = vmatmul.mubr.bf16.gmra.mrb[120].mxu0 %v3673_v35  ;;  %v2925_v37 = vld [vmem:[#allocation3 + $0x170] sm:$0xff]  ;;  %v3291_v30 = vld [vmem:[#allocation3 + $0xc2] sm:$0xff] }
 0x4e7   : > { %v3420_v43 = vpop.permute.xlu0 %3419  ;;  %4165 = vmatprep.mubr.bf16.mxu1 %v3629_v8  ;;  %v3109_v35 = vld [vmem:[#allocation3 + $0x129] sm:$0xff]  ;;  %v3208_v8 = vld [vmem:[#allocation3 + $0x158] sm:$0xff]  ;;  %v2941_v52 = vpack.c.bf16 %v2925_v37, %v2924_v9 }
 0x4e8   : > { %v3454_v11 = vpop.permute.xlu1 %3453  ;;  %v3641_v46 = vsel %vm1746_vm4, %v7865_v58, %v3420_v43  ;;  %v3279_v43 = vld [vmem:[#allocation3 + $0x32] sm:$0xff]  ;;  %v3296_v9 = vld [vmem:[#allocation3 + $0xfa] sm:$0xff] }
 0x4e9   : > { %v3677_v33 = vsel %vm1746_vm4, %v3125_v63, %v3454_v11 }
 0x4eb   : > { %v3502_v61 = vpop.permute.xlu0 %3501 }
 0x4ec   : > { %v7964_v22 = vpop.permute.xlu1 %3373  ;;  %v3741_v10 = vsel %vm1746_vm4, %v3222_v17, %v3502_v61  ;;  %v3129_v17 = vpack.c.bf16 %v3109_v35, %v3108_v4  ;;  %v3227_v61 = vpack.c.bf16 %v3208_v8, %v3207_v5  ;;  %v3293_v35 = vld [vmem:[#allocation3 + $0xda] sm:$0xff]  ;;  %v3294_v8 = vld [vmem:[#allocation3 + $0xe2] sm:$0xff] }
 0x4ed   : > { %4294 = vmatprep.mubr.bf16.mxu0 %v3741_v10  ;;  %v3581_v63 = vsel %vm1746_vm4, %v2941_v52, %v7964_v22  ;;  %v3318_v4 = vpack.c.bf16 %v3294_v8, %v3293_v35  ;;  %v3299_v5 = vld [vmem:[#allocation3 + $0x122] sm:$0xff] }
 0x4ee   : > { %4166 = vmatmul.mubr.bf16.gmra.mrb[108].mxu1 %v3565_v60  ;;  %4295 = vmatmul.mubr.bf16.gmra.mrb[124].mxu0 %v3677_v33  ;;  %v3311_v60 = vpack.c.bf16 %v3280_v49, %v3279_v43 }
 0x4ef   : > { %v3422_v7 = vpop.permute.xlu0 %3421  ;;  %4173 = vmatprep.mubr.bf16.mxu1 %v3633_v15  ;;  %v3111_v15 = vld [vmem:[#allocation3 + $0x141] sm:$0xff] }
 0x4f0   : > { %v3456_v20 = vpop.permute.xlu1 %3455  ;;  %v3645_v2 = vsel %vm1746_vm4, %v7872_v0, %v3422_v7  ;;  %v3281_v7 = vld [vmem:[#allocation3 + $0x4a] sm:$0xff] }
 0x4f1   : > { %v3681_v6 = vsel %vm1746_vm4, %v3126_v38, %v3456_v20  ;;  %v3283_v20 = vld [vmem:[#allocation3 + $0x62] sm:$0xff]  ;;  %v3312_v22 = vpack.c.bf16 %v3282_v32, %v3281_v7 }
 0x4f3   : > { %v3504_v14 = vpop.permute.xlu0 %3503 }
 0x4f4   : > { %v3745_v18 = vsel %vm1746_vm4, %v3223_v62, %v3504_v14  ;;  %v3458_v36 = vpop.permute.xlu1 %3457  ;;  %v3284_v62 = vld [vmem:[#allocation3 + $0x6a] sm:$0xff]  ;;  %v3130_v14 = vpack.c.bf16 %v3111_v15, %v3110_v55  ;;  %v3303_v15 = vld [vmem:[#allocation3 + $0x152] sm:$0xff]  ;;  %v3310_v55 = vld [vmem:[#allocation3 + $0x1a2] sm:$0xff] }
 0x4f5   : > { %4302 = vmatprep.mubr.bf16.mxu0 %v3745_v18  ;;  %v3685_v29 = vsel %vm1746_vm4, %v3127_v24, %v3458_v36  ;;  %v3313_v51 = vpack.c.bf16 %v3284_v62, %v3283_v20 }
 0x4f6   : > { %4174 = vmatmul.mubr.bf16.gmra.mrb[112].mxu1 %v3569_v34  ;;  %4303 = vmatmul.mubr.bf16.gmra.mrb[128].mxu0 %v3681_v6  ;;  %v3113_v34 = vld [vmem:[#allocation3 + $0x159] sm:$0xff] }
 0x4f7   : > { %v3506_v40 = vpop.permute.xlu0 %3505  ;;  %4181 = vmatprep.mubr.bf16.mxu1 %v3637_v57  ;;  %v3285_v6 = vld [vmem:[#allocation3 + $0x7a] sm:$0xff]  ;;  %v3212_v57 = vld [vmem:[#allocation3 + $0x188] sm:$0xff] }
 0x4f8   : > { %v3749_v13 = vsel %vm1746_vm4, %v3224_v42, %v3506_v40  ;;  %v3460_v21 = vpop.permute.xlu1 %3459  ;;  %v3112_v40 = vld [vmem:[#allocation3 + $0x151] sm:$0xff]  ;;  %v3229_v24 = vpack.c.bf16 %v3212_v57, %v3211_v45 }
 0x4f9   : > { %4310 = vmatprep.mubr.bf16.mxu0 %v3749_v13  ;;  %v3689_v19 = vsel %vm1746_vm4, %v3128_v59, %v3460_v21  ;;  %v3287_v13 = vld [vmem:[#allocation3 + $0x92] sm:$0xff]  ;;  %v3131_v36 = vpack.c.bf16 %v3113_v34, %v3112_v40  ;;  %v3114_v59 = vld [vmem:[#allocation3 + $0x169] sm:$0xff] }
 0x4fa   : > { %v3290_v21 = vld [vmem:[#allocation3 + $0xb2] sm:$0xff] }
 0x4fb   : > { %v3508_v1 = vpop.permute.xlu0 %3507 }
 0x4fc   : > { %v3753_v16 = vsel %vm1746_vm4, %v3225_v39, %v3508_v1  ;;  %v3462_v11 = vpop.permute.xlu1 %3461  ;;  %v3314_v1 = vpack.c.bf16 %v3286_v47, %v3285_v6  ;;  %v3315_v39 = vpack.c.bf16 %v3288_v54, %v3287_v13 }
 0x4fd   : > { %v3693_v10 = vsel %vm1746_vm4, %v3129_v17, %v3462_v11  ;;  %v3295_v11 = vld [vmem:[#allocation3 + $0xf2] sm:$0xff] }
 0x4fe   : > { %4182 = vmatmul.mubr.bf16.gmra.mrb[116].mxu1 %v3573_v28  ;;  %4311 = vmatmul.mubr.bf16.gmra.mrb[132].mxu0 %v3685_v29  ;;  %v3213_v28 = vld [vmem:[#allocation3 + $0x198] sm:$0xff]  ;;  %v3214_v29 = vld [vmem:[#allocation3 + $0x1a0] sm:$0xff] }
 0x4ff   : > { %4318 = vmatprep.mubr.bf16.mxu0 %v3753_v16  ;;  %4189 = vmatprep.mubr.bf16.mxu1 %v3641_v46  ;;  %v3510_v23 = vpop.permute.xlu0 %3509  ;;  %v3115_v46 = vld [vmem:[#allocation3 + $0x171] sm:$0xff]  ;;  %v3230_v3 = vpack.c.bf16 %v3214_v29, %v3213_v28  ;;  %v8027_v28 = vld [vmem:[%s429_s19] ss:$0 sm:$0xff] }
 0x500   : > { %v3757_v58 = vsel %vm1746_vm4, %v3226_v44, %v3510_v23  ;;  %v3464_v26 = vpop.permute.xlu1 %3463  ;;  %v3292_v44 = vld [vmem:[#allocation3 + $0xca] sm:$0xff]  ;;  %v3298_v17 = vld [vmem:[#allocation3 + $0x112] sm:$0xff] }
 0x501   : > { %v3697_v38 = vsel %vm1746_vm4, %v3130_v14, %v3464_v26  ;;  %v3317_v37 = vpack.c.bf16 %v3292_v44, %v3291_v30  ;;  %v3309_v26 = vld [vmem:[#allocation3 + $0x19a] sm:$0xff] }
 0x502   : > { %v3326_v20 = vpack.c.bf16 %v3310_v55, %v3309_v26 }
 0x503   : > { %v3512_v53 = vpop.permute.xlu0 %3511 }
 0x504   : > { %v3761_v33 = vsel %vm1746_vm4, %v3227_v61, %v3512_v53  ;;  %v3466_v42 = vpop.permute.xlu1 %3465  ;;  %v3319_v53 = vpack.c.bf16 %v3296_v9, %v3295_v11  ;;  %v3300_v61 = vld [vmem:[#allocation3 + $0x12a] sm:$0xff] }
 0x505   : > { %v3701_v48 = vsel %vm1746_vm4, %v3131_v36, %v3466_v42 }
 0x506   : > { %4190 = vmatmul.mubr.bf16.gmra.mrb[120].mxu1 %v3577_v50  ;;  %4319 = vmatmul.mubr.bf16.gmra.mrb[136].mxu0 %v3689_v19  ;;  %v3132_v50 = vpack.c.bf16 %v3115_v46, %v3114_v59  ;;  %v3316_v19 = vpack.c.bf16 %v3290_v21, %v3289_v56 }
 0x507   : > { %4326 = vmatprep.mubr.bf16.mxu0 %v3757_v58  ;;  %4197 = vmatprep.mubr.bf16.mxu1 %v3645_v2  ;;  %v3514_v31 = vpop.permute.xlu0 %3513 }
 0x508   : > { %v3765_v18 = vsel %vm1746_vm4, %v2941_v52, %v3514_v31  ;;  %v3468_v23 = vpop.permute.xlu1 %3467  ;;  %v3297_v52 = vld [vmem:[#allocation3 + $0x10a] sm:$0xff] }
 0x509   : > { %v3705_v2 = vsel %vm1746_vm4, %v3132_v50, %v3468_v23 }
 0x50b   : > { %v3516_v27 = vpop.permute.xlu0 %3515 }
 0x50c   : > { %v3769_v16 = vsel %vm1746_vm4, %v3229_v24, %v3516_v27  ;;  %v3470_v43 = vpop.permute.xlu1 %3469 }
 0x50d   : > { %v3709_v49 = vsel %vm1746_vm4, %v7879_v12, %v3470_v43  ;;  %v3304_v12 = vld [vmem:[#allocation3 + $0x15a] sm:$0xff] }
 0x50e   : > { %4198 = vmatmul.mubr.bf16.gmra.mrb[124].mxu1 %v3581_v63  ;;  %4327 = vmatmul.mubr.bf16.gmra.mrb[140].mxu0 %v3693_v10  ;;  %v3320_v63 = vpack.c.bf16 %v3298_v17, %v3297_v52  ;;  %v3321_v10 = vpack.c.bf16 %v3300_v61, %v3299_v5  ;;  %v3323_v32 = vpack.c.bf16 %v3304_v12, %v3303_v15 }
 0x50f   : > { %4334 = vmatprep.mubr.bf16.mxu0 %v3761_v33  ;;  %5651 = vmatprep.mubr.msk.bf16.mxu1 %vm1746_vm4, %v3311_v60  ;;  %v3518_v25 = vpop.permute.xlu0 %3517  ;;  %v3301_v60 = vld [vmem:[#allocation3 + $0x13a] sm:$0xff]  ;;  %v3302_v33 = vld [vmem:[#allocation3 + $0x142] sm:$0xff] }
 0x510   : > { %v3773_v58 = vsel %vm1746_vm4, %v3230_v3, %v3518_v25  ;;  %v3322_v7 = vpack.c.bf16 %v3302_v33, %v3301_v60 }
 0x516   : > { %4335 = vmatmul.mubr.bf16.gmra.mrb[144].mxu0 %v3697_v38  ;;  %5652 = vmatmul.mubr.msk.bf16.vlgmr.msra.gmra.mrb[128].mxu1 %vm1746_vm4, %v3312_v22 }
 0x517   : > { %4342 = vmatprep.mubr.bf16.mxu0 %v3765_v18  ;;  %5655 = vmatprep.mubr.msk.bf16.mxu1 %vm1746_vm4, %v3313_v51 }
 0x51e   : > { %4343 = vmatmul.mubr.bf16.gmra.mrb[148].mxu0 %v3701_v48  ;;  %5656 = vmatmul.mubr.msk.bf16.gmra.mrb[132].mxu1 %vm1746_vm4, %v3314_v1 }
 0x51f   : > { %4350 = vmatprep.mubr.bf16.mxu0 %v3769_v16  ;;  %5659 = vmatprep.mubr.msk.bf16.mxu1 %vm1746_vm4, %v3315_v39 }
 0x526   : > { %4351 = vmatmul.mubr.bf16.gmra.mrb[152].mxu0 %v3705_v2  ;;  %5660 = vmatmul.mubr.msk.bf16.gmra.mrb[136].mxu1 %vm1746_vm4, %v3316_v19 }
 0x527   : > { %5663 = vmatprep.mubr.msk.bf16.mxu1 %vm1746_vm4, %v3317_v37  ;;  %4358 = vmatprep.mubr.bf16.mxu0 %v3773_v58 }
 0x52e   : > { %4359 = vmatmul.mubr.bf16.gmra.mrb[156].mxu0 %v3709_v49  ;;  %5664 = vmatmul.mubr.msk.bf16.gmra.mrb[140].mxu1 %vm1746_vm4, %v3318_v4 }
 0x52f   : > { %5667 = vmatprep.mubr.msk.bf16.mxu1 %vm1746_vm4, %v3319_v53 }
 0x536   : > { %5668 = vmatmul.mubr.msk.bf16.gmra.mrb[144].mxu1 %vm1746_vm4, %v3320_v63 }
 0x537   : > { %5671 = vmatprep.mubr.msk.bf16.mxu1 %vm1746_vm4, %v3321_v10 }
 0x53e   : > { %5672 = vmatmul.mubr.msk.bf16.gmra.mrb[148].mxu1 %vm1746_vm4, %v3322_v7 }
 0x53f   : > { %5675 = vmatprep.mubr.msk.bf16.mxu1 %vm1746_vm4, %v3323_v32 }
 0x546   : > { %5676 = vmatmul.mubr.msk.bf16.gmra.mrb[152].mxu1 %vm1746_vm4, %v7872_v0 }
 0x547   : > { %5679 = vmatprep.mubr.msk.bf16.mxu1 %vm1746_vm4, %v7883_v41 }
 0x54e   : > { %5680 = vmatmul.mubr.msk.bf16.gmra.mrb[156].mxu1 %vm1746_vm4, %v3326_v20 }
 0x569   : > { %v5337_v62 = vpop.f32.mrb[64].mxu1 }
 0x56a   : > { %v5338_v31 = vpop.f32.mrb[65].mxu1 }
 0x56b   : > { %v5339_v14 = vadd.f32 %v5338_v31, %v5337_v62  ;;  %v5340_v22 = vpop.f32.mrb[66].mxu1 }
 0x56c   : > { %v5341_v38 = vpop.f32.mrb[67].mxu1 }
 0x56d   : > { %v5342_v51 = vadd.f32 %v5341_v38, %v5340_v22  ;;  %v4080_v56 = vadd.f32 %v5339_v14, %v8027_v28 }
 0x56f   : > { %v4083_v50 = vadd.f32 %v5342_v51, %v8027_v28 }
 0x571   : > { %v5343_v18 = vpop.f32.mrb[68].mxu1 }
 0x572   : > { %v5344_v34 = vpop.f32.mrb[69].mxu1 }
 0x573   : > { %v5345_v6 = vadd.f32 %v5344_v34, %v5343_v18  ;;  %v5346_v47 = vpop.f32.mrb[70].mxu1 }
 0x574   : > { %v5347_v0 = vpop.f32.mrb[71].mxu1 }
 0x575   : > { %v5348_v57 = vadd.f32 %v5347_v0, %v5346_v47  ;;  %v4088_v9 = vadd.f32 %v5345_v6, %v8027_v28 }
 0x577   : > { %v4091_v61 = vadd.f32 %v5348_v57, %v8027_v28 }
 0x579   : > { %v5349_v42 = vpop.f32.mrb[72].mxu1 }
 0x57a   : > { %v5350_v41 = vpop.f32.mrb[73].mxu1 }
 0x57b   : > { %v5351_v40 = vadd.f32 %v5350_v41, %v5349_v42  ;;  %v5352_v13 = vpop.f32.mrb[74].mxu1 }
 0x57c   : > { %v5353_v54 = vpop.f32.mrb[75].mxu1 }
 0x57d   : > { %v5354_v27 = vadd.f32 %v5353_v54, %v5352_v13  ;;  %v4096_v26 = vadd.f32 %v5351_v40, %v8027_v28 }
 0x57f   : > { %v4099_v38 = vadd.f32 %v5354_v27, %v8027_v28 }
 0x581   : > { %v5355_v36 = vpop.f32.mrb[76].mxu1 }
 0x582   : > { %v5356_v45 = vpop.f32.mrb[77].mxu1 }
 0x583   : > { %v5357_v1 = vadd.f32 %v5356_v45, %v5355_v36  ;;  %v5358_v24 = vpop.f32.mrb[78].mxu1 }
 0x584   : > { %v5359_v48 = vpop.f32.mrb[79].mxu1 }
 0x585   : > { %v5360_v39 = vadd.f32 %v5359_v48, %v5358_v24  ;;  %v4104_v41 = vadd.f32 %v5357_v1, %v8027_v28 }
 0x587   : > { %v4107_v24 = vadd.f32 %v5360_v39, %v8027_v28 }
 0x589   : > { %v5361_v29 = vpop.f32.mrb[80].mxu1  ;;  %v5449_v16 = vpop.f32.mrb[96].mxu0 }
 0x58a   : > { %v5362_v46 = vpop.f32.mrb[81].mxu1  ;;  %v5450_v3 = vpop.f32.mrb[97].mxu0 }
 0x58b   : > { %v8030_v21 = vadd.f32 %v5362_v46, %v5361_v29  ;;  %v5451_v25 = vadd.f32 %v5450_v3, %v5449_v16  ;;  %v5364_v23 = vpop.f32.mrb[82].mxu1  ;;  %v5452_v59 = vpop.f32.mrb[98].mxu0 }
 0x58c   : > { %v5365_v30 = vpop.f32.mrb[83].mxu1  ;;  %v5453_v44 = vpop.f32.mrb[99].mxu0 }
 0x58d   : > { %v8033_v19 = vadd.f32 %v5365_v30, %v5364_v23  ;;  %v5454_v58 = vadd.f32 %v5453_v44, %v5452_v59  ;;  %v8035_v2 = vadd.f32 %v5451_v25, %v4080_v56  ;;  %v4112_v23 = vadd.f32 %v8030_v21, %v8027_v28 }
 0x58f   : > { %v8037_v37 = vadd.f32 %v5454_v58, %v4083_v50 }
 0x591   : > { %v5367_v35 = vpop.f32.mrb[84].mxu1  ;;  %v5455_v8 = vpop.f32.mrb[100].mxu0 }
 0x592   : > { %v5368_v43 = vpop.f32.mrb[85].mxu1  ;;  %v5456_v11 = vpop.f32.mrb[101].mxu0 }
 0x593   : > { %v8040_v4 = vadd.f32 %v5368_v43, %v5367_v35  ;;  %v5457_v49 = vadd.f32 %v5456_v11, %v5455_v8  ;;  %v5370_v53 = vpop.f32.mrb[86].mxu1  ;;  %v5458_v52 = vpop.f32.mrb[102].mxu0  ;;  %v4115_v35 = vadd.f32 %v8033_v19, %v8027_v28 }
 0x594   : > { %v5371_v17 = vpop.f32.mrb[87].mxu1  ;;  %v5459_v5 = vpop.f32.mrb[103].mxu0 }
 0x595   : > { %v8043_v63 = vadd.f32 %v5371_v17, %v5370_v53  ;;  %v5460_v10 = vadd.f32 %v5459_v5, %v5458_v52  ;;  %v8045_v60 = vadd.f32 %v5457_v49, %v4088_v9  ;;  %v4120_v17 = vadd.f32 %v8040_v4, %v8027_v28 }
 0x597   : > { %v8047_v33 = vadd.f32 %v5460_v10, %v4091_v61 }
 0x599   : > { %v5373_v15 = vpop.f32.mrb[88].mxu1  ;;  %v5461_v12 = vpop.f32.mrb[104].mxu0 }
 0x59a   : > { %v5374_v7 = vpop.f32.mrb[89].mxu1  ;;  %v5462_v32 = vpop.f32.mrb[105].mxu0 }
 0x59b   : > { %v8050_v55 = vadd.f32 %v5374_v7, %v5373_v15  ;;  %v5463_v20 = vadd.f32 %v5462_v32, %v5461_v12  ;;  %v5376_v62 = vpop.f32.mrb[90].mxu1  ;;  %v5464_v31 = vpop.f32.mrb[106].mxu0  ;;  %v4123_v7 = vadd.f32 %v8043_v63, %v8027_v28 }
 0x59c   : > { %v5377_v14 = vpop.f32.mrb[91].mxu1  ;;  %v5465_v22 = vpop.f32.mrb[107].mxu0 }
 0x59d   : > { %v8053_v51 = vadd.f32 %v5377_v14, %v5376_v62  ;;  %v5466_v18 = vadd.f32 %v5465_v22, %v5464_v31  ;;  %v8055_v34 = vadd.f32 %v5463_v20, %v4096_v26 }
 0x59f   : > { %v8057_v6 = vadd.f32 %v5466_v18, %v4099_v38  ;;  %v4128_v38 = vadd.f32 %v8050_v55, %v8027_v28 }
 0x5a1   : > { %v5379_v47 = vpop.f32.mrb[92].mxu1  ;;  %v5467_v0 = vpop.f32.mrb[108].mxu0 }
 0x5a2   : > { %v5380_v57 = vpop.f32.mrb[93].mxu1  ;;  %v5468_v42 = vpop.f32.mrb[109].mxu0 }
 0x5a3   : > { %v8060_v40 = vadd.f32 %v5380_v57, %v5379_v47  ;;  %v5469_v13 = vadd.f32 %v5468_v42, %v5467_v0  ;;  %v5382_v54 = vpop.f32.mrb[94].mxu1  ;;  %v5470_v36 = vpop.f32.mrb[110].mxu0 }
 0x5a4   : > { %v5383_v45 = vpop.f32.mrb[95].mxu1  ;;  %v5471_v27 = vpop.f32.mrb[111].mxu0 }
 0x5a5   : > { %v8063_v48 = vadd.f32 %v5383_v45, %v5382_v54  ;;  %v5472_v29 = vadd.f32 %v5471_v27, %v5470_v36  ;;  %v8065_v16 = vadd.f32 %v5469_v13, %v4104_v41  ;;  %v4131_v41 = vadd.f32 %v8053_v51, %v8027_v28 }
 0x5a7   : > { %v8067_v46 = vadd.f32 %v5472_v29, %v4107_v24 }
 0x5a9   : > { %v5385_v3 = vpop.f32.mrb[96].mxu1  ;;  %v5473_v56 = vpop.f32.mrb[112].mxu0 }
 0x5aa   : > { %v5386_v25 = vpop.f32.mrb[97].mxu1  ;;  %v5474_v1 = vpop.f32.mrb[113].mxu0 }
 0x5ab   : > { %v8071_v59 = vadd.f32 %v5386_v25, %v5385_v3  ;;  %v5475_v30 = vadd.f32 %v5474_v1, %v5473_v56  ;;  %v5388_v44 = vpop.f32.mrb[98].mxu1  ;;  %v5476_v50 = vpop.f32.mrb[114].mxu0  ;;  %v4136_v3 = vadd.f32 %v8060_v40, %v8027_v28 }
 0x5ac   : > { %v5389_v39 = vpop.f32.mrb[99].mxu1  ;;  %v5477_v58 = vpop.f32.mrb[115].mxu0 }
 0x5ad   : > { %v8075_v8 = vadd.f32 %v5389_v39, %v5388_v44  ;;  %v5478_v43 = vadd.f32 %v5477_v58, %v5476_v50  ;;  %v8077_v11 = vadd.f32 %v5475_v30, %v4112_v23  ;;  %v4139_v44 = vadd.f32 %v8063_v48, %v8027_v28 }
 0x5af   : > { %v8079_v9 = vadd.f32 %v5478_v43, %v4115_v35 }
 0x5b1   : > { %v5391_v49 = vpop.f32.mrb[100].mxu1  ;;  %v5479_v53 = vpop.f32.mrb[116].mxu0 }
 0x5b2   : > { %v5392_v21 = vpop.f32.mrb[101].mxu1  ;;  %v5480_v52 = vpop.f32.mrb[117].mxu0 }
 0x5b3   : > { %v8083_v5 = vadd.f32 %v5392_v21, %v5391_v49  ;;  %v5481_v61 = vadd.f32 %v5480_v52, %v5479_v53  ;;  %v5394_v10 = vpop.f32.mrb[102].mxu1  ;;  %v5482_v15 = vpop.f32.mrb[118].mxu0  ;;  %v4144_v21 = vadd.f32 %v8071_v59, %v8027_v28 }
 0x5b4   : > { %v5395_v19 = vpop.f32.mrb[103].mxu1  ;;  %v5483_v12 = vpop.f32.mrb[119].mxu0 }
 0x5b5   : > { %v8087_v32 = vadd.f32 %v5395_v19, %v5394_v10  ;;  %v5484_v26 = vadd.f32 %v5483_v12, %v5482_v15  ;;  %v8089_v20 = vadd.f32 %v5481_v61, %v4120_v17  ;;  %v4147_v19 = vadd.f32 %v8075_v8, %v8027_v28 }
 0x5b7   : > { %v8091_v62 = vadd.f32 %v5484_v26, %v4123_v7 }
 0x5b9   : > { %v5397_v31 = vpop.f32.mrb[104].mxu1  ;;  %v5485_v14 = vpop.f32.mrb[120].mxu0 }
 0x5ba   : > { %v5398_v4 = vpop.f32.mrb[105].mxu1  ;;  %v5486_v22 = vpop.f32.mrb[121].mxu0 }
 0x5bb   : > { %v8095_v18 = vadd.f32 %v5398_v4, %v5397_v31  ;;  %v5487_v47 = vadd.f32 %v5486_v22, %v5485_v14  ;;  %v5400_v0 = vpop.f32.mrb[106].mxu1  ;;  %v5488_v57 = vpop.f32.mrb[122].mxu0 }
 0x5bc   : > { %v5401_v63 = vpop.f32.mrb[107].mxu1  ;;  %v5489_v42 = vpop.f32.mrb[123].mxu0 }
 0x5bd   : > { %v8099_v13 = vadd.f32 %v5401_v63, %v5400_v0  ;;  %v5490_v54 = vadd.f32 %v5489_v42, %v5488_v57  ;;  %v8101_v36 = vadd.f32 %v5487_v47, %v4128_v38  ;;  %v4152_v38 = vadd.f32 %v8083_v5, %v8027_v28 }
 0x5bf   : > { %v8103_v45 = vadd.f32 %v5490_v54, %v4131_v41  ;;  %v4155_v41 = vadd.f32 %v8087_v32, %v8027_v28 }
 0x5c1   : > { %v5403_v27 = vpop.f32.mrb[108].mxu1  ;;  %v5491_v24 = vpop.f32.mrb[124].mxu0 }
 0x5c2   : > { %v5404_v55 = vpop.f32.mrb[109].mxu1  ;;  %v5492_v29 = vpop.f32.mrb[125].mxu0 }
 0x5c3   : > { %v8107_v56 = vadd.f32 %v5404_v55, %v5403_v27  ;;  %v5493_v25 = vadd.f32 %v5492_v29, %v5491_v24  ;;  %v5406_v1 = vpop.f32.mrb[110].mxu1  ;;  %v5494_v23 = vpop.f32.mrb[126].mxu0 }
 0x5c4   : > { %v5407_v51 = vpop.f32.mrb[111].mxu1  ;;  %v5495_v30 = vpop.f32.mrb[127].mxu0 }
 0x5c5   : > { %v8111_v50 = vadd.f32 %v5407_v51, %v5406_v1  ;;  %v5496_v39 = vadd.f32 %v5495_v30, %v5494_v23  ;;  %v8113_v58 = vadd.f32 %v5493_v25, %v4136_v3  ;;  %v4160_v1 = vadd.f32 %v8095_v18, %v8027_v28 }
 0x5c7   : > { %v8115_v35 = vadd.f32 %v5496_v39, %v4139_v44 }
 0x5c9   : > { %v5409_v43 = vpop.f32.mrb[112].mxu1  ;;  %v5497_v49 = vpop.f32.mrb[128].mxu0 }
 0x5ca   : > { %v5410_v40 = vpop.f32.mrb[113].mxu1  ;;  %v5498_v53 = vpop.f32.mrb[129].mxu0 }
 0x5cb   : > { %v8119_v52 = vadd.f32 %v5410_v40, %v5409_v43  ;;  %v5499_v17 = vadd.f32 %v5498_v53, %v5497_v49  ;;  %v5412_v61 = vpop.f32.mrb[114].mxu1  ;;  %v5500_v10 = vpop.f32.mrb[130].mxu0  ;;  %v4163_v43 = vadd.f32 %v8099_v13, %v8027_v28 }
 0x5cc   : > { %v5413_v48 = vpop.f32.mrb[115].mxu1  ;;  %v5501_v15 = vpop.f32.mrb[131].mxu0 }
 0x5cd   : > { %v8123_v12 = vadd.f32 %v5413_v48, %v5412_v61  ;;  %v5502_v7 = vadd.f32 %v5501_v15, %v5500_v10  ;;  %v8125_v26 = vadd.f32 %v5499_v17, %v4144_v21  ;;  %v4168_v48 = vadd.f32 %v8107_v56, %v8027_v28  ;;  %v4530_v56 = vld [vmem:[#allocation2 + $0x31] sm:$0xff] }
 0x5cf   : > { %v8127_v31 = vadd.f32 %v5502_v7, %v4147_v19 }
 0x5d1   : > { %v5415_v14 = vpop.f32.mrb[116].mxu1  ;;  %v5503_v4 = vpop.f32.mrb[132].mxu0 }
 0x5d2   : > { %v5416_v59 = vpop.f32.mrb[117].mxu1  ;;  %v5504_v22 = vpop.f32.mrb[133].mxu0 }
 0x5d3   : > { %v8131_v47 = vadd.f32 %v5416_v59, %v5415_v14  ;;  %v5505_v0 = vadd.f32 %v5504_v22, %v5503_v4  ;;  %v5418_v57 = vpop.f32.mrb[118].mxu1  ;;  %v5506_v63 = vpop.f32.mrb[134].mxu0  ;;  %v4171_v59 = vadd.f32 %v8111_v50, %v8027_v28 }
 0x5d4   : > { %v5419_v8 = vpop.f32.mrb[119].mxu1  ;;  %v5507_v42 = vpop.f32.mrb[135].mxu0 }
 0x5d5   : > { %v8135_v54 = vadd.f32 %v5419_v8, %v5418_v57  ;;  %v5508_v27 = vadd.f32 %v5507_v42, %v5506_v63  ;;  %v8137_v24 = vadd.f32 %v5505_v0, %v4152_v38 }
 0x5d7   : > { %v8139_v55 = vadd.f32 %v5508_v27, %v4155_v41 }
 0x5d9   : > { %v5421_v29 = vpop.f32.mrb[120].mxu1  ;;  %v5509_v3 = vpop.f32.mrb[136].mxu0 }
 0x5da   : > { %v5422_v5 = vpop.f32.mrb[121].mxu1  ;;  %v5510_v25 = vpop.f32.mrb[137].mxu0 }
 0x5db   : > { %v8143_v23 = vadd.f32 %v5422_v5, %v5421_v29  ;;  %v5511_v51 = vadd.f32 %v5510_v25, %v5509_v3  ;;  %v5424_v30 = vpop.f32.mrb[122].mxu1  ;;  %v5512_v44 = vpop.f32.mrb[138].mxu0  ;;  %v4528_v29 = vld [vmem:[#allocation2 + $0x19] sm:$0xff]  ;;  %v4176_v3 = vadd.f32 %v8119_v52, %v8027_v28 }
 0x5dc   : > { %v5425_v32 = vpop.f32.mrb[123].mxu1  ;;  %v5513_v39 = vpop.f32.mrb[139].mxu0 }
 0x5dd   : > { %v8147_v49 = vadd.f32 %v5425_v32, %v5424_v30  ;;  %v5514_v40 = vadd.f32 %v5513_v39, %v5512_v44  ;;  %v8149_v53 = vadd.f32 %v5511_v51, %v4160_v1  ;;  %v4531_v51 = vld [vmem:[#allocation2 + $0x39] sm:$0xff]  ;;  %v4179_v30 = vadd.f32 %v8123_v12, %v8027_v28 }
 0x5df   : > { %v8151_v21 = vadd.f32 %v5514_v40, %v4163_v43  ;;  %v4529_v43 = vld [vmem:[#allocation2 + $0x21] sm:$0xff] }
 0x5e1   : > { %v5427_v17 = vpop.f32.mrb[124].mxu1  ;;  %v5515_v61 = vpop.f32.mrb[140].mxu0 }
 0x5e2   : > { %v5428_v18 = vpop.f32.mrb[125].mxu1  ;;  %v5516_v10 = vpop.f32.mrb[141].mxu0 }
 0x5e3   : > { %v8155_v15 = vadd.f32 %v5428_v18, %v5427_v17  ;;  %v5517_v19 = vadd.f32 %v5516_v10, %v5515_v61  ;;  %v5430_v7 = vpop.f32.mrb[126].mxu1  ;;  %v5518_v14 = vpop.f32.mrb[142].mxu0 }
 0x5e4   : > { %v5431_v13 = vpop.f32.mrb[127].mxu1  ;;  %v5519_v4 = vpop.f32.mrb[143].mxu0 }
 0x5e5   : > { %v8159_v22 = vadd.f32 %v5431_v13, %v5430_v7  ;;  %v5520_v38 = vadd.f32 %v5519_v4, %v5518_v14  ;;  %v8161_v0 = vadd.f32 %v5517_v19, %v4168_v48  ;;  %v4534_v48 = vld [vmem:[#allocation2 + $0x61] sm:$0xff]  ;;  %v4532_v14 = vld [vmem:[#allocation2 + $0x49] sm:$0xff]  ;;  %v4184_v13 = vadd.f32 %v8131_v47, %v8027_v28 }
 0x5e7   : > { %v8163_v57 = vadd.f32 %v5520_v38, %v4171_v59 }
 0x5e9   : > { %v5521_v63 = vpop.f32.mrb[144].mxu0  ;;  %v5653_v8 = vpop.f32.mrb[128].mxu1 }
 0x5ea   : > { %v4410_v42 = vadd.f32 %v5653_v8, %v8045_v60  ;;  %v5522_v41 = vpop.f32.mrb[145].mxu0  ;;  %v4401_v27 = vpop.f32.mrb[129].mxu1  ;;  %v4535_v8 = vld [vmem:[#allocation2 + $0x69] sm:$0xff] }
 0x5eb   : > { %v5523_v5 = vadd.f32 %v5522_v41, %v5521_v63  ;;  %v4402_v50 = vadd.f32 %v4401_v27, %v8035_v2  ;;  %v5524_v25 = vpop.f32.mrb[146].mxu0  ;;  %v5654_v1 = vpop.f32.mrb[130].mxu1 }
 0x5ec   : > { %v4562_v44 = vadd.f32 %v4530_v56, %v4410_v42  ;;  %v4413_v32 = vadd.f32 %v5654_v1, %v8047_v33  ;;  %v5525_v39 = vpop.f32.mrb[147].mxu0  ;;  %v4404_v60 = vpop.f32.mrb[131].mxu1  ;;  %v4187_v56 = vadd.f32 %v8135_v54, %v8027_v28 }
 0x5ed   : > { %v4560_v40 = vadd.f32 %v4528_v29, %v4402_v50  ;;  %v5526_v17 = vadd.f32 %v5525_v39, %v5524_v25  ;;  %v4405_v61 = vadd.f32 %v4404_v60, %v8037_v37  ;;  %v8173_v52 = vadd.f32 %v5523_v5, %v4176_v3  ;;  %v4533_v29 = vld [vmem:[#allocation2 + $0x51] sm:$0xff] }
 0x5ee   : > { %4594 = vst.msk [vmem:[#allocation2 + $0x31] sm:$0xff] %vm1746_vm4, %v4562_v44  ;;  %v4563_v2 = vadd.f32 %v4531_v51, %v4413_v32  ;;  %v4538_v51 = vld [vmem:[#allocation2 + $0x91] sm:$0xff]  ;;  %v4536_v32 = vld [vmem:[#allocation2 + $0x79] sm:$0xff]  ;;  %v4192_v39 = vadd.f32 %v8143_v23, %v8027_v28 }
 0x5ef   : > { %4592 = vst.msk [vmem:[#allocation2 + $0x19] sm:$0xff] %vm1746_vm4, %v4560_v40  ;;  %v4561_v18 = vadd.f32 %v4529_v43, %v4405_v61  ;;  %v8177_v10 = vadd.f32 %v5526_v17, %v4179_v30  ;;  %v4539_v61 = vld [vmem:[#allocation2 + $0x99] sm:$0xff] }
 0x5f0   : > { %4595 = vst.msk [vmem:[#allocation2 + $0x39] sm:$0xff] %vm1746_vm4, %v4563_v2  ;;  %v4195_v2 = vadd.f32 %v8147_v49, %v8027_v28 }
 0x5f1   : > { %4593 = vst.msk [vmem:[#allocation2 + $0x21] sm:$0xff] %vm1746_vm4, %v4561_v18  ;;  %v5527_v33 = vpop.f32.mrb[148].mxu0  ;;  %v5657_v12 = vpop.f32.mrb[132].mxu1 }
 0x5f2   : > { %v4426_v19 = vadd.f32 %v5657_v12, %v8065_v16  ;;  %v5528_v37 = vpop.f32.mrb[149].mxu0  ;;  %v4417_v7 = vpop.f32.mrb[133].mxu1 }
 0x5f3   : > { %v5529_v4 = vadd.f32 %v5528_v37, %v5527_v33  ;;  %v4418_v59 = vadd.f32 %v4417_v7, %v8055_v34  ;;  %v5530_v38 = vpop.f32.mrb[150].mxu0  ;;  %v5658_v63 = vpop.f32.mrb[134].mxu1 }
 0x5f4   : > { %v4566_v42 = vadd.f32 %v4534_v48, %v4426_v19  ;;  %v4429_v41 = vadd.f32 %v5658_v63, %v8067_v46  ;;  %v5531_v27 = vpop.f32.mrb[151].mxu0  ;;  %v4420_v16 = vpop.f32.mrb[135].mxu1  ;;  %v4537_v48 = vld [vmem:[#allocation2 + $0x81] sm:$0xff]  ;;  %v4540_v63 = vld [vmem:[#allocation2 + $0xa9] sm:$0xff] }
 0x5f5   : > { %v4564_v3 = vadd.f32 %v4532_v14, %v4418_v59  ;;  %v5532_v5 = vadd.f32 %v5531_v27, %v5530_v38  ;;  %v4421_v50 = vadd.f32 %v4420_v16, %v8057_v6  ;;  %v8189_v47 = vadd.f32 %v5529_v4, %v4184_v13  ;;  %v4542_v4 = vld [vmem:[#allocation2 + $0xc1] sm:$0xff]  ;;  %v4543_v16 = vld [vmem:[#allocation2 + $0xc9] sm:$0xff] }
 0x5f6   : > { %4598 = vst.msk [vmem:[#allocation2 + $0x61] sm:$0xff] %vm1746_vm4, %v4566_v42  ;;  %v4567_v34 = vadd.f32 %v4535_v8, %v4429_v41  ;;  %v4200_v8 = vadd.f32 %v8155_v15, %v8027_v28 }
 0x5f7   : > { %4596 = vst.msk [vmem:[#allocation2 + $0x49] sm:$0xff] %vm1746_vm4, %v4564_v3  ;;  %v4565_v25 = vadd.f32 %v4533_v29, %v4421_v50  ;;  %v8193_v1 = vadd.f32 %v5532_v5, %v4187_v56  ;;  %v4203_v29 = vadd.f32 %v8159_v22, %v8027_v28 }
 0x5f8   : > { %4599 = vst.msk [vmem:[#allocation2 + $0x69] sm:$0xff] %vm1746_vm4, %v4567_v34  ;;  %v4541_v34 = vld [vmem:[#allocation2 + $0xb1] sm:$0xff] }
 0x5f9   : > { %4597 = vst.msk [vmem:[#allocation2 + $0x51] sm:$0xff] %vm1746_vm4, %v4565_v25  ;;  %v5533_v46 = vpop.f32.mrb[152].mxu0  ;;  %v5661_v54 = vpop.f32.mrb[136].mxu1 }
 0x5fa   : > { %v4442_v30 = vadd.f32 %v5661_v54, %v8089_v20  ;;  %v5534_v6 = vpop.f32.mrb[153].mxu0  ;;  %v4433_v44 = vpop.f32.mrb[137].mxu1 }
 0x5fb   : > { %v5535_v60 = vadd.f32 %v5534_v6, %v5533_v46  ;;  %v4434_v43 = vadd.f32 %v4433_v44, %v8077_v11  ;;  %v5536_v40 = vpop.f32.mrb[154].mxu0  ;;  %v5662_v17 = vpop.f32.mrb[138].mxu1 }
 0x5fc   : > { %v4570_v18 = vadd.f32 %v4538_v51, %v4442_v30  ;;  %v4445_v33 = vadd.f32 %v5662_v17, %v8091_v62  ;;  %v5537_v12 = vpop.f32.mrb[155].mxu0  ;;  %v4436_v20 = vpop.f32.mrb[139].mxu1  ;;  %v4545_v17 = vld [vmem:[#allocation2 + $0xe1] sm:$0xff] }
 0x5fd   : > { %v4568_v19 = vadd.f32 %v4536_v32, %v4434_v43  ;;  %v5538_v37 = vadd.f32 %v5537_v12, %v5536_v40  ;;  %v4437_v7 = vadd.f32 %v4436_v20, %v8079_v9  ;;  %v8205_v23 = vadd.f32 %v5535_v60, %v4192_v39  ;;  %v4547_v39 = vld [vmem:[#allocation2 + $0xf9] sm:$0xff]  ;;  %v4548_v20 = vld [vmem:[#allocation2 + $0x109] sm:$0xff] }
 0x5fe   : > { %4602 = vst.msk [vmem:[#allocation2 + $0x91] sm:$0xff] %vm1746_vm4, %v4570_v18  ;;  %v4571_v11 = vadd.f32 %v4539_v61, %v4445_v33  ;;  %v4550_v33 = vld [vmem:[#allocation2 + $0x121] sm:$0xff] }
 0x5ff   : > { %4600 = vst.msk [vmem:[#allocation2 + $0x79] sm:$0xff] %vm1746_vm4, %v4568_v19  ;;  %v4569_v14 = vadd.f32 %v4537_v48, %v4437_v7  ;;  %v8209_v13 = vadd.f32 %v5538_v37, %v4195_v2 }
 0x600   : > { %4603 = vst.msk [vmem:[#allocation2 + $0x99] sm:$0xff] %vm1746_vm4, %v4571_v11 }
 0x601   : > { %4601 = vst.msk [vmem:[#allocation2 + $0x81] sm:$0xff] %vm1746_vm4, %v4569_v14  ;;  %v5539_v62 = vpop.f32.mrb[156].mxu0  ;;  %v5665_v49 = vpop.f32.mrb[140].mxu1  ;;  %v4549_v14 = vld [vmem:[#allocation2 + $0x111] sm:$0xff] }
 0x602   : > { %v4458_v59 = vadd.f32 %v5665_v49, %v8113_v58  ;;  %v5540_v9 = vpop.f32.mrb[157].mxu0  ;;  %v4449_v38 = vpop.f32.mrb[141].mxu1 }
 0x603   : > { %v5541_v56 = vadd.f32 %v5540_v9, %v5539_v62  ;;  %v4450_v42 = vadd.f32 %v4449_v38, %v8101_v36  ;;  %v5542_v41 = vpop.f32.mrb[158].mxu0  ;;  %v5666_v27 = vpop.f32.mrb[142].mxu1  ;;  %v4552_v38 = vld [vmem:[#allocation2 + $0x139] sm:$0xff] }
 0x604   : > { %v4574_v3 = vadd.f32 %v4542_v4, %v4458_v59  ;;  %v4461_v5 = vadd.f32 %v5666_v27, %v8115_v35  ;;  %v5543_v50 = vpop.f32.mrb[159].mxu0  ;;  %v4452_v58 = vpop.f32.mrb[143].mxu1  ;;  %v4546_v35 = vld [vmem:[#allocation2 + $0xf1] sm:$0xff]  ;;  %v4553_v27 = vld [vmem:[#allocation2 + $0x141] sm:$0xff] }
 0x605   : > { %v4572_v25 = vadd.f32 %v4540_v63, %v4450_v42  ;;  %v5544_v46 = vadd.f32 %v5543_v50, %v5542_v41  ;;  %v4453_v54 = vadd.f32 %v4452_v58, %v8103_v45  ;;  %v8221_v15 = vadd.f32 %v5541_v56, %v4200_v8  ;;  %v4544_v45 = vld [vmem:[#allocation2 + $0xd9] sm:$0xff]  ;;  %v4554_v59 = vld [vmem:[#allocation2 + $0x151] sm:$0xff]  ;;  %v4556_v58 = vld [vmem:[#allocation2 + $0x169] sm:$0xff] }
 0x606   : > { %4606 = vst.msk [vmem:[#allocation2 + $0xc1] sm:$0xff] %vm1746_vm4, %v4574_v3  ;;  %v4575_v36 = vadd.f32 %v4543_v16, %v4461_v5  ;;  %v4558_v5 = vld [vmem:[#allocation2 + $0x181] sm:$0xff] }
 0x607   : > { %4604 = vst.msk [vmem:[#allocation2 + $0xa9] sm:$0xff] %vm1746_vm4, %v4572_v25  ;;  %v4573_v51 = vadd.f32 %v4541_v34, %v4453_v54  ;;  %v8225_v30 = vadd.f32 %v5544_v46, %v4203_v29 }
 0x608   : > { %4607 = vst.msk [vmem:[#allocation2 + $0xc9] sm:$0xff] %vm1746_vm4, %v4575_v36 }
 0x609   : > { %4605 = vst.msk [vmem:[#allocation2 + $0xb1] sm:$0xff] %vm1746_vm4, %v4573_v51  ;;  %v5669_v28 = vpop.f32.mrb[144].mxu1  ;;  %v4557_v51 = vld [vmem:[#allocation2 + $0x171] sm:$0xff] }
 0x60a   : > { %v4474_v22 = vadd.f32 %v5669_v28, %v8137_v24  ;;  %v4465_v6 = vpop.f32.mrb[145].mxu1 }
 0x60b   : > { %v4466_v44 = vadd.f32 %v4465_v6, %v8125_v26  ;;  %v5670_v32 = vpop.f32.mrb[146].mxu1  ;;  %v4631_v6 = vld [vmem:[#allocation2 + $0x39] sm:$0xff] (!%p5050_p6) }
 0x60c   : > { %v4578_v60 = vadd.f32 %v4546_v35, %v4474_v22  ;;  %v4477_v43 = vadd.f32 %v5670_v32, %v8139_v55  ;;  %v4468_v40 = vpop.f32.mrb[147].mxu1  ;;  %4663 = vst.msk [vmem:[%s6744_s6 + $0x18] sm:$0xff] (!%p5050_p6), %vm1746_vm4, %v4631_v6  ;;  %v4634_v32 = vld [vmem:[#allocation2 + $0x61] sm:$0xff] (!%p5050_p6) }
 0x60d   : > { %v4576_v61 = vadd.f32 %v4544_v45, %v4466_v44  ;;  %v4469_v2 = vadd.f32 %v4468_v40, %v8127_v31  ;;  %v4551_v31 = vld [vmem:[#allocation2 + $0x129] sm:$0xff]  ;;  %v4633_v44 = vld [vmem:[#allocation2 + $0x51] sm:$0xff] (!%p5050_p6)  ;;  %4666 = vst.msk [vmem:[%s6744_s6 + $0x30] sm:$0xff] (!%p5050_p6), %vm1746_vm4, %v4634_v32 }
 0x60e   : > { %4610 = vst.msk [vmem:[#allocation2 + $0xf1] sm:$0xff] %vm1746_vm4, %v4578_v60  ;;  %v4579_v18 = vadd.f32 %v4547_v39, %v4477_v43  ;;  %v4632_v45 = vld [vmem:[#allocation2 + $0x49] sm:$0xff] (!%p5050_p6)  ;;  %4665 = vst.msk [vmem:[%s6744_s6 + $0x28] sm:$0xff] (!%p5050_p6), %vm1746_vm4, %v4633_v44  ;;  %v4636_v60 = vld [vmem:[#allocation2 + $0x79] sm:$0xff] (!%p5050_p6) }
 0x60f   : > { %4608 = vst.msk [vmem:[#allocation2 + $0xd9] sm:$0xff] %vm1746_vm4, %v4576_v61  ;;  %v4577_v24 = vadd.f32 %v4545_v17, %v4469_v2  ;;  %4664 = vst.msk [vmem:[%s6744_s6 + $0x20] sm:$0xff] (!%p5050_p6), %vm1746_vm4, %v4632_v45  ;;  %v4635_v39 = vld [vmem:[#allocation2 + $0x69] sm:$0xff] (!%p5050_p6)  ;;  %v4637_v43 = vld [vmem:[#allocation2 + $0x81] sm:$0xff] (!%p5050_p6) }
 0x610   : > { %4611 = vst.msk [vmem:[#allocation2 + $0xf9] sm:$0xff] %vm1746_vm4, %v4579_v18  ;;  %4667 = vst.msk [vmem:[%s6744_s6 + $0x38] sm:$0xff] (!%p5050_p6), %vm1746_vm4, %v4635_v39  ;;  %v4638_v40 = vld [vmem:[#allocation2 + $0x91] sm:$0xff] (!%p5050_p6)  ;;  %v4639_v17 = vld [vmem:[#allocation2 + $0x99] sm:$0xff] (!%p5050_p6) }
 0x611   : > { %4609 = vst.msk [vmem:[#allocation2 + $0xe1] sm:$0xff] %vm1746_vm4, %v4577_v24  ;;  %v5673_v26 = vpop.f32.mrb[148].mxu1  ;;  %4668 = vst.msk [vmem:[%s6744_s6 + $0x40] sm:$0xff] (!%p5050_p6), %vm1746_vm4, %v4636_v60  ;;  %v4640_v61 = vld [vmem:[#allocation2 + $0xa9] sm:$0xff] (!%p5050_p6)  ;;  %v4641_v2 = vld [vmem:[#allocation2 + $0xb1] sm:$0xff] (!%p5050_p6) }
 0x612   : > { %v4490_v12 = vadd.f32 %v5673_v26, %v8161_v0  ;;  %v4481_v55 = vpop.f32.mrb[149].mxu1  ;;  %4669 = vst.msk [vmem:[%s6744_s6 + $0x48] sm:$0xff] (!%p5050_p6), %vm1746_vm4, %v4637_v43  ;;  %4670 = vst.msk [vmem:[%s6744_s6 + $0x50] sm:$0xff] (!%p5050_p6), %vm1746_vm4, %v4638_v40  ;;  %v4642_v18 = vld [vmem:[#allocation2 + $0xc1] sm:$0xff] (!%p5050_p6)  ;;  %v4643_v24 = vld [vmem:[#allocation2 + $0xc9] sm:$0xff] (!%p5050_p6) }
 0x613   : > { %v4482_v48 = vadd.f32 %v4481_v55, %v8149_v53  ;;  %v5674_v19 = vpop.f32.mrb[150].mxu1  ;;  %4671 = vst.msk [vmem:[%s6744_s6 + $0x58] sm:$0xff] (!%p5050_p6), %vm1746_vm4, %v4639_v17  ;;  %4672 = vst.msk [vmem:[%s6744_s6 + $0x60] sm:$0xff] (!%p5050_p6), %vm1746_vm4, %v4640_v61 }
 0x614   : > { %v4582_v37 = vadd.f32 %v4550_v33, %v4490_v12  ;;  %v4493_v7 = vadd.f32 %v5674_v19, %v8163_v57  ;;  %v4484_v11 = vpop.f32.mrb[151].mxu1  ;;  %4673 = vst.msk [vmem:[%s6744_s6 + $0x68] sm:$0xff] (!%p5050_p6), %vm1746_vm4, %v4641_v2  ;;  %4674 = vst.msk [vmem:[%s6744_s6 + $0x70] sm:$0xff] (!%p5050_p6), %vm1746_vm4, %v4642_v18 }
 0x615   : > { %v4580_v62 = vadd.f32 %v4548_v20, %v4482_v48  ;;  %v4485_v49 = vadd.f32 %v4484_v11, %v8151_v21  ;;  %v4555_v21 = vld [vmem:[#allocation2 + $0x159] sm:$0xff]  ;;  %4675 = vst.msk [vmem:[%s6744_s6 + $0x78] sm:$0xff] (!%p5050_p6), %vm1746_vm4, %v4643_v24  ;;  %v4646_v12 = vld [vmem:[#allocation2 + $0xf1] sm:$0xff] (!%p5050_p6) }
 0x616   : > { %4614 = vst.msk [vmem:[#allocation2 + $0x121] sm:$0xff] %vm1746_vm4, %v4582_v37  ;;  %v4583_v4 = vadd.f32 %v4551_v31, %v4493_v7  ;;  %v4644_v26 = vld [vmem:[#allocation2 + $0xd9] sm:$0xff] (!%p5050_p6)  ;;  %4678 = vst.msk [vmem:[%s6744_s6 + $0x90] sm:$0xff] (!%p5050_p6), %vm1746_vm4, %v4646_v12 }
 0x617   : > { %4612 = vst.msk [vmem:[#allocation2 + $0x109] sm:$0xff] %vm1746_vm4, %v4580_v62  ;;  %v4581_v0 = vadd.f32 %v4549_v14, %v4485_v49  ;;  %4676 = vst.msk [vmem:[%s6744_s6 + $0x80] sm:$0xff] (!%p5050_p6), %vm1746_vm4, %v4644_v26  ;;  %v4647_v55 = vld [vmem:[#allocation2 + $0xf9] sm:$0xff] (!%p5050_p6) }
 0x618   : > { %4615 = vst.msk [vmem:[#allocation2 + $0x129] sm:$0xff] %vm1746_vm4, %v4583_v4  ;;  %v4645_v33 = vld [vmem:[#allocation2 + $0xe1] sm:$0xff] (!%p5050_p6)  ;;  %4679 = vst.msk [vmem:[%s6744_s6 + $0x98] sm:$0xff] (!%p5050_p6), %vm1746_vm4, %v4647_v55 }
 0x619   : > { %4613 = vst.msk [vmem:[#allocation2 + $0x111] sm:$0xff] %vm1746_vm4, %v4581_v0  ;;  %v5677_v53 = vpop.f32.mrb[152].mxu1  ;;  %4677 = vst.msk [vmem:[%s6744_s6 + $0x88] sm:$0xff] (!%p5050_p6), %vm1746_vm4, %v4645_v33 }
 0x61a   : > { %v4506_v9 = vadd.f32 %v5677_v53, %v8189_v47  ;;  %v4497_v57 = vpop.f32.mrb[153].mxu1 }
 0x61b   : > { %v4498_v63 = vadd.f32 %v4497_v57, %v8173_v52  ;;  %v5678_v8 = vpop.f32.mrb[154].mxu1 }
 0x61c   : > { %v4586_v56 = vadd.f32 %v4554_v59, %v4506_v9  ;;  %v4509_v42 = vadd.f32 %v5678_v8, %v8193_v1  ;;  %v4500_v41 = vpop.f32.mrb[155].mxu1 }
 0x61d   : > { %v4584_v16 = vadd.f32 %v4552_v38, %v4498_v63  ;;  %v4501_v29 = vadd.f32 %v4500_v41, %v8177_v10  ;;  %v4559_v10 = vld [vmem:[#allocation2 + $0x189] sm:$0xff]  ;;  %v4650_v19 = vld [vmem:[#allocation2 + $0x121] sm:$0xff] (!%p5050_p6) }
 0x61e   : > { %4618 = vst.msk [vmem:[#allocation2 + $0x151] sm:$0xff] %vm1746_vm4, %v4586_v56  ;;  %v4587_v3 = vadd.f32 %v4555_v21, %v4509_v42  ;;  %v4648_v20 = vld [vmem:[#allocation2 + $0x109] sm:$0xff] (!%p5050_p6)  ;;  %4682 = vst.msk [vmem:[%s6744_s6 + $0xb0] sm:$0xff] (!%p5050_p6), %vm1746_vm4, %v4650_v19 }
 0x61f   : > { %4616 = vst.msk [vmem:[#allocation2 + $0x139] sm:$0xff] %vm1746_vm4, %v4584_v16  ;;  %v4585_v47 = vadd.f32 %v4553_v27, %v4501_v29  ;;  %4680 = vst.msk [vmem:[%s6744_s6 + $0xa0] sm:$0xff] (!%p5050_p6), %vm1746_vm4, %v4648_v20  ;;  %v4651_v31 = vld [vmem:[#allocation2 + $0x129] sm:$0xff] (!%p5050_p6) }
 0x620   : > { %4619 = vst.msk [vmem:[#allocation2 + $0x159] sm:$0xff] %vm1746_vm4, %v4587_v3  ;;  %v4649_v48 = vld [vmem:[#allocation2 + $0x111] sm:$0xff] (!%p5050_p6)  ;;  %4683 = vst.msk [vmem:[%s6744_s6 + $0xb8] sm:$0xff] (!%p5050_p6), %vm1746_vm4, %v4651_v31 }
 0x621   : > { %4617 = vst.msk [vmem:[#allocation2 + $0x141] sm:$0xff] %vm1746_vm4, %v4585_v47  ;;  %v5681_v52 = vpop.f32.mrb[156].mxu1  ;;  %4681 = vst.msk [vmem:[%s6744_s6 + $0xa8] sm:$0xff] (!%p5050_p6), %vm1746_vm4, %v4649_v48 }
 0x622   : > { %v4522_v50 = vadd.f32 %v5681_v52, %v8221_v15  ;;  %v4513_v1 = vpop.f32.mrb[157].mxu1 }
 0x623   : > { %v4514_v34 = vadd.f32 %v4513_v1, %v8205_v23  ;;  %v5682_v25 = vpop.f32.mrb[158].mxu1  ;;  %4627 = sbr.rel (%p5050_p6) target bundleno = 1586 (0x632), region = 84  ;;  %v4628_v23 = vld [vmem:[#allocation2 + $0x19] sm:$0xff] (!%p5050_p6) }
 0x624   : > { %v4590_v46 = vadd.f32 %v4558_v5, %v4522_v50  ;;  %v4525_v54 = vadd.f32 %v5682_v25, %v8225_v30  ;;  %v4516_v36 = vpop.f32.mrb[159].mxu1  ;;  %v4630_v30 = vld [vmem:[#allocation2 + $0x31] sm:$0xff] (!%p5050_p6)  ;;  %4660 = vst.msk [vmem:[%s6744_s6] sm:$0xff] (!%p5050_p6), %vm1746_vm4, %v4628_v23 }
 0x625   : > { %v4588_v28 = vadd.f32 %v4556_v58, %v4514_v34  ;;  %v4517_v35 = vadd.f32 %v4516_v36, %v8209_v13  ;;  %v4629_v13 = vld [vmem:[#allocation2 + $0x21] sm:$0xff] (!%p5050_p6)  ;;  %4662 = vst.msk [vmem:[%s6744_s6 + $0x10] sm:$0xff] (!%p5050_p6), %vm1746_vm4, %v4630_v30  ;;  %v4654_v11 = vld [vmem:[#allocation2 + $0x151] sm:$0xff] (!%p5050_p6) }
 0x626   : > { %4622 = vst.msk [vmem:[#allocation2 + $0x181] sm:$0xff] %vm1746_vm4, %v4590_v46  ;;  %v4591_v22 = vadd.f32 %v4559_v10, %v4525_v54  ;;  %4661 = vst.msk [vmem:[%s6744_s6 + $0x8] sm:$0xff] (!%p5050_p6), %vm1746_vm4, %v4629_v13  ;;  %v4652_v37 = vld [vmem:[#allocation2 + $0x139] sm:$0xff] (!%p5050_p6) }
 0x627   : > { %4620 = vst.msk [vmem:[#allocation2 + $0x169] sm:$0xff] %vm1746_vm4, %v4588_v28  ;;  %v4589_v15 = vadd.f32 %v4557_v51, %v4517_v35  ;;  %4684 = vst.msk [vmem:[%s6744_s6 + $0xc0] sm:$0xff] (!%p5050_p6), %vm1746_vm4, %v4652_v37  ;;  %v4655_v14 = vld [vmem:[#allocation2 + $0x159] sm:$0xff] (!%p5050_p6) }
 0x628   : > { %4623 = vst.msk [vmem:[#allocation2 + $0x189] sm:$0xff] %vm1746_vm4, %v4591_v22  ;;  %v4653_v7 = vld [vmem:[#allocation2 + $0x141] sm:$0xff] (!%p5050_p6)  ;;  %4686 = vst.msk [vmem:[%s6744_s6 + $0xd0] sm:$0xff] (!%p5050_p6), %vm1746_vm4, %v4654_v11 }
 0x629   : > { %4621 = vst.msk [vmem:[#allocation2 + $0x171] sm:$0xff] %vm1746_vm4, %v4589_v15  ;;  %4685 = vst.msk [vmem:[%s6744_s6 + $0xc8] sm:$0xff] (!%p5050_p6), %vm1746_vm4, %v4653_v7 }
 0x62a   : > { %4687 = vst.msk [vmem:[%s6744_s6 + $0xd8] sm:$0xff] %vm1746_vm4, %v4655_v14 }
 0x62d   : > { %v4658_v4 = vld [vmem:[#allocation2 + $0x181] sm:$0xff] }
 0x62e   : > { %v4656_v62 = vld [vmem:[#allocation2 + $0x169] sm:$0xff]  ;;  %4690 = vst.msk [vmem:[%s6744_s6 + $0xf0] sm:$0xff] %vm1746_vm4, %v4658_v4 }
 0x62f   : > { %4688 = vst.msk [vmem:[%s6744_s6 + $0xe0] sm:$0xff] %vm1746_vm4, %v4656_v62  ;;  %v4659_v0 = vld [vmem:[#allocation2 + $0x189] sm:$0xff] }
 0x630   : > { %v4657_v49 = vld [vmem:[#allocation2 + $0x171] sm:$0xff]  ;;  %4691 = vst.msk [vmem:[%s6744_s6 + $0xf8] sm:$0xff] %vm1746_vm4, %v4659_v0 }
 0x631   : > { %4689 = vst.msk [vmem:[%s6744_s6 + $0xe8] sm:$0xff] %vm1746_vm4, %v4657_v49 }
 0x632 PF: > { %s8498_s15 = sld [smem:[#allocation26_spill]]  ;;  %s8499_s25 = sld [smem:[#allocation39_spill]] }
 0x633   : > { %s4706_s20 = sshll.u32 %s6744_s6, 4  ;;  %s4693_s2 = scalar_lea.sflag [#allocation6], %s6710_s0  ;;  %s8333_s20 = int_to_ptr.vmem [resolvable:$true] %s4706_s20 }
 0x634   : > { %s6142_s30 = scalar_lea.vmem %s8333_s20, 4096  ;;  %p8501_p10 = scmp.ne.s32.totalorder %s8478_s8, 0 }
 0x635   : > { %p6143_p3 = scmp.ne.s32.totalorder %s8333_s20, %s6142_s30  ;;  %s6289_s26 = smov [#allocation16]  }
 0x636   : > { %s6146_s22 = sshll.u32 %s6289_s26, 4  ;;  %s6147_s22 = int_to_ptr.vmem [resolvable:$false] %s6146_s22 }
 0x637   : > { %p6144_p11 = pnand %p6143_p3, %p8501_p10  ;;  %s6148_s7 = scalar_lea.vmem %s6147_s22, 8192 }
 0x638   : > { %s5057_s5 = sshll.u32 %s8498_s15, 12  ;;  %s8500_s13 = smov %s8499_s25 }
 0x639   : > { %s8330_s14 = scalar_lea.hbm %s8499_s25, %s5057_s5  ;;  %p6145_p7 = pneg %p6144_p11 }
 0x63a   : > { %p6149_p2 = scmp.lt.s32.totalorder %s8333_s20, %s6147_s22  ;;  %p6150_p0 = scmp.lt.s32.totalorder %s6148_s7, %s6142_s30 }
 0x63c   : > { %p6151_p4 = por %p6150_p0, %p6149_p2 }
 0x63e   : > { %p6152_p9 = pnand %p6151_p4, %p6145_p7 }
 0x640   : > { %6155 = shalt.err (!%p6152_p9)
}
 0x641   : > { %s6156_s21 = scalar_lea.hbm %s8330_s14, 4096  ;;  %s6160_s6 = scalar_lea.hbm %s8500_s13, 8192 }
 0x642   : > { %p6157_p1 = scmp.ne.s32.totalorder %s8330_s14, %s6156_s21  ;;  %p6161_p13 = scmp.lt.u32.totalorder %s8330_s14, %s8500_s13 }
 0x643   : > { %p6162_p5 = scmp.lt.u32.totalorder %s6160_s6, %s6156_s21  ;;  %p6164_p3 = scmp.lt.u32.totalorder %s6156_s21, %s8330_s14 }
 0x644   : > { %p6158_p12 = pnand %p6157_p1, %p8501_p10 }
 0x645   : > { %p6163_p6 = por %p6162_p5, %p6161_p13 }
 0x646   : > { %p6159_p8 = pneg %p6158_p12 }
 0x647   : > { %p6165_p11 = por %p6164_p3, %p6163_p6 }
 0x649   : > { %p6166_p7 = pnand %p6165_p11, %p6159_p8 }
 0x64b   : > { %6169 = shalt.err (!%p6166_p7)
}
 0x64c   : > { %s6290_s23 = smov 128   ;;  %s6291_s15 = smov 8  }
 0x64d   : > { %5714 = dma.vmem_to_hbm [thread:$0]  (%p8501_p10), %s8333_s20, 4096, %s8330_s14, %s4693_s2, %s6290_s23, %s6290_s23, %s6291_s15  }
 0x64e PF: > { %s8502_s5 = sld [smem:[#allocation24_spill]]  ;;  %s8503_s24 = sld [smem:[#allocation29_spill]] }
 0x64f   : > { %p5748_p2 = scmp.ge.s32.totalorder %s6276_s11, 2 }
 0x654   : > { %s4721_s27 = sand.u32 1, %s8502_s5   ;;  %p8504_p0 = scmp.ne.s32.totalorder %s8503_s24, 0 }
 0x655   : > { %s4722_s25 = scalar_lea.sflag [#allocation6], %s4721_s27 }
 0x656   : > { %p5740_p4 = pnand %p5748_p2, %p8504_p0 }
 0x658   : > { %6231 = dma.done.wait (!%p5740_p4), %s4722_s25, 4096  }
 0x659   : > { %6233 = vsyncadd (!%p5740_p4), %s4722_s25, 4294963200  ;;  %s30_s11 = sadd.s32 1, %s6276_s11   ;;  %s8505_s24 = sld [smem:[#allocation22_spill]] }
 0x65a   : > { %p27_p9 = scmp.ge.s32.totalorder %s30_s11, 12   ;;  %s8506_s25 = sld [smem:[#allocation23_spill]] }
 0x65b   : > { %s8507_s26 = sld [smem:[#allocation32_spill]]  ;;  %s8508_s0 = sld [smem:[#allocation31_spill]] }
 0x65c   : > { %s8509_s27 = smov %s6252_s28  ;;  %s8510_s28 = smov %s6256_s29 }
 0x65d   : > { %s8511_s29 = smov %s6628_s3  ;;  %s8512_s30 = smov %s6268_s9 }
 0x65e   : > { %s8513_s8 = smov %s6272_s10  ;;  %s8515_s10 = smov %s8521_s18 }
 0x65f   :  { %29 = sbr.rel (!%p27_p9) target bundleno = 22 (0x16), region = 165 }
 0x661   : > { %s8514_s9 = smov %s8508_s0 }
 0x666   :  { %4727 = vsyncpa [#allocation5], 1 }
 0x667   :  { %4729 = vsyncpa [#allocation5 + $0x1], 1 }
 0x668   :  { %4730 = vsyncpa [#allocation8], 1 }
 0x669   :  { %4731 = vsyncpa [#allocation11], 1 }
 0x66a   :  { %4733 = vsyncpa [#allocation11 + $0x1], 1 }
 0x66b   :  { %4734 = vsyncpa [#allocation14], 1 }
 0x66c   :  { %4736 = vsyncpa [#allocation14 + $0x1], 1 }
 0x66d   :  { %4737 = vsyncpa [#allocation6], 1 }
 0x66e   :  { %4739 = vsyncpa [#allocation6 + $0x1], 1 }

</bundles_post_ra>
